<compile_context>
chip_gen: v6e
topology: v6e:2x2x1
jax: 0.10.0
libtpu: 0.0.40
codegen_flags: <defaults>
</compile_context>

<pallas_src>
import functools

import jax
import jax.numpy as jnp
from jax.experimental import pallas as pl
from jax.experimental.pallas import tpu as pltpu

LN_EPS = 1e-5


def _round_up(n: int, m: int) -> int:
    return ((n + m - 1) // m) * m


def mlp_resnet_block_kernel(x_ref, gamma_ref, beta_ref,
                            w1_ref, b1_ref, w2_ref, b2_ref, o_ref,
                            *, inv_features: float):
    # Fused hot path: layernorm -> dense1 -> relu -> dense2 -> residual add.
    x = x_ref[...].astype(jnp.float32)                       # [bm, Fp]

    # --- LayerNorm (single reduction pass: sum and sum-of-squares together) ---
    # Padded feature lanes of x are zero, so they contribute nothing to the sums;
    # divide by the *true* feature count (inv_features).
    s = jnp.sum(x, axis=-1, keepdims=True)
    s2 = jnp.sum(x * x, axis=-1, keepdims=True)
    mean = s * inv_features
    var = jnp.maximum(s2 * inv_features - mean * mean, 0.0)
    xn = (x - mean) * jax.lax.rsqrt(var + LN_EPS)
    # gamma/beta are zero-padded on the padded lanes -> xn is exactly 0 there.
    xn = xn * gamma_ref[...] + beta_ref[...]                  # [bm, Fp], f32

    # --- dense1 (F -> 4F) + ReLU: bf16 MXU operands, f32 accumulation ---
    h = jnp.dot(xn.astype(jnp.bfloat16), w1_ref[...],
                preferred_element_type=jnp.float32) + b1_ref[...]
    h = jnp.maximum(h, 0.0)                                   # ReLU in f32 (VPU)

    # --- dense2 (4F -> F): bf16 MXU operands, f32 accumulation ---
    y = jnp.dot(h.astype(jnp.bfloat16), w2_ref[...],
                preferred_element_type=jnp.float32) + b2_ref[...]

    # Residual add uses the pre-LN f32 x (residual Linear not needed: shapes match).
    o_ref[...] = (x + y).astype(o_ref.dtype)


def mlp_resnet_block(x, gamma, beta, w1, b1, w2, b2, *, block_m=256):
    """Fused MLPResNetBlock forward.

    x: [B, F] float32; w1: [F, 4F]; w2: [4F, F]; gamma/beta/b*: 1-D.
    Arbitrary B and F are supported (padded internally to TPU-friendly tiles).
    """
    B, F = x.shape
    H = w1.shape[1]

    # Lane-dense padding: feature / hidden dims to multiples of 128 lanes.
    Fp = _round_up(F, 128)
    Hp = _round_up(H, 128)

    # Row tiling: cap block_m at the (rounded-up) batch, keep it a multiple of 8.
    block_m = max(8, min(_round_up(block_m, 8), _round_up(B, 8)))
    Bp = _round_up(B, block_m)
    grid_m = Bp // block_m

    f32 = jnp.float32
    bf16 = jnp.bfloat16

    # Zero-pad inputs. Padded lanes/rows produce zeros (or discarded rows) by
    # construction because gamma/beta/biases/weights are zero-padded.
    xp = jnp.pad(x, ((0, Bp - B), (0, Fp - F)))
    gamma_p = jnp.pad(gamma.astype(f32), (0, Fp - F)).reshape(1, Fp)
    beta_p = jnp.pad(beta.astype(f32), (0, Fp - F)).reshape(1, Fp)
    # Weights in bf16 for the MXU (halves weight HBM/VMEM traffic); biases stay f32.
    w1_p = jnp.pad(w1, ((0, Fp - F), (0, Hp - H))).astype(bf16)
    b1_p = jnp.pad(b1.astype(f32), (0, Hp - H)).reshape(1, Hp)
    w2_p = jnp.pad(w2, ((0, Hp - H), (0, Fp - F))).astype(bf16)
    b2_p = jnp.pad(b2.astype(f32), (0, Fp - F)).reshape(1, Fp)

    # VMEM budget estimate (double-buffered x/out tiles, resident weights,
    # hidden intermediates) with headroom; capped so it is safe on every chip
    # (<= 64 MiB keeps v7x's smaller physical VMEM happy).
    est = (2 * block_m * Fp * 4            # x tiles (double-buffered)
           + 2 * block_m * Fp * 4          # out tiles (double-buffered)
           + 2 * (Fp * Hp + Hp * Fp) * 2   # bf16 weights (double-buffered)
           + 2 * (2 * Fp + Hp + Fp) * 4    # gamma/beta/b1/b2
           + 4 * block_m * Hp * 4)         # hidden activation + spill headroom
    vmem_limit = int(min(max(2 * est, 32 * 1024 * 1024), 64 * 1024 * 1024))

    # Advisory cost estimate for XLA's scheduler.
    flops = 2 * Bp * Fp * Hp + 2 * Bp * Hp * Fp
    bytes_accessed = (xp.size * 4 + Bp * Fp * 4          # x in, out
                      + w1_p.size * 2 + w2_p.size * 2    # bf16 weights
                      + (gamma_p.size + beta_p.size + b1_p.size + b2_p.size) * 4)
    cost = pl.CostEstimate(flops=int(flops),
                           transcendentals=int(Bp),       # one rsqrt per row
                           bytes_accessed=int(bytes_accessed))

    kernel = functools.partial(mlp_resnet_block_kernel, inv_features=1.0 / F)

    # NOTE: the weight/bias/gamma/beta BlockSpecs have constant index maps, so
    # Pallas does not re-DMA them across grid steps (only the 2x buffer
    # allocation remains). For very large F (>~1024) additionally tile the
    # hidden dim H with an 'arbitrary' reduction axis + f32 accumulator scratch
    # to bound the (block_m x 4F) intermediate and fit v7x's 64 MiB VMEM.
    out_padded = pl.pallas_call(
        kernel,
        out_shape=jax.ShapeDtypeStruct((Bp, Fp), x.dtype),
        grid_spec=pltpu.PrefetchScalarGridSpec(
            num_scalar_prefetch=0,
            grid=(grid_m,),
            in_specs=[
                pl.BlockSpec((block_m, Fp), lambda i: (i, 0)),   # x tile
                pl.BlockSpec((1, Fp), lambda i: (0, 0)),          # gamma
                pl.BlockSpec((1, Fp), lambda i: (0, 0)),          # beta
                pl.BlockSpec((Fp, Hp), lambda i: (0, 0)),         # w1 (bf16)
                pl.BlockSpec((1, Hp), lambda i: (0, 0)),          # b1
                pl.BlockSpec((Hp, Fp), lambda i: (0, 0)),         # w2 (bf16)
                pl.BlockSpec((1, Fp), lambda i: (0, 0)),          # b2
            ],
            out_specs=pl.BlockSpec((block_m, Fp), lambda i: (i, 0)),
        ),
        compiler_params=pltpu.CompilerParams(
            dimension_semantics=("parallel",),
            vmem_limit_bytes=vmem_limit,
        ),
        cost_estimate=cost,
    )(xp, gamma_p, beta_p, w1_p, b1_p, w2_p, b2_p)

    return out_padded[:B, :F]


def reference(x, gamma, beta, w1, b1, w2, b2):
    xf = x.astype(jnp.float32)
    mean = jnp.mean(xf, axis=-1, keepdims=True)
    var = jnp.mean((xf - mean) ** 2, axis=-1, keepdims=True)
    xn = (xf - mean) / jnp.sqrt(var + LN_EPS) * gamma + beta
    h = jnp.maximum(xn @ w1 + b1, 0.0)
    y = h @ w2 + b2
    return (xf + y).astype(x.dtype)


if __name__ == "__main__":
    # Small demo shapes that still exercise: batch remainder padding (384 -> 512),
    # feature lane padding (160 -> 256), bf16 MXU path, and a 2-step parallel grid.
    B, F = 384, 160
    H = 4 * F

    key = jax.random.PRNGKey(0)
    kx, kg, kb, k1, k2, k3, k4 = jax.random.split(key, 7)

    x = jax.random.normal(kx, (B, F), dtype=jnp.float32)

    # Deterministic parameter init (synthetic; mimics Linear fan-in scaling).
    gamma = 1.0 + 0.1 * jax.random.normal(kg, (F,), dtype=jnp.float32)
    beta = 0.1 * jax.random.normal(kb, (F,), dtype=jnp.float32)
    w1 = jax.random.normal(k1, (F, H), dtype=jnp.float32) * (1.0 / jnp.sqrt(F))
    b1 = jax.random.normal(k2, (H,), dtype=jnp.float32) * 0.01
    w2 = jax.random.normal(k3, (H, F), dtype=jnp.float32) * (1.0 / jnp.sqrt(H))
    b2 = jax.random.normal(k4, (F,), dtype=jnp.float32) * 0.01
    # TODO(synk): self.residual Linear is unused in forward when in/out features
    # match (always true for this block), so it is omitted; dropout is identity
    # in eval mode (train=False).

    out = mlp_resnet_block(x, gamma, beta, w1, b1, w2, b2, block_m=256)
    out = jax.block_until_ready(out)

    ref = reference(x, gamma, beta, w1, b1, w2, b2)
    assert out.shape == (B, F)
    # Relaxed tolerance vs. the f32 reference: MXU operands are bf16 (f32 accum).
    assert jnp.allclose(out, ref, atol=3e-2, rtol=3e-2), (
        "mismatch vs reference, max abs err = "
        f"{float(jnp.max(jnp.abs(out - ref)))}")
    print("KERNEL_OK")
</pallas_src>

<mosaic_0001>
module attributes {stable_mosaic.version = 11 : i64} {
  func.func @mlp_resnet_block_kernel(%arg0: i32, %arg1: memref<256x256xf32, #tpu.memory_space<vmem>>, %arg2: memref<1x256xf32, #tpu.memory_space<vmem>>, %arg3: memref<1x256xf32, #tpu.memory_space<vmem>>, %arg4: memref<256x640xbf16, #tpu.memory_space<vmem>>, %arg5: memref<1x640xf32, #tpu.memory_space<vmem>>, %arg6: memref<640x256xbf16, #tpu.memory_space<vmem>>, %arg7: memref<1x256xf32, #tpu.memory_space<vmem>>, %arg8: memref<256x256xf32, #tpu.memory_space<vmem>>) attributes {dimension_semantics = [#tpu.dimension_semantics<parallel>], iteration_bounds = array<i64: 2>, scalar_prefetch = 0 : i64, scratch_operands = 0 : i64, tpu.core_type = #tpu.core_type<tc>, window_params = [{transform_indices = @transform_0, window_bounds = array<i64: 256, 256>}, {pipeline_mode = #tpu.pipeline_mode<synchronous>, transform_indices = @transform_1, window_bounds = array<i64: 1, 256>}, {pipeline_mode = #tpu.pipeline_mode<synchronous>, transform_indices = @transform_2, window_bounds = array<i64: 1, 256>}, {pipeline_mode = #tpu.pipeline_mode<synchronous>, transform_indices = @transform_3, window_bounds = array<i64: 256, 640>}, {pipeline_mode = #tpu.pipeline_mode<synchronous>, transform_indices = @transform_4, window_bounds = array<i64: 1, 640>}, {pipeline_mode = #tpu.pipeline_mode<synchronous>, transform_indices = @transform_5, window_bounds = array<i64: 640, 256>}, {pipeline_mode = #tpu.pipeline_mode<synchronous>, transform_indices = @transform_6, window_bounds = array<i64: 1, 256>}, {transform_indices = @transform_7, window_bounds = array<i64: 256, 256>}]} {
    %c0 = arith.constant 0 : index
    %c0_0 = arith.constant 0 : index
    %0 = vector.load %arg1[%c0, %c0_0] : memref<256x256xf32, #tpu.memory_space<vmem>>, vector<256x256xf32>
    %cst = arith.constant dense<0.000000e+00> : vector<256xf32>
    %1 = vector.multi_reduction <add>, %0, %cst [1] : vector<256x256xf32> to vector<256xf32>
    %2 = vector.shape_cast %1 : vector<256xf32> to vector<256x1xf32>
    %3 = arith.mulf %0, %0 : vector<256x256xf32>
    %cst_1 = arith.constant dense<0.000000e+00> : vector<256xf32>
    %4 = vector.multi_reduction <add>, %3, %cst_1 [1] : vector<256x256xf32> to vector<256xf32>
    %5 = vector.shape_cast %4 : vector<256xf32> to vector<256x1xf32>
    %cst_2 = arith.constant 6.250000e-03 : f32
    %6 = vector.broadcast %cst_2 : f32 to vector<256x1xf32>
    %7 = arith.mulf %2, %6 : vector<256x1xf32>
    %cst_3 = arith.constant 6.250000e-03 : f32
    %8 = vector.broadcast %cst_3 : f32 to vector<256x1xf32>
    %9 = arith.mulf %5, %8 : vector<256x1xf32>
    %10 = arith.mulf %7, %7 : vector<256x1xf32>
    %11 = arith.subf %9, %10 : vector<256x1xf32>
    %cst_4 = arith.constant 0.000000e+00 : f32
    %12 = vector.broadcast %cst_4 : f32 to vector<256x1xf32>
    %13 = arith.maximumf %11, %12 : vector<256x1xf32>
    %14 = vector.broadcast %7 : vector<256x1xf32> to vector<256x256xf32>
    %15 = arith.subf %0, %14 : vector<256x256xf32>
    %cst_5 = arith.constant 9.99999974E-6 : f32
    %16 = vector.broadcast %cst_5 : f32 to vector<256x1xf32>
    %17 = arith.addf %13, %16 : vector<256x1xf32>
    %18 = math.rsqrt %17 : vector<256x1xf32>
    %19 = vector.broadcast %18 : vector<256x1xf32> to vector<256x256xf32>
    %20 = arith.mulf %15, %19 : vector<256x256xf32>
    %c0_6 = arith.constant 0 : index
    %c0_7 = arith.constant 0 : index
    %21 = vector.load %arg2[%c0_6, %c0_7] : memref<1x256xf32, #tpu.memory_space<vmem>>, vector<1x256xf32>
    %22 = vector.broadcast %21 : vector<1x256xf32> to vector<256x256xf32>
    %23 = arith.mulf %20, %22 : vector<256x256xf32>
    %c0_8 = arith.constant 0 : index
    %c0_9 = arith.constant 0 : index
    %24 = vector.load %arg3[%c0_8, %c0_9] : memref<1x256xf32, #tpu.memory_space<vmem>>, vector<1x256xf32>
    %25 = vector.broadcast %24 : vector<1x256xf32> to vector<256x256xf32>
    %26 = arith.addf %23, %25 : vector<256x256xf32>
    %27 = arith.truncf %26 : vector<256x256xf32> to vector<256x256xbf16>
    %c0_10 = arith.constant 0 : index
    %c0_11 = arith.constant 0 : index
    %28 = vector.load %arg4[%c0_10, %c0_11] : memref<256x640xbf16, #tpu.memory_space<vmem>>, vector<256x640xbf16>
    %cst_12 = arith.constant dense<0.000000e+00> : vector<256x640xf32>
    %29 = tpu.matmul %27, %28, %cst_12 {dimension_numbers = #tpu.dot_dimension_numbers<[1], [0], [0], [1], [0, 0, 1, 1], [], []>} : vector<256x256xbf16>, vector<256x640xbf16>, vector<256x640xf32> -> vector<256x640xf32>
    %c0_13 = arith.constant 0 : index
    %c0_14 = arith.constant 0 : index
    %30 = vector.load %arg5[%c0_13, %c0_14] : memref<1x640xf32, #tpu.memory_space<vmem>>, vector<1x640xf32>
    %31 = vector.broadcast %30 : vector<1x640xf32> to vector<256x640xf32>
    %32 = arith.addf %29, %31 : vector<256x640xf32>
    %cst_15 = arith.constant 0.000000e+00 : f32
    %33 = vector.broadcast %cst_15 : f32 to vector<256x640xf32>
    %34 = arith.maximumf %32, %33 : vector<256x640xf32>
    %35 = arith.truncf %34 : vector<256x640xf32> to vector<256x640xbf16>
    %c0_16 = arith.constant 0 : index
    %c0_17 = arith.constant 0 : index
    %36 = vector.load %arg6[%c0_16, %c0_17] : memref<640x256xbf16, #tpu.memory_space<vmem>>, vector<640x256xbf16>
    %cst_18 = arith.constant dense<0.000000e+00> : vector<256x256xf32>
    %37 = tpu.matmul %35, %36, %cst_18 {dimension_numbers = #tpu.dot_dimension_numbers<[1], [0], [0], [1], [0, 0, 1, 1], [], []>} : vector<256x640xbf16>, vector<640x256xbf16>, vector<256x256xf32> -> vector<256x256xf32>
    %c0_19 = arith.constant 0 : index
    %c0_20 = arith.constant 0 : index
    %38 = vector.load %arg7[%c0_19, %c0_20] : memref<1x256xf32, #tpu.memory_space<vmem>>, vector<1x256xf32>
    %39 = vector.broadcast %38 : vector<1x256xf32> to vector<256x256xf32>
    %40 = arith.addf %37, %39 : vector<256x256xf32>
    %41 = arith.addf %0, %40 : vector<256x256xf32>
    %c0_21 = arith.constant 0 : index
    %c0_22 = arith.constant 0 : index
    %42 = vector.load %arg8[%c0_21, %c0_22] : memref<256x256xf32, #tpu.memory_space<vmem>>, vector<256x256xf32>
    tpu.vector_store %arg8[%c0_21, %c0_22], %41 {strides = array<i32>} : memref<256x256xf32, #tpu.memory_space<vmem>>, vector<256x256xf32>,
    return
  }
  func.func @transform_0(%arg0: i32) -> (i32, i32) {
    %c0_i32 = arith.constant 0 : i32
    %c0_i32_0 = arith.constant 0 : i32
    return %arg0, %c0_i32 : i32, i32
  }
  func.func @transform_1(%arg0: i32) -> (i32, i32) {
    %c0_i32 = arith.constant 0 : i32
    %c0_i32_0 = arith.constant 0 : i32
    %c0_i32_1 = arith.constant 0 : i32
    return %c0_i32, %c0_i32_0 : i32, i32
  }
  func.func @transform_2(%arg0: i32) -> (i32, i32) {
    %c0_i32 = arith.constant 0 : i32
    %c0_i32_0 = arith.constant 0 : i32
    %c0_i32_1 = arith.constant 0 : i32
    return %c0_i32, %c0_i32_0 : i32, i32
  }
  func.func @transform_3(%arg0: i32) -> (i32, i32) {
    %c0_i32 = arith.constant 0 : i32
    %c0_i32_0 = arith.constant 0 : i32
    %c0_i32_1 = arith.constant 0 : i32
    return %c0_i32, %c0_i32_0 : i32, i32
  }
  func.func @transform_4(%arg0: i32) -> (i32, i32) {
    %c0_i32 = arith.constant 0 : i32
    %c0_i32_0 = arith.constant 0 : i32
    %c0_i32_1 = arith.constant 0 : i32
    return %c0_i32, %c0_i32_0 : i32, i32
  }
  func.func @transform_5(%arg0: i32) -> (i32, i32) {
    %c0_i32 = arith.constant 0 : i32
    %c0_i32_0 = arith.constant 0 : i32
    %c0_i32_1 = arith.constant 0 : i32
    return %c0_i32, %c0_i32_0 : i32, i32
  }
  func.func @transform_6(%arg0: i32) -> (i32, i32) {
    %c0_i32 = arith.constant 0 : i32
    %c0_i32_0 = arith.constant 0 : i32
    %c0_i32_1 = arith.constant 0 : i32
    return %c0_i32, %c0_i32_0 : i32, i32
  }
  func.func @transform_7(%arg0: i32) -> (i32, i32) {
    %c0_i32 = arith.constant 0 : i32
    %c0_i32_0 = arith.constant 0 : i32
    return %arg0, %c0_i32 : i32, i32
  }
}

</mosaic_0001>

<bundles_post_ra>
// kernel: tpu_custom_call.1
= control target key start
LH: loop header
LB: loop body
LE: loop exit
PB: predicated region body
PF: predicated region fallthrough
CT: control target
= control target key end

     0   :  { %s6772_s0 = inlined_call_operand.hbm [shape: f32[512,256], index: 0, kind: input, shape index: {}]   ;;  %s6773_s1 = inlined_call_operand.hbm [shape: f32[1,256], index: 1, kind: input, shape index: {}]   ;;  %s6774_s2 = inlined_call_operand.vmem [shape: f32[1,256], index: 2, kind: input, shape index: {}]   ;;  %s6775_s3 = inlined_call_operand.hbm [shape: bf16[256,640], index: 3, kind: input, shape index: {}]   ;;  %s6776_s4 = inlined_call_operand.vmem [shape: f32[1,640], index: 4, kind: input, shape index: {}]   ;;  %s6777_s5 = inlined_call_operand.hbm [shape: bf16[640,256], index: 5, kind: input, shape index: {}]   ;;  %s6778_s6 = inlined_call_operand.vmem [shape: f32[1,256], index: 6, kind: input, shape index: {}]   ;;  %s6779_s7 = inlined_call_operand.hbm [shape: f32[512,256], index: 7, kind: output, shape index: {}]  }
   0x1   :  { %6790 = sst [smem:[#allocation62_spill]] %s6773_s1 }
   0x2   :  { %12 = vsyncpa [#allocation3], 0 }
   0x3   :  { %14 = vsyncpa [#allocation3 + $0x1], 0 }
   0x4   :  { %15 = vsyncpa [#allocation6], 0 }
   0x5   :  { %16 = vsyncpa [#allocation9], 0 }
   0x6   :  { %17 = vsyncpa [#allocation4], 0 }
   0x7   :  { %19 = vsyncpa [#allocation4 + $0x1], 0  ;;  %s4883_s24 = smov 0   ;;  %s4885_s25 = smov 0  }
   0x8   :  { %s4887_s26 = smov 0   ;;  %s4889_s27 = smov 0  }
   0x9 LB: > { %s4904_s28 = sadd.s32 4294967295, %s4827_s27   ;;  %s3841_s29 = sadd.s32 4294967294, %s4827_s27   ;;  %s4827_s27 = sphi %s4889_s27, %s6921_s27   ;;  %s4823_s26 = sphi %s4887_s26, %s6920_s26   ;;  %s4819_s25 = sphi %s4885_s25, %s6919_s25   ;;  %s4815_s24 = sphi %s4883_s24, %s6918_s24  }
   0xa   : > { %p45_p0 = scmp.ne.s32.totalorder %s4819_s25, %s4815_s24  ;;  %p6780_p1 = scmp.eq.s32.totalorder %s4904_s28, 0 }
   0xb   : > { %p201_p3 = scmp.eq.s32.totalorder %s3841_s29, 1  ;;  %p3842_p5 = scmp.ge.s32.totalorder %s4827_s27, 1 }
   0xc   : > { %p4913_p4 = por %p6780_p1, %p45_p0  ;;  %p208_p7 = scmp.lt.s32.totalorder %s4827_s27, 3 }
   0xd   : > { %p4918_p6 = por %p201_p3, %p45_p0  ;;  %s4829_s10 = smov [#allocation5]  }
   0xe   : > { %s6791_s30 = scalar_select %p4913_p4, 1, 0 }
   0xf   : > { %s6792_s8 = scalar_select %p4918_p6, 1, 0 }
  0x10   : > { %p4923_p8 = pnand %p3842_p5, %p208_p7  ;;  %s221_s11 = sshll.u32 %s4829_s10, 4  ;;  %s222_s11 = int_to_ptr.vmem [resolvable:$true] %s221_s11 }
  0x11   : > { %s4830_s12 = smov [#allocation7]   ;;  %s4831_s15 = smov [#allocation8]  }
  0x12   : > { %s6793_s9 = scalar_select %p4923_p8, 1, 0 }
  0x13   : > { %p4155_p10 = pneg %p4923_p8  ;;  %s234_s13 = sshll.u32 %s4830_s12, 4  ;;  %s235_s13 = int_to_ptr.vmem [resolvable:$true] %s234_s13 }
  0x14   : > { %s250_s16 = sshll.u32 %s4831_s15, 4  ;;  %s4660_s17 = scalar_lea.vmem %s222_s11, 32  ;;  %s251_s16 = int_to_ptr.vmem [resolvable:$true] %s250_s16 }
  0x15   : > { %p4932_p11 = pnand %p4155_p10, %p6780_p1  ;;  %p4661_p13 = scmp.ne.s32.totalorder %s222_s11, %s4660_s17 }
  0x16   : > { %p4668_p5 = scmp.lt.s32.totalorder %s222_s11, %s222_s11  ;;  %p4669_p7 = scmp.lt.s32.totalorder %s4660_s17, %s4660_s17 }
  0x17   : > { %p4651_p12 = pneg %p4932_p11 }
  0x18   : > { %p4670_p9 = por %p4669_p7, %p4668_p5 }
  0x19   : > { %p4663_p0 = pnand %p4661_p13, %p4651_p12 }
  0x1b   : > { %p4664_p3 = pneg %p4663_p0 }
  0x1d   : > { %p4671_p10 = pnand %p4670_p9, %p4664_p3 }
  0x1f   : > { %4674 = shalt.err (!%p4671_p10)
}
  0x20   : > { %s6795_s1 = sld [smem:[#allocation62_spill]]  ;;  %s4686_s20 = scalar_lea.vmem %s235_s13, 10240 }
  0x21   : > { %p4687_p1 = scmp.ne.s32.totalorder %s235_s13, %s4686_s20  ;;  %p4694_p13 = scmp.lt.s32.totalorder %s235_s13, %s235_s13 }
  0x22   : > { %p4695_p0 = scmp.lt.s32.totalorder %s4686_s20, %s4686_s20 }
  0x23   : > { %p4689_p2 = pnand %p4687_p1, %p4651_p12 }
  0x24   : > { %p4696_p4 = por %p4695_p0, %p4694_p13 }
  0x25   : > { %p4690_p6 = pneg %p4689_p2 }
  0x26   : > { %4158 = dma.hbm_to_vmem [thread:$0]  (!%p4932_p11), %s6795_s1, 32, %s222_s11, [#allocation6]  }
  0x27   : > { %p4697_p8 = pnand %p4696_p4, %p4690_p6 }
  0x29   : > { %4700 = shalt.err (!%p4697_p8)
}
  0x2a   : > { %s4832_s21 = smov 320   ;;  %s4833_s22 = smov 20  }
  0x2b   : > { %4161 = dma.hbm_to_vmem [thread:$0]  (!%p4932_p11), %s6775_s3, 10240, %s235_s13, [#allocation6], %s4832_s21, %s4832_s21, %s4833_s22  }
  0x2c   : > { %s4712_s10 = scalar_lea.vmem %s251_s16, 10240  ;;  %p4720_p3 = scmp.lt.s32.totalorder %s251_s16, %s251_s16 }
  0x2d   : > { %p4713_p9 = scmp.ne.s32.totalorder %s251_s16, %s4712_s10  ;;  %p4721_p5 = scmp.lt.s32.totalorder %s4712_s10, %s4712_s10 }
  0x2f   : > { %p4715_p1 = pnand %p4713_p9, %p4651_p12  ;;  %p4722_p4 = por %p4721_p5, %p4720_p3 }
  0x31   : > { %p4716_p2 = pneg %p4715_p1 }
  0x33   : > { %p4723_p6 = pnand %p4722_p4, %p4716_p2 }
  0x35   : > { %4726 = shalt.err (!%p4723_p6)
}
  0x36   : > { %s4834_s11 = smov 128   ;;  %s4835_s12 = smov 8  }
  0x37   : > { %4164 = dma.hbm_to_vmem [thread:$0]  (!%p4932_p11), %s6777_s5, 10240, %s251_s16, [#allocation9], %s4834_s11, %s4834_s11, %s4835_s12  }
  0x38   : > { %s4963_s17 = sadd.s32 1, %s4827_s27   ;;  %s32_s19 = sadd.s32 1, %s4823_s26 }
  0x39   : > { %s29_s18 = ssub.s32 %s4827_s27, %s4963_s17  ;;  %p39_p12 = scmp.ne.s32.totalorder %s4823_s26, %s4819_s25 }
  0x3a   : > { %p30_p8 = scmp.eq.s32.totalorder %s29_s18, 0  ;;  %p40_p7 = scmp.eq.s32.totalorder %s4827_s27, 0 }
  0x3b   : > { %p4176_p10 = scmp.lt.s32.totalorder %s4827_s27, 2  ;;  %p6796_p0 = scmp.eq.s32.totalorder %s4904_s28, 1 }
  0x3c   : > { %s4973_s20 = scalar_select %p30_p8, %s4823_s26, %s32_s19  }
  0x3d   : > { %p41_p13 = por %p40_p7, %p39_p12  ;;  %p4977_p9 = por %p6796_p0, %p39_p12 }
  0x3e   : > { %s267_s14 = sand.u32 1, %s4823_s26   ;;  %s4024_s22 = sshll.u32 %s4827_s27, 13 }
  0x3f   : > { %s6797_s21 = scalar_select %p4977_p9, 1, 0 }
  0x40   : > { %s3847_s16 = sshll.u32 %s267_s14, 9  ;;  %s4986_s10 = scalar_lea.hbm %s6772_s0, %s4024_s22 }
  0x41   : > { %s271_s11 = scalar_lea.vmem [#allocation2], %s3847_s16  ;;  %p4988_p11 = pnand %p4176_p10, %p41_p13 }
  0x42   : > { %s279_s12 = sshll.u32 %s271_s11, 4  ;;  %s4994_s15 = scalar_lea.sflag [#allocation3], %s267_s14  ;;  %s4992_s12 = int_to_ptr.vmem [resolvable:$true] %s279_s12 }
  0x43   : > { %s4727_s18 = scalar_lea.hbm %s4986_s10, 8192  ;;  %p4729_p2 = pneg %p4988_p11 }
  0x44   : > { %p4728_p1 = scmp.ne.s32.totalorder %s4986_s10, %s4727_s18  ;;  %s4732_s16 = scalar_lea.hbm %s6772_s0, 16384 }
  0x45   : > { %p4733_p4 = scmp.lt.s32.totalorder %s4986_s10, %s6772_s0  ;;  %p4734_p6 = scmp.lt.s32.totalorder %s4732_s16, %s4727_s18 }
  0x46   : > { %p4730_p3 = pnand %p4729_p2, %p4728_p1 }
  0x47   : > { %p4735_p8 = por %p4734_p6, %p4733_p4 }
  0x48   : > { %p4731_p5 = pneg %p4730_p3 }
  0x4a   : > { %p4736_p12 = pnand %p4735_p8, %p4731_p5 }
  0x4c   : > { %4739 = shalt.err (!%p4736_p12)
}
  0x4d   : > { %s4740_s14 = scalar_lea.vmem %s4992_s12, 8192  ;;  %s4836_s11 = smov [#allocation2]  }
  0x4e   : > { %p4741_p7 = scmp.ne.s32.totalorder %s4992_s12, %s4740_s14  ;;  %s4745_s1 = sshll.u32 %s4836_s11, 4  ;;  %s4746_s1 = int_to_ptr.vmem [resolvable:$false] %s4745_s1 }
  0x4f   : > { %s4747_s19 = scalar_lea.vmem %s4746_s1, 16384  ;;  %p4748_p0 = scmp.lt.s32.totalorder %s4992_s12, %s4746_s1 }
  0x50   : > { %p4743_p10 = pnand %p4741_p7, %p4729_p2  ;;  %p4749_p1 = scmp.lt.s32.totalorder %s4747_s19, %s4740_s14 }
  0x52   : > { %p4744_p13 = pneg %p4743_p10  ;;  %p4750_p3 = por %p4749_p1, %p4748_p0 }
  0x54   : > { %p4751_p9 = pnand %p4750_p3, %p4744_p13 }
  0x56   : > { %4754 = shalt.err (!%p4751_p9)
}
  0x57   : > { %s4837_s18 = smov 256   ;;  %s4838_s22 = smov 16  }
  0x58   : > { %4168 = dma.hbm_to_vmem [thread:$0]  (!%p4988_p11), %s4986_s10, 8192, %s4992_s12, %s4994_s15, %s4837_s18, %s4837_s18, %s4838_s22  }
  0x59   : > { %p6799_p2 = scmp.ne.s32.totalorder %s6793_s9, 0 }
  0x5b   : > { %291 = sbr.rel (%p6799_p2) target bundleno = 969 (0x3c9), region = 48 }
  0x60   : > { %s5018_s16 = sand.u32 1, %s4819_s25   ;;  %p6800_p9 = scmp.ne.s32.totalorder %s6791_s30, 0 }
  0x61   : > { %s3852_s1 = sshll.u32 %s5018_s16, 9  ;;  %s294_s23 = scalar_lea.sflag [#allocation3], %s5018_s16 }
  0x62   : > { %s5024_s29 = scalar_lea.vmem [#allocation2], %s3852_s1 }
  0x63   : > { %4798 = dma.done.wait (%p6800_p9), %s294_s23, 8192  }
  0x64   : > { %4800 = vsyncadd (%p6800_p9), %s294_s23, 4294959104  ;;  %p6801_p11 = scmp.eq.s32.totalorder %s4904_s28, 0 }
  0x66   : > { %4802 = dma.done.wait (%p6801_p11), [#allocation6], 10272   ;;  %p6802_p5 = pmov %p6801_p11 }
  0x68   : > { %4804 = vsyncadd (%p6802_p5), [#allocation6], 4294957024  ;;  %p6803_p4 = pmov %p6802_p5 }
  0x6a   : > { %4806 = dma.done.wait (%p6803_p4), [#allocation9], 10240   ;;  %p6804_p6 = pmov %p6803_p4 }
  0x6b   : > { %v343_v0 = vld [vmem:[%s5024_s29] sm:$0xff]  ;;  %v344_v1 = vld [vmem:[%s5024_s29 + $0x8] sm:$0xff]  ;;  %v345_v2 = vld [vmem:[%s5024_s29 + $0x10] sm:$0xff]  ;;  %s6376_s14 = scalar_lea.vmem [#allocation10], %s3852_s1  ;;  %s4026_s11 = sshll.u32 %s4904_s28, 13 }
  0x6c   : > { %4808 = vsyncadd (%p6804_p6), [#allocation9], 4294957056  ;;  %v407_v3 = vadd.f32 %v344_v1, %v343_v0  ;;  %v503_v4 = vmul.f32 %v343_v0, %v343_v0  ;;  %v504_v5 = vmul.f32 %v344_v1, %v344_v1  ;;  %v346_v6 = vld [vmem:[%s5024_s29 + $0x18] sm:$0xff]  ;;  %v505_v7 = vmul.f32 %v345_v2, %v345_v2  ;;  %v347_v11 = vld [vmem:[%s5024_s29 + $0x20] sm:$0xff]  ;;  %s3739_s19 = sshll.u32 %s6376_s14, 4  ;;  %s6724_s1 = scalar_lea.hbm %s6779_s7, %s4026_s11  ;;  %s6726_s19 = int_to_ptr.vmem [resolvable:$true] %s3739_s19 }
  0x6d   : > { %v506_v8 = vmul.f32 %v346_v6, %v346_v6  ;;  %v410_v10 = vadd.f32 %v346_v6, %v345_v2  ;;  %v348_v12 = vld [vmem:[%s5024_s29 + $0x28] sm:$0xff]  ;;  %v349_v14 = vld [vmem:[%s5024_s29 + $0x30] sm:$0xff]  ;;  %v350_v15 = vld [vmem:[%s5024_s29 + $0x38] sm:$0xff]  ;;  %v507_v17 = vmul.f32 %v347_v11, %v347_v11  ;;  %s3725_s28 = scalar_lea.sflag [#allocation4], %s5018_s16  ;;  %s4755_s23 = scalar_lea.vmem %s6726_s19, 8192 }
  0x6e   : > { %408 = vadd.xlane.f32.xlu0 %v407_v3  ;;  %v567_v9 = vadd.f32 %v504_v5, %v503_v4  ;;  %v413_v16 = vadd.f32 %v348_v12, %v347_v11  ;;  %v508_v18 = vmul.f32 %v348_v12, %v348_v12  ;;  %v416_v19 = vadd.f32 %v350_v15, %v349_v14  ;;  %v351_v23 = vld [vmem:[%s5024_s29 + $0x40] sm:$0xff]  ;;  %v352_v24 = vld [vmem:[%s5024_s29 + $0x48] sm:$0xff]  ;;  %v353_v26 = vld [vmem:[%s5024_s29 + $0x50] sm:$0xff]  ;;  %p4756_p8 = scmp.ne.s32.totalorder %s6726_s19, %s4755_s23  ;;  %p6915_p12 = scmp.ne.s32.totalorder %s6797_s21, 0 }
  0x6f   : > { %v570_v13 = vadd.f32 %v506_v8, %v505_v7  ;;  %v509_v20 = vmul.f32 %v349_v14, %v349_v14  ;;  %v510_v21 = vmul.f32 %v350_v15, %v350_v15  ;;  %v354_v27 = vld [vmem:[%s5024_s29 + $0x58] sm:$0xff]  ;;  %v419_v28 = vadd.f32 %v352_v24, %v351_v23  ;;  %v355_v34 = vld [vmem:[%s5024_s29 + $0x60] sm:$0xff]  ;;  %v356_v36 = vld [vmem:[%s5024_s29 + $0x68] sm:$0xff]  ;;  %s4840_s30 = smov [#allocation10]  }
  0x70   : > { %568 = vadd.xlane.f32.xlu1 %v567_v9  ;;  %v573_v22 = vadd.f32 %v508_v18, %v507_v17  ;;  %v511_v29 = vmul.f32 %v351_v23, %v351_v23  ;;  %v512_v30 = vmul.f32 %v352_v24, %v352_v24  ;;  %v422_v31 = vadd.f32 %v354_v27, %v353_v26  ;;  %v4225_v37 = vld [vmem:[#allocation7 + $0x11c] ss:$20 sps:$4 sm:$0xff]   ;;  %v4227_v38 = vld [vmem:[#allocation7 + $0x118] ss:$20 sps:$4 sm:$0xff]   ;;  %v4230_v46 = vld [vmem:[#allocation7 + $0x120] ss:$20 sps:$4 sm:$0xff]   ;;  %p4757_p7 = pnand %p4756_p8, %p6915_p12 }
  0x71   : > { %v576_v25 = vadd.f32 %v510_v21, %v509_v20  ;;  %v513_v32 = vmul.f32 %v353_v26, %v353_v26  ;;  %v514_v33 = vmul.f32 %v354_v27, %v354_v27  ;;  %v357_v40 = vld [vmem:[%s5024_s29 + $0x70] sm:$0xff]  ;;  %v358_v41 = vld [vmem:[%s5024_s29 + $0x78] sm:$0xff]  ;;  %1738 = vmatprep.subr.bf16.mxu0 %v4225_v37  ;;  %v425_v43 = vadd.f32 %v356_v36, %v355_v34  ;;  %v359_v55 = vld [vmem:[%s5024_s29 + $0x80] sm:$0xff]  ;;  %s4759_s9 = sshll.u32 %s4840_s30, 4  ;;  %s4760_s9 = int_to_ptr.vmem [resolvable:$false] %s4759_s9 }
  0x72   : > { %411 = vadd.xlane.f32.xlu0 %v410_v10  ;;  %v579_v35 = vadd.f32 %v512_v30, %v511_v29  ;;  %v4228_v42 = vld [vmem:[#allocation7 + $0x124] ss:$20 sps:$4 sm:$0xff]   ;;  %v515_v44 = vmul.f32 %v355_v34, %v355_v34  ;;  %v516_v45 = vmul.f32 %v356_v36, %v356_v36  ;;  %1739 = vmatpush1.bf16.msra.mxu0 %v4227_v38  ;;  %v4231_v47 = vld [vmem:[#allocation7 + $0xf4] ss:$20 sps:$4 sm:$0xff]   ;;  %v4234_v52 = vld [vmem:[#allocation7 + $0xfc] ss:$20 sps:$4 sm:$0xff]   ;;  %p4758_p10 = pneg %p4757_p7  ;;  %p4762_p13 = scmp.lt.s32.totalorder %s6726_s19, %s4760_s9 }
  0x73   : > { %v582_v39 = vadd.f32 %v514_v33, %v513_v32  ;;  %v428_v48 = vadd.f32 %v358_v41, %v357_v40  ;;  %v517_v49 = vmul.f32 %v357_v40, %v357_v40  ;;  %v518_v50 = vmul.f32 %v358_v41, %v358_v41  ;;  %v4233_v51 = vld [vmem:[#allocation7 + $0xf0] ss:$20 sps:$4 sm:$0xff]   ;;  %1931 = vmatprep.subr.bf16.mxu1 %v4228_v42  ;;  %v4237_v53 = vld [vmem:[#allocation7 + $0xcc] ss:$20 sps:$4 sm:$0xff]   ;;  %v362_v60 = vld [vmem:[%s5024_s29 + $0x98] sm:$0xff]  ;;  %s4761_s10 = scalar_lea.vmem %s4760_s9, 16384 }
  0x74   : > { %571 = vadd.xlane.f32.xlu1 %v570_v13  ;;  %v585_v54 = vadd.f32 %v516_v45, %v515_v44  ;;  %v360_v56 = vld [vmem:[%s5024_s29 + $0x88] sm:$0xff]  ;;  %v361_v57 = vld [vmem:[%s5024_s29 + $0x90] sm:$0xff]  ;;  %1932 = vmatpush1.bf16.msra.mxu1 %v4230_v46  ;;  %v519_v1 = vmul.f32 %v359_v55, %v359_v55  ;;  %v522_v6 = vmul.f32 %v362_v60, %v362_v60  ;;  %v363_v11 = vld [vmem:[%s5024_s29 + $0xa0] sm:$0xff]  ;;  %p4763_p0 = scmp.lt.s32.totalorder %s4761_s10, %s4755_s23 }
  0x75   : > { %1740 = vmatprep.subr.bf16.mxu0 %v4231_v47  ;;  %v4236_v58 = vld [vmem:[#allocation7 + $0xf8] ss:$20 sps:$4 sm:$0xff]   ;;  %v588_v59 = vadd.f32 %v518_v50, %v517_v49  ;;  %v4239_v61 = vld [vmem:[#allocation7 + $0xc8] ss:$20 sps:$4 sm:$0xff]   ;;  %1933 = vmatprep.subr.bf16.mxu1 %v4234_v52  ;;  %v431_v0 = vadd.f32 %v360_v56, %v359_v55  ;;  %v520_v2 = vmul.f32 %v360_v56, %v360_v56  ;;  %v4242_v3 = vld [vmem:[#allocation7 + $0xd0] ss:$20 sps:$4 sm:$0xff]  }
  0x76   : > { %414 = vadd.xlane.f32.xlu0 %v413_v16  ;;  %1741 = vmatpush1.bf16.msra.mxu0 %v4233_v51  ;;  %v4240_v62 = vld [vmem:[#allocation7 + $0xd4] ss:$20 sps:$4 sm:$0xff]   ;;  %v4243_v63 = vld [vmem:[#allocation7 + $0xa4] ss:$20 sps:$4 sm:$0xff]   ;;  %v434_v4 = vadd.f32 %v362_v60, %v361_v57  ;;  %v521_v5 = vmul.f32 %v361_v57, %v361_v57  ;;  %v4246_v8 = vld [vmem:[#allocation7 + $0xac] ss:$20 sps:$4 sm:$0xff]   ;;  %v523_v21 = vmul.f32 %v363_v11, %v363_v11  ;;  %p4764_p1 = por %p4763_p0, %p4762_p13 }
  0x77   : > { %1742 = vmatprep.subr.bf16.mxu0 %v4237_v53  ;;  %v4245_v7 = vld [vmem:[#allocation7 + $0xa0] ss:$20 sps:$4 sm:$0xff]   ;;  %v4249_v9 = vld [vmem:[#allocation7 + $0x7c] ss:$20 sps:$4 sm:$0xff]   ;;  %v591_v10 = vadd.f32 %v520_v2, %v519_v1  ;;  %v364_v12 = vld [vmem:[%s5024_s29 + $0xa8] sm:$0xff] }
  0x78   : > { %417 = vadd.xlane.f32.xlu1 %v416_v19  ;;  %1934 = vmatpush1.bf16.msra.mxu1 %v4236_v58  ;;  %v365_v13 = vld [vmem:[%s5024_s29 + $0xb0] sm:$0xff]  ;;  %v366_v14 = vld [vmem:[%s5024_s29 + $0xb8] sm:$0xff]  ;;  %v594_v16 = vadd.f32 %v522_v6, %v521_v5  ;;  %v437_v20 = vadd.f32 %v364_v12, %v363_v11  ;;  %v368_v32 = vld [vmem:[%s5024_s29 + $0xc8] sm:$0xff]  ;;  %p4765_p3 = pnand %p4764_p1, %p4758_p10 }
  0x79   : > { %1935 = vmatprep.subr.bf16.mxu1 %v4240_v62  ;;  %v4248_v15 = vld [vmem:[#allocation7 + $0xa8] ss:$20 sps:$4 sm:$0xff]   ;;  %v4251_v17 = vld [vmem:[#allocation7 + $0x78] ss:$20 sps:$4 sm:$0xff]   ;;  %v4254_v23 = vld [vmem:[#allocation7 + $0x80] ss:$20 sps:$4 sm:$0xff]   ;;  %v440_v24 = vadd.f32 %v366_v14, %v365_v13  ;;  %v526_v26 = vmul.f32 %v366_v14, %v366_v14  ;;  %v528_v42 = vmul.f32 %v368_v32, %v368_v32 }
  0x7a   : > { %574 = vadd.xlane.f32.xlu0 %v573_v22  ;;  %1743 = vmatpush1.bf16.msra.mxu0 %v4239_v61  ;;  %v4252_v18 = vld [vmem:[#allocation7 + $0x84] ss:$20 sps:$4 sm:$0xff]   ;;  %v4255_v19 = vld [vmem:[#allocation7 + $0x54] ss:$20 sps:$4 sm:$0xff]   ;;  %v524_v22 = vmul.f32 %v364_v12, %v364_v12  ;;  %v4261_v29 = vld [vmem:[#allocation7 + $0x2c] ss:$20 sps:$4 sm:$0xff]  }
  0x7b   : > { %1744 = vmatprep.subr.bf16.mxu0 %v4243_v63  ;;  %v4257_v27 = vld [vmem:[#allocation7 + $0x50] ss:$20 sps:$4 sm:$0xff]   ;;  %v370_v34 = vld [vmem:[%s5024_s29 + $0xd8] sm:$0xff]  ;;  %v4285_v5 = vld [vmem:[#allocation7 + $0x20c] ss:$20 sps:$4 sm:$0xff]  }
  0x7c   : > { %577 = vadd.xlane.f32.xlu1 %v576_v25  ;;  %1936 = vmatpush1.bf16.msra.mxu1 %v4242_v3  ;;  %v525_v25 = vmul.f32 %v365_v13, %v365_v13  ;;  %v597_v30 = vadd.f32 %v524_v22, %v523_v21  ;;  %v369_v33 = vld [vmem:[%s5024_s29 + $0xd0] sm:$0xff]  ;;  %v4263_v37 = vld [vmem:[#allocation7 + $0x28] ss:$20 sps:$4 sm:$0xff]   ;;  %v530_v46 = vmul.f32 %v370_v34, %v370_v34  ;;  %v4276_v58 = vld [vmem:[#allocation7 + $0x264] ss:$20 sps:$4 sm:$0xff]  }
  0x7d   : > { %1937 = vmatprep.subr.bf16.mxu1 %v4246_v8  ;;  %v4264_v38 = vld [vmem:[#allocation7 + $0x34] ss:$20 sps:$4 sm:$0xff]   ;;  %v446_v44 = vadd.f32 %v370_v34, %v369_v33  ;;  %v529_v45 = vmul.f32 %v369_v33, %v369_v33  ;;  %v4273_v49 = vld [vmem:[#allocation7 + $0x25c] ss:$20 sps:$4 sm:$0xff]   ;;  %v4275_v57 = vld [vmem:[#allocation7 + $0x258] ss:$20 sps:$4 sm:$0xff]  }
  0x7e   : > { %420 = vadd.xlane.f32.xlu0 %v419_v28  ;;  %1745 = vmatpush1.bf16.msra.mxu0 %v4245_v7  ;;  %v4258_v28 = vld [vmem:[#allocation7 + $0x5c] ss:$20 sps:$4 sm:$0xff]   ;;  %v600_v36 = vadd.f32 %v526_v26, %v525_v25  ;;  %v4269_v47 = vld [vmem:[#allocation7] ss:$20 sps:$4 sm:$0xff]   ;;  %v372_v52 = vld [vmem:[%s5024_s29 + $0xe8] sm:$0xff] }
  0x7f   : > { %1746 = vmatprep.subr.bf16.mxu0 %v4249_v9  ;;  %v371_v51 = vld [vmem:[%s5024_s29 + $0xe0] sm:$0xff]  ;;  %v373_v53 = vld [vmem:[%s5024_s29 + $0xf0] sm:$0xff]  ;;  %v606_v56 = vadd.f32 %v530_v46, %v529_v45  ;;  %v532_v62 = vmul.f32 %v372_v52, %v372_v52  ;;  %v376_v8 = vld [vmem:[%s5024_s29 + $0x108] sm:$0xff] }
  0x80   : > { %423 = vadd.xlane.f32.xlu1 %v422_v31  ;;  %1938 = vmatpush1.bf16.msra.mxu1 %v4248_v15  ;;  %v367_v31 = vld [vmem:[%s5024_s29 + $0xc0] sm:$0xff]  ;;  %v449_v60 = vadd.f32 %v372_v52, %v371_v51  ;;  %v531_v61 = vmul.f32 %v371_v51, %v371_v51  ;;  %v533_v1 = vmul.f32 %v373_v53, %v373_v53  ;;  %v377_v9 = vld [vmem:[%s5024_s29 + $0x110] sm:$0xff]  ;;  %v380_v26 = vld [vmem:[%s5024_s29 + $0x128] sm:$0xff] }
  0x81   : > { %1939 = vmatprep.subr.bf16.mxu1 %v4252_v18  ;;  %v443_v40 = vadd.f32 %v368_v32, %v367_v31  ;;  %v527_v41 = vmul.f32 %v367_v31, %v367_v31  ;;  %v4272_v55 = vld [vmem:[#allocation7 + $0x8] ss:$20 sps:$4 sm:$0xff]   ;;  %v4278_v63 = vld [vmem:[#allocation7 + $0x260] ss:$20 sps:$4 sm:$0xff]   ;;  %v4281_v3 = vld [vmem:[#allocation7 + $0x230] ss:$20 sps:$4 sm:$0xff]   ;;  %v536_v18 = vmul.f32 %v376_v8, %v376_v8  ;;  %v537_v22 = vmul.f32 %v377_v9, %v377_v9 }
  0x82   : > { %580 = vadd.xlane.f32.xlu0 %v579_v35  ;;  %1747 = vmatpush1.bf16.msra.mxu0 %v4251_v17  ;;  %v4260_v35 = vld [vmem:[#allocation7 + $0x58] ss:$20 sps:$4 sm:$0xff]   ;;  %v609_v6 = vadd.f32 %v532_v62, %v531_v61  ;;  %v375_v7 = vld [vmem:[%s5024_s29 + $0x100] sm:$0xff]  ;;  %v4288_v14 = vld [vmem:[#allocation7 + $0x214] ss:$20 sps:$4 sm:$0xff]  }
  0x83   : > { %1748 = vmatprep.subr.bf16.mxu0 %v4255_v19  ;;  %v603_v50 = vadd.f32 %v528_v42, %v527_v41  ;;  %v4284_v11 = vld [vmem:[#allocation7 + $0x238] ss:$20 sps:$4 sm:$0xff]   ;;  %v4287_v13 = vld [vmem:[#allocation7 + $0x208] ss:$20 sps:$4 sm:$0xff]   ;;  %v535_v17 = vmul.f32 %v375_v7, %v375_v7  ;;  %v4290_v19 = vld [vmem:[#allocation7 + $0x210] ss:$20 sps:$4 sm:$0xff]  }
  0x84   : > { %583 = vadd.xlane.f32.xlu1 %v582_v39  ;;  %1940 = vmatpush1.bf16.msra.mxu1 %v4254_v23  ;;  %v4267_v39 = vld [vmem:[#allocation7 + $0x4] ss:$20 sps:$4 sm:$0xff]   ;;  %v381_v31 = vld [vmem:[%s5024_s29 + $0x130] sm:$0xff]  ;;  %v4321_v62 = vld [vmem:[#allocation7 + $0x268] ss:$20 sps:$4 sm:$0xff]  }
  0x85   : > { %1941 = vmatprep.subr.bf16.mxu1 %v4258_v28  ;;  %v4291_v15 = vld [vmem:[#allocation7 + $0x1e4] ss:$20 sps:$4 sm:$0xff]   ;;  %v4297_v28 = vld [vmem:[#allocation7 + $0x1bc] ss:$20 sps:$4 sm:$0xff]   ;;  %v4303_v34 = vld [vmem:[#allocation7 + $0x194] ss:$20 sps:$4 sm:$0xff]  }
  0x86   : > { %426 = vadd.xlane.f32.xlu0 %v425_v43  ;;  %1749 = vmatpush1.bf16.msra.mxu0 %v4257_v27  ;;  %v4266_v43 = vld [vmem:[#allocation7 + $0x30] ss:$20 sps:$4 sm:$0xff]   ;;  %v4296_v27 = vld [vmem:[#allocation7 + $0x1e8] ss:$20 sps:$4 sm:$0xff]   ;;  %v4309_v45 = vld [vmem:[#allocation7 + $0x16c] ss:$20 sps:$4 sm:$0xff]  }
  0x87   : > { %1750 = vmatprep.subr.bf16.mxu0 %v4261_v29  ;;  %v379_v25 = vld [vmem:[%s5024_s29 + $0x120] sm:$0xff]  ;;  %v615_v29 = vadd.f32 %v536_v18, %v535_v17  ;;  %v382_v32 = vld [vmem:[%s5024_s29 + $0x138] sm:$0xff]  ;;  %v385_v51 = vld [vmem:[%s5024_s29 + $0x150] sm:$0xff] }
  0x88   : > { %429 = vadd.xlane.f32.xlu1 %v428_v48  ;;  %1942 = vmatpush1.bf16.msra.mxu1 %v4260_v35  ;;  %v4270_v48 = vld [vmem:[#allocation7 + $0xc] ss:$20 sps:$4 sm:$0xff]   ;;  %v4300_v33 = vld [vmem:[#allocation7 + $0x1c4] ss:$20 sps:$4 sm:$0xff]   ;;  %v4306_v41 = vld [vmem:[#allocation7 + $0x19c] ss:$20 sps:$4 sm:$0xff]   ;;  %v464_v42 = vadd.f32 %v382_v32, %v381_v31 }
  0x89   : > { %1943 = vmatprep.subr.bf16.mxu1 %v4264_v38  ;;  %v539_v38 = vmul.f32 %v379_v25, %v379_v25  ;;  %v383_v46 = vld [vmem:[%s5024_s29 + $0x140] sm:$0xff]  ;;  %v386_v52 = vld [vmem:[%s5024_s29 + $0x158] sm:$0xff]  ;;  %v392_v17 = vld [vmem:[%s5024_s29 + $0x188] sm:$0xff] }
  0x8a   : > { %586 = vadd.xlane.f32.xlu0 %v585_v54  ;;  %1751 = vmatpush1.bf16.msra.mxu0 %v4263_v37  ;;  %v374_v54 = vld [vmem:[%s5024_s29 + $0xf8] sm:$0xff]  ;;  %v461_v37 = vadd.f32 %v380_v26, %v379_v25  ;;  %v4318_v61 = vld [vmem:[#allocation7 + $0x14c] ss:$20 sps:$4 sm:$0xff]  }
  0x8b   : > { %1752 = vmatprep.subr.bf16.mxu0 %v4267_v39  ;;  %v534_v2 = vmul.f32 %v374_v54, %v374_v54  ;;  %v540_v39 = vmul.f32 %v380_v26, %v380_v26  ;;  %v393_v18 = vld [vmem:[%s5024_s29 + $0x190] sm:$0xff] }
  0x8c   : > { %589 = vadd.xlane.f32.xlu1 %v588_v59  ;;  %1944 = vmatpush1.bf16.msra.mxu1 %v4266_v43  ;;  %v4279_v59 = vld [vmem:[#allocation7 + $0x234] ss:$20 sps:$4 sm:$0xff]   ;;  %v541_v43 = vmul.f32 %v381_v31, %v381_v31  ;;  %v553_v25 = vmul.f32 %v393_v18, %v393_v18 }
  0x8d   : > { %1945 = vmatprep.subr.bf16.mxu1 %v4270_v48  ;;  %v612_v12 = vadd.f32 %v534_v2, %v533_v1  ;;  %v4308_v48 = vld [vmem:[#allocation7 + $0x198] ss:$20 sps:$4 sm:$0xff]   ;;  %v546_v1 = vmul.f32 %v386_v52, %v386_v52  ;;  %v387_v2 = vld [vmem:[%s5024_s29 + $0x160] sm:$0xff] }
  0x8e   : > { %432 = vadd.xlane.f32.xlu0 %v431_v0  ;;  %1753 = vmatpush1.bf16.msra.mxu0 %v4269_v47  ;;  %v452_v0 = vadd.f32 %v374_v54, %v373_v53  ;;  %v384_v47 = vld [vmem:[%s5024_s29 + $0x148] sm:$0xff]  ;;  %v398_v31 = vld [vmem:[%s5024_s29 + $0x1b8] sm:$0xff] }
  0x8f   : > { %1754 = vmatprep.subr.bf16.mxu0 %v4273_v49  ;;  %v621_v49 = vadd.f32 %v540_v39, %v539_v38  ;;  %v4312_v53 = vld [vmem:[#allocation7 + $0x174] ss:$20 sps:$4 sm:$0xff]   ;;  %v4315_v54 = vld [vmem:[#allocation7 + $0x144] ss:$20 sps:$4 sm:$0xff]   ;;  %v558_v38 = vmul.f32 %v398_v31, %v398_v31 }
  0x90   : > { %435 = vadd.xlane.f32.xlu1 %v434_v4  ;;  %1946 = vmatpush1.bf16.msra.mxu1 %v4272_v55  ;;  %v4282_v4 = vld [vmem:[#allocation7 + $0x23c] ss:$20 sps:$4 sm:$0xff]  }
  0x91   : > { %1947 = vmatprep.subr.bf16.mxu1 %v4276_v58  ;;  %v543_v58 = vmul.f32 %v383_v46, %v383_v46 }
  0x92   : > { %592 = vadd.xlane.f32.xlu0 %v591_v10  ;;  %1755 = vmatpush2.bf16.msra.mxu0 %v4275_v57  ;;  %v378_v10 = vld [vmem:[%s5024_s29 + $0x118] sm:$0xff]  ;;  %v467_v57 = vadd.f32 %v384_v47, %v383_v46 }
  0x93   : > { %1756 = vmatprep.subr.bf16.mxu0 %v4279_v59  ;;  %v458_v21 = vadd.f32 %v378_v10, %v377_v9  ;;  %v538_v23 = vmul.f32 %v378_v10, %v378_v10  ;;  %v544_v59 = vmul.f32 %v384_v47, %v384_v47  ;;  %v547_v10 = vmul.f32 %v387_v2, %v387_v2 }
  0x94   : > { %595 = vadd.xlane.f32.xlu1 %v594_v16  ;;  %1948 = vmatpush2.bf16.msra.mxu1 %v4278_v63  ;;  %v455_v16 = vadd.f32 %v376_v8, %v375_v7  ;;  %v470_v63 = vadd.f32 %v386_v52, %v385_v51  ;;  %v390_v7 = vld [vmem:[%s5024_s29 + $0x178] sm:$0xff]  ;;  %v403_v52 = vld [vmem:[%s5024_s29 + $0x1e0] sm:$0xff] }
  0x95   : > { %1949 = vmatprep.subr.bf16.mxu1 %v4282_v4  ;;  %v618_v35 = vadd.f32 %v538_v23, %v537_v22  ;;  %v4320_v4 = vld [vmem:[#allocation7 + $0x148] ss:$20 sps:$4 sm:$0xff]   ;;  %v552_v23 = vmul.f32 %v392_v17, %v392_v17 }
  0x96   : > { %438 = vadd.xlane.f32.xlu0 %v437_v20  ;;  %1757 = vmatpush2.bf16.msra.mxu0 %v4281_v3  ;;  %v4293_v20 = vld [vmem:[#allocation7 + $0x1e0] ss:$20 sps:$4 sm:$0xff]   ;;  %v388_v3 = vld [vmem:[%s5024_s29 + $0x168] sm:$0xff] }
  0x97   : > { %1758 = vmatprep.subr.bf16.mxu0 %v4285_v5  ;;  %v627_v5 = vadd.f32 %v544_v59, %v543_v58  ;;  %v473_v9 = vadd.f32 %v388_v3, %v387_v2  ;;  %v563_v58 = vmul.f32 %v403_v52, %v403_v52 }
  0x98   : > { %441 = vadd.xlane.f32.xlu1 %v440_v24  ;;  %1950 = vmatpush2.bf16.msra.mxu1 %v4284_v11  ;;  %v4294_v24 = vld [vmem:[#allocation7 + $0x1ec] ss:$20 sps:$4 sm:$0xff]   ;;  %v548_v11 = vmul.f32 %v388_v3, %v388_v3 }
  0x99   : > { %1951 = vmatprep.subr.bf16.mxu1 %v4288_v14  ;;  %v550_v14 = vmul.f32 %v390_v7, %v390_v7 }
  0x9a   : > { %598 = vadd.xlane.f32.xlu0 %v597_v30  ;;  %1759 = vmatpush2.bf16.msra.mxu0 %v4287_v13  ;;  %v4299_v30 = vld [vmem:[#allocation7 + $0x1b8] ss:$20 sps:$4 sm:$0xff]  }
  0x9b   : > { %1760 = vmatprep.subr.bf16.mxu0 %v4291_v15  ;;  %v391_v15 = vld [vmem:[%s5024_s29 + $0x180] sm:$0xff] }
  0x9c   : > { %601 = vadd.xlane.f32.xlu1 %v600_v36  ;;  %1952 = vmatpush2.bf16.msra.mxu1 %v4290_v19  ;;  %v4302_v36 = vld [vmem:[#allocation7 + $0x1c0] ss:$20 sps:$4 sm:$0xff]   ;;  %v551_v22 = vmul.f32 %v391_v15, %v391_v15 }
  0x9d   : > { %1953 = vmatprep.subr.bf16.mxu1 %v4294_v24  ;;  %v394_v19 = vld [vmem:[%s5024_s29 + $0x198] sm:$0xff] }
  0x9e   : > { %444 = vadd.xlane.f32.xlu0 %v443_v40  ;;  %1761 = vmatpush2.bf16.msra.mxu0 %v4293_v20  ;;  %v4305_v40 = vld [vmem:[#allocation7 + $0x190] ss:$20 sps:$4 sm:$0xff]   ;;  %v482_v24 = vadd.f32 %v394_v19, %v393_v18  ;;  %v554_v26 = vmul.f32 %v394_v19, %v394_v19 }
  0x9f   : > { %1762 = vmatprep.subr.bf16.mxu0 %v4297_v28  ;;  %v396_v28 = vld [vmem:[%s5024_s29 + $0x1a8] sm:$0xff] }
  0xa0   : > { %447 = vadd.xlane.f32.xlu1 %v446_v44  ;;  %1954 = vmatpush2.bf16.msra.mxu1 %v4296_v27  ;;  %v542_v44 = vmul.f32 %v382_v32, %v382_v32  ;;  %v395_v27 = vld [vmem:[%s5024_s29 + $0x1a0] sm:$0xff]  ;;  %v642_v32 = vadd.f32 %v554_v26, %v553_v25  ;;  %v1017_v26 = vlaneseq }
  0xa1   : > { %1955 = vmatprep.subr.bf16.mxu1 %v4300_v33  ;;  %v485_v33 = vadd.f32 %v396_v28, %v395_v27 }
  0xa2   : > { %604 = vadd.xlane.f32.xlu0 %v603_v50  ;;  %1763 = vmatpush2.bf16.msra.mxu0 %v4299_v30  ;;  %v4311_v50 = vld [vmem:[#allocation7 + $0x168] ss:$20 sps:$4 sm:$0xff]   ;;  %v624_v55 = vadd.f32 %v542_v44, %v541_v43  ;;  %v397_v30 = vld [vmem:[%s5024_s29 + $0x1b0] sm:$0xff] }
  0xa3   : > { %1764 = vmatprep.subr.bf16.mxu0 %v4303_v34  ;;  %v555_v34 = vmul.f32 %v395_v27, %v395_v27  ;;  %v401_v43 = vld [vmem:[%s5024_s29 + $0x1d0] sm:$0xff]  ;;  %v402_v44 = vld [vmem:[%s5024_s29 + $0x1d8] sm:$0xff] }
  0xa4   : > { %607 = vadd.xlane.f32.xlu1 %v606_v56  ;;  %1956 = vmatpush2.bf16.msra.mxu1 %v4302_v36  ;;  %v4314_v56 = vld [vmem:[#allocation7 + $0x170] ss:$20 sps:$4 sm:$0xff]   ;;  %v488_v36 = vadd.f32 %v398_v31, %v397_v30 }
  0xa5   : > { %1957 = vmatprep.subr.bf16.mxu1 %v4306_v41  ;;  %v400_v41 = vld [vmem:[%s5024_s29 + $0x1c8] sm:$0xff] }
  0xa6   : > { %450 = vadd.xlane.f32.xlu0 %v449_v60  ;;  %1765 = vmatpush2.bf16.msra.mxu0 %v4305_v40  ;;  %v4317_v60 = vld [vmem:[#allocation7 + $0x140] ss:$20 sps:$4 sm:$0xff]   ;;  %v560_v47 = vmul.f32 %v400_v41, %v400_v41 }
  0xa7   : > { %1766 = vmatprep.subr.bf16.mxu0 %v4309_v45  ;;  %v399_v40 = vld [vmem:[%s5024_s29 + $0x1c0] sm:$0xff] }
  0xa8   : > { %453 = vadd.xlane.f32.xlu1 %v452_v0  ;;  %1958 = vmatpush2.bf16.msra.mxu1 %v4308_v48  ;;  %v545_v0 = vmul.f32 %v385_v51, %v385_v51  ;;  %v491_v45 = vadd.f32 %v400_v41, %v399_v40  ;;  %v559_v46 = vmul.f32 %v399_v40, %v399_v40 }
  0xa9   : > { %1959 = vmatprep.subr.bf16.mxu1 %v4312_v53  ;;  %v494_v48 = vadd.f32 %v402_v44, %v401_v43  ;;  %v404_v53 = vld [vmem:[%s5024_s29 + $0x1e8] sm:$0xff] }
  0xaa   : > { %610 = vadd.xlane.f32.xlu0 %v609_v6  ;;  %1767 = vmatpush2.bf16.msra.mxu0 %v4311_v50  ;;  %v389_v6 = vld [vmem:[%s5024_s29 + $0x170] sm:$0xff]  ;;  %v630_v8 = vadd.f32 %v546_v1, %v545_v0  ;;  %v562_v50 = vmul.f32 %v402_v44, %v402_v44  ;;  %v651_v51 = vadd.f32 %v560_v47, %v559_v46 }
  0xab   : > { %1768 = vmatprep.subr.bf16.mxu0 %v4315_v54  ;;  %v549_v13 = vmul.f32 %v389_v6, %v389_v6  ;;  %v564_v59 = vmul.f32 %v404_v53, %v404_v53  ;;  %v4333_v1 = vld [vmem:[#allocation8 + $0x74] ss:$8 sps:$4 sm:$0xff]  }
  0xac   : > { %613 = vadd.xlane.f32.xlu1 %v612_v12  ;;  %1960 = vmatpush2.bf16.msra.mxu1 %v4314_v56  ;;  %v476_v12 = vadd.f32 %v390_v7, %v389_v6  ;;  %v406_v56 = vld [vmem:[%s5024_s29 + $0x1f8] sm:$0xff] }
  0xad   : > { %1961 = vmatprep.subr.bf16.mxu1 %v4318_v61  ;;  %v636_v20 = vadd.f32 %v550_v14, %v549_v13 }
  0xae   : > { %456 = vadd.xlane.f32.xlu0 %v455_v16  ;;  %1769 = vmatpush2.bf16.msra.mxu0 %v4317_v60  ;;  %v633_v16 = vadd.f32 %v548_v11, %v547_v10 }
  0xaf   : > { %4027 = vmatprep.subr.bf16.mxu0 %v4321_v62  ;;  %v566_v62 = vmul.f32 %v406_v56, %v406_v56 }
  0xb0   : > { %459 = vadd.xlane.f32.xlu1 %v458_v21  ;;  %1962 = vmatpush2.bf16.msra.mxu1 %v4320_v4  ;;  %v479_v21 = vadd.f32 %v392_v17, %v391_v15 }
  0xb1   : > { %3017 = vmatprep.subr.bf16.mxu1 %v4333_v1  ;;  %v4523_v1 = vld [vmem:[%s5024_s29 + $0x18] sm:$0xff] }
  0xb2   : > { %616 = vadd.xlane.f32.xlu0 %v615_v29  ;;  %v639_v29 = vadd.f32 %v552_v23, %v551_v22 }
  0xb4   : > { %619 = vadd.xlane.f32.xlu1 %v618_v35  ;;  %v556_v35 = vmul.f32 %v396_v28, %v396_v28 }
  0xb6   : > { %462 = vadd.xlane.f32.xlu0 %v461_v37  ;;  %v557_v37 = vmul.f32 %v397_v30, %v397_v30  ;;  %v645_v39 = vadd.f32 %v556_v35, %v555_v34  ;;  %v5120_v35 = vshrl.u32 %v1017_v26, 7 }
  0xb8   : > { %465 = vadd.xlane.f32.xlu1 %v464_v42  ;;  %v648_v42 = vadd.f32 %v558_v38, %v557_v37  ;;  %6805 = vst [vmem:[#allocation15_spill] sm:$0xff] %v5120_v35  ;;  %v5127_v44 = vsub.s32 1, %v5120_v35 }
  0xba   : > { %622 = vadd.xlane.f32.xlu0 %v621_v49  ;;  %v561_v49 = vmul.f32 %v401_v43, %v401_v43 }
  0xbc   : > { %625 = vadd.xlane.f32.xlu1 %v624_v55  ;;  %v654_v54 = vadd.f32 %v562_v50, %v561_v49  ;;  %v405_v55 = vld [vmem:[%s5024_s29 + $0x1f0] sm:$0xff]  ;;  %v4521_v50 = vld [vmem:[%s5024_s29 + $0x8] sm:$0xff] }
  0xbd   : > { %v500_v60 = vadd.f32 %v406_v56, %v405_v55  ;;  %v565_v61 = vmul.f32 %v405_v55, %v405_v55  ;;  %v5136_v56 = vsub.s32 0, %v5120_v35 }
  0xbe   : > { %468 = vadd.xlane.f32.xlu0 %v467_v57  ;;  %v497_v57 = vadd.f32 %v404_v53, %v403_v52 }
  0xbf   : > { %v660_v0 = vadd.f32 %v566_v62, %v565_v61  ;;  %6806 = vst [vmem:[#allocation16_spill] sm:$0xff] %v5136_v56 }
  0xc0   : > { %471 = vadd.xlane.f32.xlu1 %v470_v63  ;;  %v657_v63 = vadd.f32 %v564_v59, %v563_v58 }
  0xc2   : > { %628 = vadd.xlane.f32.xlu0 %v627_v5 }
  0xc4   : > { %631 = vadd.xlane.f32.xlu1 %v630_v8 }
  0xc6   : > { %474 = vadd.xlane.f32.xlu0 %v473_v9 }
  0xc8   : > { %477 = vadd.xlane.f32.xlu1 %v476_v12 }
  0xca   : > { %634 = vadd.xlane.f32.xlu0 %v633_v16 }
  0xcc   : > { %637 = vadd.xlane.f32.xlu1 %v636_v20 }
  0xce   : > { %480 = vadd.xlane.f32.xlu0 %v479_v21 }
  0xd0   : > { %483 = vadd.xlane.f32.xlu1 %v482_v24 }
  0xd2   : > { %640 = vadd.xlane.f32.xlu0 %v639_v29 }
  0xd4   : > { %643 = vadd.xlane.f32.xlu1 %v642_v32 }
  0xd6   : > { %486 = vadd.xlane.f32.xlu0 %v485_v33 }
  0xd8   : > { %489 = vadd.xlane.f32.xlu1 %v488_v36 }
  0xda   : > { %646 = vadd.xlane.f32.xlu0 %v645_v39 }
  0xdc   : > { %649 = vadd.xlane.f32.xlu1 %v648_v42 }
  0xde   : > { %492 = vadd.xlane.f32.xlu0 %v491_v45 }
  0xe0   : > { %495 = vadd.xlane.f32.xlu1 %v494_v48  ;;  %v1015_v48 = vld [vmem:[#allocation5] sm:$0x3] }
  0xe1   : > { %v5139_v59 = vrot.slane %v1015_v48, %v5127_v44 }
  0xe2   : > { %652 = vadd.xlane.f32.xlu0 %v651_v51 }
  0xe4   : > { %655 = vadd.xlane.f32.xlu1 %v654_v54 }
  0xe6   : > { %498 = vadd.xlane.f32.xlu0 %v497_v57 }
  0xe8   : > { %501 = vadd.xlane.f32.xlu1 %v500_v60  ;;  %v4522_v60 = vld [vmem:[%s5024_s29] sm:$0xff] }
  0xea   : > { %658 = vadd.xlane.f32.xlu0 %v657_v63 }
  0xec   : > { %661 = vadd.xlane.f32.xlu1 %v660_v0  ;;  %v1091_v0 = vld [vmem:[%s6774_s2] sm:$0x3] }
  0xf7   : > { %v409_v2 = vpop.xlane.xlu0 %408 }
  0xf8   : > { %v5102_v3 = vmul.f32 0.00625, %v409_v2 }
  0xf9   : > { %v569_v4 = vpop.xlane.xlu1 %568 }
  0xfa   : > { %v695_v5 = vmul.f32 0.00625, %v569_v4  ;;  %v727_v6 = vmul.f32 %v5102_v3, %v5102_v3  ;;  %v824_v51 = vsub.f32 %v4521_v50, %v5102_v3  ;;  %v823_v61 = vsub.f32 %v4522_v60, %v5102_v3 }
  0xfb   : > { %v412_v7 = vpop.xlane.xlu0 %411  ;;  %v5153_v3 = vrot.slane %v1015_v48, %v5136_v56 }
  0xfc   : > { %v759_v8 = vsub.f32 %v695_v5, %v727_v6  ;;  %v5106_v9 = vmul.f32 0.00625, %v412_v7 }
  0xfd   : > { %v572_v10 = vpop.xlane.xlu1 %571 }
  0xfe   : > { %v791_v11 = vmax.f32 %v759_v8, 0.0  ;;  %v696_v12 = vmul.f32 0.00625, %v572_v10  ;;  %v728_v13 = vmul.f32 %v5106_v9, %v5106_v9  ;;  %v826_v2 = vsub.f32 %v4523_v1, %v5106_v9 }
  0xff   : > { %v415_v14 = vpop.xlane.xlu0 %414 }
 0x100   : > { %v887_v15 = vadd.f32 1e-05, %v791_v11  ;;  %v5110_v16 = vmul.f32 0.00625, %v415_v14  ;;  %v760_v17 = vsub.f32 %v696_v12, %v728_v13  ;;  %v4524_v12 = vld [vmem:[%s5024_s29 + $0x10] sm:$0xff] }
 0x101   : > { %v418_v18 = vpop.xlane.xlu1 %417  ;;  %v825_v13 = vsub.f32 %v4524_v12, %v5106_v9  ;;  %v4338_v12 = vld [vmem:[#allocation8 + $0x64] ss:$8 sps:$4 sm:$0xff]  }
 0x102   : > { %4457 = vrsqrt.f32 %v887_v15  ;;  %v5112_v19 = vmul.f32 0.00625, %v418_v18  ;;  %v792_v20 = vmax.f32 %v760_v17, 0.0  ;;  %v729_v21 = vmul.f32 %v5110_v16, %v5110_v16 }
 0x103   : > { %v575_v22 = vpop.xlane.xlu0 %574  ;;  %v5159_v18 = vrot.slane %v1091_v0, %v5127_v44 }
 0x104   : > { %v697_v23 = vmul.f32 0.00625, %v575_v22  ;;  %v888_v24 = vadd.f32 1e-05, %v792_v20  ;;  %v730_v28 = vmul.f32 %v5112_v19, %v5112_v19 }
 0x105   : > { %v578_v25 = vpop.xlane.xlu1 %577 }
 0x106   : > { %v761_v27 = vsub.f32 %v697_v23, %v729_v21  ;;  %v698_v29 = vmul.f32 0.00625, %v578_v25  ;;  %4459 = vrsqrt.f32 %v888_v24  ;;  %v5165_v25 = vrot.slane %v1091_v0, %v5136_v56 }
 0x107   : > { %v421_v30 = vpop.xlane.xlu0 %420 }
 0x108   : > { %v793_v31 = vmax.f32 %v761_v27, 0.0  ;;  %v762_v32 = vsub.f32 %v698_v29, %v730_v28  ;;  %v5118_v33 = vmul.f32 0.00625, %v421_v30 }
 0x109   : > { %v424_v34 = vpop.xlane.xlu1 %423 }
 0x10a   : > { %v889_v36 = vadd.f32 1e-05, %v793_v31  ;;  %v794_v37 = vmax.f32 %v762_v32, 0.0  ;;  %v5122_v38 = vmul.f32 0.00625, %v424_v34  ;;  %v731_v39 = vmul.f32 %v5118_v33, %v5118_v33 }
 0x10b   : > { %v581_v40 = vpop.xlane.xlu0 %580 }
 0x10c   : > { %4461 = vrsqrt.f32 %v889_v36  ;;  %v890_v41 = vadd.f32 1e-05, %v794_v37  ;;  %v699_v42 = vmul.f32 0.00625, %v581_v40  ;;  %v732_v46 = vmul.f32 %v5122_v38, %v5122_v38  ;;  %v4525_v37 = vld [vmem:[%s5024_s29 + $0x20] sm:$0xff]  ;;  %v4526_v40 = vld [vmem:[%s5024_s29 + $0x28] sm:$0xff] }
 0x10d   : > { %v584_v43 = vpop.xlane.xlu1 %583 }
 0x10e   : > { %v763_v45 = vsub.f32 %v699_v42, %v731_v39  ;;  %v700_v47 = vmul.f32 0.00625, %v584_v43  ;;  %4463 = vrsqrt.f32 %v890_v41  ;;  %v827_v39 = vsub.f32 %v4525_v37, %v5110_v16 }
 0x10f   : > { %v4458_v49 = vpop.eup %4457  ;;  %v427_v52 = vpop.xlane.xlu0 %426  ;;  %v828_v41 = vsub.f32 %v4526_v40, %v5110_v16 }
 0x110   : > { %v795_v53 = vmax.f32 %v763_v45, 0.0  ;;  %v764_v54 = vsub.f32 %v700_v47, %v732_v46  ;;  %v5133_v55 = vmul.f32 0.00625, %v427_v52  ;;  %v952_v58 = vmul.f32 %v4458_v49, %v824_v51 }
 0x111   : > { %v430_v57 = vpop.xlane.xlu1 %429  ;;  %v951_v11 = vmul.f32 %v4458_v49, %v823_v61 }
 0x112   : > { %v891_v62 = vadd.f32 1e-05, %v795_v53  ;;  %v796_v63 = vmax.f32 %v764_v54, 0.0  ;;  %v5148_v4 = vmul.f32 0.00625, %v430_v57  ;;  %v733_v5 = vmul.f32 %v5133_v55, %v5133_v55  ;;  %v4527_v57 = vld [vmem:[%s5024_s29 + $0x30] sm:$0xff] }
 0x113   : > { %v587_v6 = vpop.xlane.xlu0 %586  ;;  %v4460_v7 = vpop.eup %4459  ;;  %v1028_v17 = vmul.f32 %v5139_v59, %v952_v58  ;;  %v1027_v29 = vmul.f32 %v5153_v3, %v951_v11  ;;  %v829_v16 = vsub.f32 %v4527_v57, %v5112_v19  ;;  %v4528_v58 = vld [vmem:[%s5024_s29 + $0x38] sm:$0xff] }
 0x114   : > { %v892_v8 = vadd.f32 1e-05, %v796_v63  ;;  %v701_v10 = vmul.f32 0.00625, %v587_v6  ;;  %v954_v15 = vmul.f32 %v4460_v7, %v826_v2  ;;  %4465 = vrsqrt.f32 %v891_v62  ;;  %v4322_v63 = vld [vmem:[#allocation7 + $0x128] ss:$20 sps:$4 sm:$0xff]  }
 0x115   : > { %v590_v14 = vpop.xlane.xlu1 %589  ;;  %v734_v21 = vmul.f32 %v5148_v4, %v5148_v4  ;;  %v953_v9 = vmul.f32 %v4460_v7, %v825_v13  ;;  %v1104_v32 = vadd.f32 %v5159_v18, %v1028_v17  ;;  %v1103_v53 = vadd.f32 %v5165_v25, %v1027_v29  ;;  %v4331_v6 = vld [vmem:[#allocation8 + $0x70] ss:$8 sps:$4 sm:$0xff]  }
 0x116   : > { %v765_v20 = vsub.f32 %v701_v10, %v733_v5  ;;  %v702_v22 = vmul.f32 0.00625, %v590_v14  ;;  %4467 = vrsqrt.f32 %v892_v8  ;;  %v1030_v24 = vmul.f32 %v5139_v59, %v954_v15  ;;  %v4323_v5 = vld [vmem:[#allocation7 + $0x240] ss:$20 sps:$4 sm:$0xff]   ;;  %v4326_v57 = vld [vmem:[#allocation7 + $0xd8] ss:$20 sps:$4 sm:$0xff]  }
 0x117   : > { %v433_v23 = vpop.xlane.xlu0 %432  ;;  %v1029_v36 = vmul.f32 %v5153_v3, %v953_v9  ;;  %v830_v60 = vsub.f32 %v4528_v58, %v5112_v19  ;;  %v4529_v9 = vld [vmem:[%s5024_s29 + $0x40] sm:$0xff] }
 0x118   : > { %v797_v26 = vmax.f32 %v765_v20, 0.0  ;;  %v766_v27 = vsub.f32 %v702_v22, %v734_v21  ;;  %v5167_v28 = vmul.f32 0.00625, %v433_v23  ;;  %v1106_v34 = vadd.f32 %v5159_v18, %v1030_v24  ;;  %v4324_v23 = vld [vmem:[#allocation7 + $0x100] ss:$20 sps:$4 sm:$0xff]  }
 0x119   : > { %v4462_v30 = vpop.eup %4461  ;;  %v436_v31 = vpop.xlane.xlu1 %435  ;;  %v1105_v49 = vadd.f32 %v5165_v25, %v1029_v36  ;;  %v4325_v24 = vld [vmem:[#allocation7 + $0x218] ss:$20 sps:$4 sm:$0xff]  }
 0x11a   : > { %v893_v42 = vadd.f32 1e-05, %v797_v26  ;;  %v798_v43 = vmax.f32 %v766_v27, 0.0  ;;  %v5177_v45 = vmul.f32 0.00625, %v436_v31  ;;  %v735_v46 = vmul.f32 %v5167_v28, %v5167_v28  ;;  %v4530_v27 = vld [vmem:[%s5024_s29 + $0x48] sm:$0xff] }
 0x11b   : > { %v593_v47 = vpop.xlane.xlu0 %592  ;;  %v5181_v48 = vpack.c.bf16 %v1106_v34, %v1104_v32  ;;  %v4464_v50 = vpop.eup %4463  ;;  %v956_v54 = vmul.f32 %v4462_v30, %v828_v41  ;;  %v5193_v2 = vpack.c.bf16 %v1105_v49, %v1103_v53  ;;  %v955_v10 = vmul.f32 %v4462_v30, %v827_v39  ;;  %v4336_v32 = vld [vmem:[#allocation8 + $0x60] ss:$8 sps:$4 sm:$0xff]   ;;  %v4531_v49 = vld [vmem:[%s5024_s29 + $0x50] sm:$0xff] }
 0x11c   : > { %v894_v51 = vadd.f32 1e-05, %v798_v43  ;;  %v703_v52 = vmul.f32 0.00625, %v593_v47  ;;  %4469 = vrsqrt.f32 %v893_v42  ;;  %v736_v61 = vmul.f32 %v5177_v45, %v5177_v45 }
 0x11d   : > { %1770 = vmatprep.mubr.bf16.mxu0 %v5181_v48  ;;  %1963 = vmatprep.mubr.bf16.mxu1 %v5181_v48  ;;  %v596_v62 = vpop.xlane.xlu1 %595  ;;  %v958_v8 = vmul.f32 %v4464_v50, %v830_v60  ;;  %v1032_v19 = vmul.f32 %v5139_v59, %v956_v54  ;;  %v957_v11 = vmul.f32 %v4464_v50, %v829_v16  ;;  %v4341_v16 = vld [vmem:[#allocation8 + $0x54] ss:$8 sps:$4 sm:$0xff]  }
 0x11e   : > { %4471 = vrsqrt.f32 %v894_v51  ;;  %v767_v0 = vsub.f32 %v703_v52, %v735_v46  ;;  %v704_v1 = vmul.f32 0.00625, %v596_v62  ;;  %1771 = vmatmul.mubr.bf16.vlgmr.msra.gmra.mxu0 %v5193_v2  ;;  %1964 = vmatmul.mubr.bf16.vlgmr.msra.gmra.mxu1 %v5193_v2  ;;  %v1031_v21 = vmul.f32 %v5153_v3, %v955_v10  ;;  %v4532_v51 = vld [vmem:[%s5024_s29 + $0x58] sm:$0xff] }
 0x11f   : > { %v439_v7 = vpop.xlane.xlu0 %438  ;;  %4028 = vmatpush3.bf16.msra.mxu0 %v4322_v63  ;;  %v1034_v20 = vmul.f32 %v5139_v59, %v958_v8  ;;  %v1033_v22 = vmul.f32 %v5153_v3, %v957_v11  ;;  %v831_v26 = vsub.f32 %v4529_v9, %v5118_v33  ;;  %v832_v29 = vsub.f32 %v4530_v27, %v5118_v33  ;;  %v4327_v63 = vld [vmem:[#allocation7 + $0x1f0] ss:$20 sps:$4 sm:$0xff]   ;;  %v4344_v27 = vld [vmem:[#allocation8 + $0x40] ss:$8 sps:$4 sm:$0xff]  }
 0x120   : > { %v799_v13 = vmax.f32 %v767_v0, 0.0  ;;  %v768_v14 = vsub.f32 %v704_v1, %v736_v61  ;;  %v5198_v15 = vmul.f32 0.00625, %v439_v7  ;;  %4029 = vmatprep.subr.bf16.mxu0 %v4323_v5  ;;  %3018 = vmatpush1.bf16.msra.mxu1 %v4331_v6  ;;  %v1108_v40 = vadd.f32 %v5159_v18, %v1032_v19  ;;  %v4339_v0 = vld [vmem:[#allocation8 + $0x50] ss:$8 sps:$4 sm:$0xff]  }
 0x121   : > { %v442_v17 = vpop.xlane.xlu1 %441  ;;  %v4466_v34 = vpop.eup %4465  ;;  %v1110_v41 = vadd.f32 %v5159_v18, %v1034_v20  ;;  %3019 = vmatprep.subr.bf16.mxu1 %v4338_v12  ;;  %v1107_v46 = vadd.f32 %v5165_v25, %v1031_v21  ;;  %v1109_v47 = vadd.f32 %v5165_v25, %v1033_v22  ;;  %v833_v50 = vsub.f32 %v4531_v49, %v5122_v38  ;;  %v4346_v7 = vld [vmem:[#allocation8 + $0x44] ss:$8 sps:$4 sm:$0xff]   ;;  %v4329_v20 = vld [vmem:[#allocation7 + $0x1c8] ss:$20 sps:$4 sm:$0xff]  }
 0x122   : > { %v895_v30 = vadd.f32 1e-05, %v799_v13  ;;  %v800_v31 = vmax.f32 %v768_v14, 0.0  ;;  %v5207_v36 = vmul.f32 0.00625, %v442_v17  ;;  %v737_v37 = vmul.f32 %v5198_v15, %v5198_v15  ;;  %v4533_v22 = vld [vmem:[%s5024_s29 + $0x60] sm:$0xff] }
 0x123   : > { %v599_v39 = vpop.xlane.xlu0 %598  ;;  %v4468_v33 = vpop.eup %4467  ;;  %v834_v52 = vsub.f32 %v4532_v51, %v5122_v38  ;;  %v5219_v53 = vpack.c.bf16 %v1110_v41, %v1108_v40  ;;  %4030 = vmatpush3.bf16.msra.mxu0 %v4324_v23  ;;  %v5223_v62 = vpack.c.bf16 %v1109_v47, %v1107_v46  ;;  %v960_v1 = vmul.f32 %v4466_v34, %v832_v29  ;;  %v4328_v17 = vld [vmem:[#allocation7 + $0xb0] ss:$20 sps:$4 sm:$0xff]   ;;  %v4536_v49 = vld [vmem:[%s5024_s29 + $0x78] sm:$0xff] }
 0x124   : > { %v896_v42 = vadd.f32 1e-05, %v800_v31  ;;  %v705_v43 = vmul.f32 0.00625, %v599_v39  ;;  %4473 = vrsqrt.f32 %v895_v30  ;;  %v738_v60 = vmul.f32 %v5207_v36, %v5207_v36  ;;  %4031 = vmatprep.subr.bf16.mxu0 %v4325_v24  ;;  %3020 = vmatpush1.bf16.msra.mxu1 %v4336_v32  ;;  %v4534_v39 = vld [vmem:[%s5024_s29 + $0x68] sm:$0xff]  ;;  %v4535_v46 = vld [vmem:[%s5024_s29 + $0x70] sm:$0xff] }
 0x125   : > { %v602_v54 = vpop.xlane.xlu1 %601  ;;  %1780 = vmatprep.mubr.bf16.mxu0 %v5219_v53  ;;  %1973 = vmatprep.mubr.bf16.mxu1 %v5219_v53  ;;  %v962_v5 = vmul.f32 %v4468_v33, %v834_v52  ;;  %v959_v6 = vmul.f32 %v4466_v34, %v831_v26  ;;  %v961_v11 = vmul.f32 %v4468_v33, %v833_v50 }
 0x126   : > { %v769_v58 = vsub.f32 %v705_v43, %v737_v37  ;;  %v706_v61 = vmul.f32 0.00625, %v602_v54  ;;  %4475 = vrsqrt.f32 %v896_v42  ;;  %1781 = vmatmul.mubr.bf16.gmra.mxu0 %v5223_v62  ;;  %1974 = vmatmul.mubr.bf16.gmra.mxu1 %v5223_v62  ;;  %v1036_v13 = vmul.f32 %v5139_v59, %v960_v1  ;;  %v4349_v43 = vld [vmem:[#allocation8 + $0x34] ss:$8 sps:$4 sm:$0xff]  }
 0x127   : > { %v445_v38 = vpop.xlane.xlu0 %444  ;;  %v1038_v14 = vmul.f32 %v5139_v59, %v962_v5  ;;  %4032 = vmatpush3.bf16.msra.mxu0 %v4326_v57  ;;  %3021 = vmatprep.subr.bf16.mxu1 %v4341_v16  ;;  %v835_v23 = vsub.f32 %v4533_v22, %v5133_v55  ;;  %v1035_v26 = vmul.f32 %v5153_v3, %v959_v6  ;;  %v4330_v54 = vld [vmem:[#allocation7 + $0x88] ss:$20 sps:$4 sm:$0xff]  }
 0x128   : > { %v801_v8 = vmax.f32 %v769_v58, 0.0  ;;  %v770_v19 = vsub.f32 %v706_v61, %v738_v60  ;;  %v5229_v10 = vmul.f32 0.00625, %v445_v38  ;;  %4033 = vmatprep.subr.bf16.mxu0 %v4327_v63  ;;  %3022 = vmatpush1.bf16.msra.mxu1 %v4339_v0  ;;  %v1112_v34 = vadd.f32 %v5159_v18, %v1036_v13  ;;  %v4334_v60 = vld [vmem:[#allocation7 + $0x1a0] ss:$20 sps:$4 sm:$0xff]  }
 0x129   : > { %v448_v12 = vpop.xlane.xlu1 %447  ;;  %v4470_v21 = vpop.eup %4469  ;;  %v1114_v37 = vadd.f32 %v5159_v18, %v1038_v14  ;;  %3023 = vmatprep.subr.bf16.mxu1 %v4346_v7  ;;  %v836_v40 = vsub.f32 %v4534_v39, %v5133_v55  ;;  %v1037_v42 = vmul.f32 %v5153_v3, %v961_v11  ;;  %v837_v47 = vsub.f32 %v4535_v46, %v5148_v4  ;;  %v4347_v61 = vld [vmem:[#allocation8 + $0x30] ss:$8 sps:$4 sm:$0xff]   ;;  %v4335_v14 = vld [vmem:[#allocation7 + $0x60] ss:$20 sps:$4 sm:$0xff]  }
 0x12a   : > { %v897_v24 = vadd.f32 1e-05, %v801_v8  ;;  %v802_v9 = vmax.f32 %v770_v19, 0.0  ;;  %v5236_v30 = vmul.f32 0.00625, %v448_v12  ;;  %v739_v31 = vmul.f32 %v5229_v10, %v5229_v10  ;;  %v4539_v46 = vld [vmem:[%s5024_s29 + $0x98] sm:$0xff] }
 0x12b   : > { %v4472_v29 = vpop.eup %4471  ;;  %v605_v32 = vpop.xlane.xlu0 %604  ;;  %v838_v50 = vsub.f32 %v4536_v49, %v5148_v4  ;;  %v5249_v51 = vpack.c.bf16 %v1114_v37, %v1112_v34  ;;  %4034 = vmatpush3.bf16.msra.mxu0 %v4328_v17  ;;  %v1111_v58 = vadd.f32 %v5165_v25, %v1035_v26  ;;  %v1113_v4 = vadd.f32 %v5165_v25, %v1037_v42  ;;  %v4354_v8 = vld [vmem:[#allocation8 + $0x24] ss:$8 sps:$4 sm:$0xff]  }
 0x12c   : > { %v898_v41 = vadd.f32 1e-05, %v802_v9  ;;  %v707_v33 = vmul.f32 0.00625, %v605_v32  ;;  %4477 = vrsqrt.f32 %v897_v24  ;;  %v740_v55 = vmul.f32 %v5236_v30, %v5236_v30  ;;  %4035 = vmatprep.subr.bf16.mxu0 %v4329_v20  ;;  %3024 = vmatpush1.bf16.msra.mxu1 %v4344_v27  ;;  %v4342_v17 = vld [vmem:[#allocation7 + $0x178] ss:$20 sps:$4 sm:$0xff]  }
 0x12d   : > { %v608_v52 = vpop.xlane.xlu1 %607  ;;  %1790 = vmatprep.mubr.bf16.mxu0 %v5249_v51  ;;  %1983 = vmatprep.mubr.bf16.mxu1 %v5249_v51  ;;  %v964_v0 = vmul.f32 %v4470_v21, %v836_v40  ;;  %v966_v38 = vmul.f32 %v4472_v29, %v838_v50  ;;  %v963_v7 = vmul.f32 %v4470_v21, %v835_v23  ;;  %v4352_v21 = vld [vmem:[#allocation8 + $0x20] ss:$8 sps:$4 sm:$0xff]  }
 0x12e   : > { %v771_v57 = vsub.f32 %v707_v33, %v739_v31  ;;  %v708_v16 = vmul.f32 0.00625, %v608_v52  ;;  %4479 = vrsqrt.f32 %v898_v41  ;;  %3025 = vmatprep.subr.bf16.mxu1 %v4349_v43  ;;  %v5259_v19 = vpack.c.bf16 %v1113_v4, %v1111_v58  ;;  %v4537_v34 = vld [vmem:[%s5024_s29 + $0x80] sm:$0xff]  ;;  %v4538_v42 = vld [vmem:[%s5024_s29 + $0x88] sm:$0xff] }
 0x12f   : > { %v451_v63 = vpop.xlane.xlu0 %450  ;;  %v1040_v12 = vmul.f32 %v5139_v59, %v964_v0  ;;  %v1042_v13 = vmul.f32 %v5139_v59, %v966_v38  ;;  %4036 = vmatpush3.bf16.msra.mxu0 %v4330_v54  ;;  %v965_v9 = vmul.f32 %v4472_v29, %v837_v47  ;;  %v839_v37 = vsub.f32 %v4537_v34, %v5167_v28  ;;  %v4357_v33 = vld [vmem:[#allocation8 + $0x14] ss:$8 sps:$4 sm:$0xff]   ;;  %v4343_v52 = vld [vmem:[#allocation7 + $0x38] ss:$20 sps:$4 sm:$0xff]   ;;  %v4350_v58 = vld [vmem:[#allocation7 + $0x150] ss:$20 sps:$4 sm:$0xff]  }
 0x130   : > { %v803_v1 = vmax.f32 %v771_v57, 0.0  ;;  %v772_v5 = vsub.f32 %v708_v16, %v740_v55  ;;  %v5257_v6 = vmul.f32 0.00625, %v451_v63  ;;  %4037 = vmatprep.subr.bf16.mxu0 %v4334_v60  ;;  %3026 = vmatpush1.bf16.msra.mxu1 %v4347_v61  ;;  %v1039_v41 = vmul.f32 %v5153_v3, %v963_v7  ;;  %v4360_v0 = vld [vmem:[#allocation8 + $0x4] ss:$8 sps:$4 sm:$0xff]  }
 0x131   : > { %v454_v11 = vpop.xlane.xlu1 %453  ;;  %v4474_v20 = vpop.eup %4473  ;;  %1791 = vmatmul.mubr.bf16.gmra.mxu0 %v5259_v19  ;;  %1984 = vmatmul.mubr.bf16.gmra.mxu1 %v5259_v19  ;;  %v1116_v31 = vadd.f32 %v5159_v18, %v1040_v12  ;;  %v1118_v32 = vadd.f32 %v5159_v18, %v1042_v13  ;;  %v840_v43 = vsub.f32 %v4538_v42, %v5167_v28  ;;  %v4355_v28 = vld [vmem:[#allocation8 + $0x10] ss:$8 sps:$4 sm:$0xff]  }
 0x132   : > { %v899_v22 = vadd.f32 1e-05, %v803_v1  ;;  %v804_v24 = vmax.f32 %v772_v5, 0.0  ;;  %v5265_v23 = vmul.f32 0.00625, %v454_v11  ;;  %v741_v26 = vmul.f32 %v5257_v6, %v5257_v6  ;;  %3027 = vmatprep.subr.bf16.mxu1 %v4354_v8  ;;  %v4540_v8 = vld [vmem:[%s5024_s29 + $0x90] sm:$0xff] }
 0x133   : > { %v611_v27 = vpop.xlane.xlu0 %610  ;;  %v4476_v29 = vpop.eup %4475  ;;  %v842_v47 = vsub.f32 %v4539_v46, %v5177_v45  ;;  %v5278_v49 = vpack.c.bf16 %v1118_v32, %v1116_v31  ;;  %4038 = vmatpush3.bf16.msra.mxu0 %v4335_v14  ;;  %v1041_v16 = vmul.f32 %v5153_v3, %v965_v9  ;;  %v1115_v60 = vadd.f32 %v5165_v25, %v1039_v41  ;;  %v4541_v31 = vld [vmem:[%s5024_s29 + $0xa0] sm:$0xff]  ;;  %v4542_v46 = vld [vmem:[%s5024_s29 + $0xa8] sm:$0xff] }
 0x134   : > { %v900_v39 = vadd.f32 1e-05, %v804_v24  ;;  %v709_v40 = vmul.f32 0.00625, %v611_v27  ;;  %4481 = vrsqrt.f32 %v899_v22  ;;  %v742_v57 = vmul.f32 %v5265_v23, %v5265_v23  ;;  %4039 = vmatprep.subr.bf16.mxu0 %v4342_v17  ;;  %3028 = vmatpush1.bf16.msra.mxu1 %v4352_v21  ;;  %v4351_v22 = vld [vmem:[#allocation7 + $0x10] ss:$20 sps:$4 sm:$0xff]  }
 0x135   : > { %v614_v50 = vpop.xlane.xlu1 %613  ;;  %1800 = vmatprep.mubr.bf16.mxu0 %v5278_v49  ;;  %1993 = vmatprep.mubr.bf16.mxu1 %v5278_v49  ;;  %v968_v4 = vmul.f32 %v4474_v20, %v840_v43  ;;  %v970_v63 = vmul.f32 %v4476_v29, %v842_v47  ;;  %v1117_v5 = vadd.f32 %v5165_v25, %v1041_v16  ;;  %v4358_v27 = vld [vmem:[#allocation8] ss:$8 sps:$4 sm:$0xff]  }
 0x136   : > { %v773_v54 = vsub.f32 %v709_v40, %v741_v26  ;;  %v710_v55 = vmul.f32 0.00625, %v614_v50  ;;  %4483 = vrsqrt.f32 %v900_v39  ;;  %3029 = vmatprep.subr.bf16.mxu1 %v4357_v33  ;;  %v841_v11 = vsub.f32 %v4540_v8, %v5177_v45  ;;  %v4363_v39 = vld [vmem:[#allocation8 + $0xf4] ss:$8 sps:$4 sm:$0xff]  }
 0x137   : > { %v457_v61 = vpop.xlane.xlu0 %456  ;;  %v1044_v13 = vmul.f32 %v5139_v59, %v968_v4  ;;  %v1046_v14 = vmul.f32 %v5139_v59, %v970_v63  ;;  %v967_v17 = vmul.f32 %v4474_v20, %v839_v37  ;;  %4040 = vmatpush3.bf16.msra.mxu0 %v4343_v52  ;;  %v5293_v26 = vpack.c.bf16 %v1117_v5, %v1115_v60  ;;  %v4543_v50 = vld [vmem:[%s5024_s29 + $0xb8] sm:$0xff]  ;;  %v4366_v63 = vld [vmem:[#allocation8 + $0xe4] ss:$8 sps:$4 sm:$0xff]  }
 0x138   : > { %v805_v38 = vmax.f32 %v773_v54, 0.0  ;;  %v774_v1 = vsub.f32 %v710_v55, %v742_v57  ;;  %v5287_v7 = vmul.f32 0.00625, %v457_v61  ;;  %4041 = vmatprep.subr.bf16.mxu0 %v4350_v58  ;;  %3030 = vmatpush1.bf16.msra.mxu1 %v4355_v28  ;;  %v843_v45 = vsub.f32 %v4541_v31, %v5198_v15  ;;  %v4361_v28 = vld [vmem:[#allocation8 + $0xf0] ss:$8 sps:$4 sm:$0xff]  }
 0x139   : > { %v460_v12 = vpop.xlane.xlu1 %459  ;;  %v4478_v24 = vpop.eup %4477  ;;  %v969_v37 = vmul.f32 %v4476_v29, %v841_v11  ;;  %3031 = vmatprep.subr.bf16.mxu1 %v4360_v0  ;;  %1801 = vmatmul.mubr.bf16.gmra.mxu0 %v5293_v26  ;;  %v1120_v42 = vadd.f32 %v5159_v18, %v1044_v13  ;;  %v1122_v43 = vadd.f32 %v5159_v18, %v1046_v14  ;;  %v4544_v0 = vld [vmem:[%s5024_s29 + $0xb0] sm:$0xff] }
 0x13a   : > { %v901_v9 = vadd.f32 1e-05, %v805_v38  ;;  %v806_v21 = vmax.f32 %v774_v1, 0.0  ;;  %v5297_v32 = vmul.f32 0.00625, %v460_v12  ;;  %v743_v20 = vmul.f32 %v5287_v7, %v5287_v7  ;;  %1994 = vmatmul.mubr.bf16.gmra.mxu1 %v5293_v26 }
 0x13b   : > { %v617_v34 = vpop.xlane.xlu0 %616  ;;  %v4480_v40 = vpop.eup %4479  ;;  %v844_v47 = vsub.f32 %v4542_v46, %v5198_v15  ;;  %v846_v52 = vsub.f32 %v4543_v50, %v5207_v36  ;;  %v1043_v54 = vmul.f32 %v5153_v3, %v967_v17  ;;  %4042 = vmatpush3.bf16.msra.mxu0 %v4351_v22  ;;  %v5310_v55 = vpack.c.bf16 %v1122_v43, %v1120_v42  ;;  %v4545_v46 = vld [vmem:[%s5024_s29 + $0xc0] sm:$0xff]  ;;  %v4546_v50 = vld [vmem:[%s5024_s29 + $0xc8] sm:$0xff] }
 0x13c   : > { %v902_v41 = vadd.f32 1e-05, %v806_v21  ;;  %v711_v33 = vmul.f32 0.00625, %v617_v34  ;;  %4485 = vrsqrt.f32 %v901_v9  ;;  %v744_v16 = vmul.f32 %v5297_v32, %v5297_v32  ;;  %3032 = vmatpush1.bf16.msra.mxu1 %v4358_v27  ;;  %v4364_v27 = vld [vmem:[#allocation8 + $0xe0] ss:$8 sps:$4 sm:$0xff]  }
 0x13d   : > { %v620_v29 = vpop.xlane.xlu1 %619  ;;  %v1045_v15 = vmul.f32 %v5153_v3, %v969_v37  ;;  %v972_v61 = vmul.f32 %v4478_v24, %v844_v47  ;;  %v974_v4 = vmul.f32 %v4480_v40, %v846_v52  ;;  %3033 = vmatprep.subr.bf16.mxu1 %v4363_v39  ;;  %v845_v38 = vsub.f32 %v4544_v0, %v5207_v36 }
 0x13e   : > { %v775_v57 = vsub.f32 %v711_v33, %v743_v20  ;;  %v712_v58 = vmul.f32 0.00625, %v620_v29  ;;  %4487 = vrsqrt.f32 %v902_v41  ;;  %1810 = vmatprep.mubr.bf16.mxu0 %v5310_v55  ;;  %2003 = vmatprep.mubr.bf16.mxu1 %v5310_v55  ;;  %v1119_v11 = vadd.f32 %v5165_v25, %v1043_v54  ;;  %v4369_v41 = vld [vmem:[#allocation8 + $0xd4] ss:$8 sps:$4 sm:$0xff]  }
 0x13f   : > { %v463_v60 = vpop.xlane.xlu0 %462  ;;  %v1121_v12 = vadd.f32 %v5165_v25, %v1045_v15  ;;  %v1048_v14 = vmul.f32 %v5139_v59, %v972_v61  ;;  %v1050_v17 = vmul.f32 %v5139_v59, %v974_v4  ;;  %v971_v21 = vmul.f32 %v4478_v24, %v843_v45  ;;  %v4547_v29 = vld [vmem:[%s5024_s29 + $0xd8] sm:$0xff] }
 0x140   : > { %v807_v1 = vmax.f32 %v775_v57, 0.0  ;;  %v776_v5 = vsub.f32 %v712_v58, %v744_v16  ;;  %v5319_v8 = vmul.f32 0.00625, %v463_v60  ;;  %3034 = vmatpush2.bf16.msra.mxu1 %v4361_v28  ;;  %v973_v39 = vmul.f32 %v4480_v40, %v845_v38  ;;  %v4367_v15 = vld [vmem:[#allocation8 + $0xd0] ss:$8 sps:$4 sm:$0xff]  }
 0x141   : > { %v466_v13 = vpop.xlane.xlu1 %465  ;;  %v5325_v22 = vpop.eup %4481  ;;  %v5327_v31 = vpack.c.bf16 %v1121_v12, %v1119_v11  ;;  %3035 = vmatprep.subr.bf16.mxu1 %v4366_v63  ;;  %v1124_v24 = vadd.f32 %v5159_v18, %v1048_v14  ;;  %v1126_v45 = vadd.f32 %v5159_v18, %v1050_v17  ;;  %v847_v47 = vsub.f32 %v4545_v46, %v5229_v10  ;;  %v4372_v17 = vld [vmem:[#allocation8 + $0xc4] ss:$8 sps:$4 sm:$0xff]  }
 0x142   : > { %v903_v36 = vadd.f32 1e-05, %v807_v1  ;;  %v808_v9 = vmax.f32 %v776_v5, 0.0  ;;  %v5329_v20 = vmul.f32 0.00625, %v466_v13  ;;  %v745_v34 = vmul.f32 %v5319_v8, %v5319_v8 }
 0x143   : > { %v623_v37 = vpop.xlane.xlu0 %622  ;;  %v5333_v33 = vpop.eup %4483  ;;  %v848_v52 = vsub.f32 %v4546_v50, %v5229_v10  ;;  %v850_v54 = vsub.f32 %v4547_v29, %v5236_v30  ;;  %1811 = vmatmul.mubr.bf16.gmra.mxu0 %v5327_v31  ;;  %2004 = vmatmul.mubr.bf16.gmra.mxu1 %v5327_v31  ;;  %v5345_v16 = vpack.c.bf16 %v1126_v45, %v1124_v24 }
 0x144   : > { %v904_v42 = vadd.f32 1e-05, %v808_v9  ;;  %v713_v43 = vmul.f32 0.00625, %v623_v37  ;;  %4489 = vrsqrt.f32 %v903_v36  ;;  %v746_v58 = vmul.f32 %v5329_v20, %v5329_v20  ;;  %3036 = vmatpush2.bf16.msra.mxu1 %v4364_v27  ;;  %v4548_v9 = vld [vmem:[%s5024_s29 + $0xd0] sm:$0xff]  ;;  %v4549_v27 = vld [vmem:[%s5024_s29 + $0xe0] sm:$0xff] }
 0x145   : > { %v626_v40 = vpop.xlane.xlu1 %625  ;;  %v1047_v10 = vmul.f32 %v5153_v3, %v971_v21  ;;  %v1049_v60 = vmul.f32 %v5153_v3, %v973_v39  ;;  %v976_v4 = vmul.f32 %v5325_v22, %v848_v52  ;;  %v978_v63 = vmul.f32 %v5333_v33, %v850_v54  ;;  %3037 = vmatprep.subr.bf16.mxu1 %v4369_v41  ;;  %v4550_v37 = vld [vmem:[%s5024_s29 + $0xe8] sm:$0xff] }
 0x146   : > { %v777_v57 = vsub.f32 %v713_v43, %v745_v34  ;;  %v714_v28 = vmul.f32 0.00625, %v626_v40  ;;  %4491 = vrsqrt.f32 %v904_v42  ;;  %1820 = vmatprep.mubr.bf16.mxu0 %v5345_v16  ;;  %2013 = vmatprep.mubr.bf16.mxu1 %v5345_v16  ;;  %v849_v21 = vsub.f32 %v4548_v9, %v5236_v30  ;;  %v4370_v42 = vld [vmem:[#allocation8 + $0xc0] ss:$8 sps:$4 sm:$0xff]   ;;  %v5379_v40 = vld [vmem:[%s5024_s29 + $0xf0] sm:$0xff] }
 0x147   : > { %v469_v61 = vpop.xlane.xlu0 %468  ;;  %v1123_v5 = vadd.f32 %v5165_v25, %v1047_v10  ;;  %v1125_v11 = vadd.f32 %v5165_v25, %v1049_v60  ;;  %v1052_v13 = vmul.f32 %v5139_v59, %v976_v4  ;;  %v1054_v14 = vmul.f32 %v5139_v59, %v978_v63  ;;  %v4373_v9 = vld [vmem:[#allocation8 + $0xb0] ss:$8 sps:$4 sm:$0xff]  }
 0x148   : > { %v809_v0 = vmax.f32 %v777_v57, 0.0  ;;  %v778_v38 = vsub.f32 %v714_v28, %v746_v58  ;;  %v5355_v1 = vmul.f32 0.00625, %v469_v61  ;;  %v851_v34 = vsub.f32 %v4549_v27, %v5257_v6  ;;  %3038 = vmatpush2.bf16.msra.mxu1 %v4367_v15  ;;  %v4552_v58 = vld [vmem:[%s5024_s29 + $0xf8] sm:$0xff]  ;;  %v5386_v15 = vld [vmem:[%s5024_s29 + $0x100] sm:$0xff] }
 0x149   : > { %v472_v12 = vpop.xlane.xlu1 %471  ;;  %v4486_v36 = vpop.eup %4485  ;;  %v852_v39 = vsub.f32 %v4550_v37, %v5257_v6  ;;  %v5367_v43 = vpack.c.bf16 %v1125_v11, %v1123_v5  ;;  %v975_v46 = vmul.f32 %v5325_v22, %v847_v47  ;;  %3039 = vmatprep.subr.bf16.mxu1 %v4372_v17  ;;  %v1128_v29 = vadd.f32 %v5159_v18, %v1052_v13 }
 0x14a   : > { %v810_v41 = vmax.f32 %v778_v38, 0.0  ;;  %v5369_v24 = vmul.f32 0.00625, %v472_v12  ;;  %v747_v45 = vmul.f32 %v5355_v1, %v5355_v1  ;;  %v905_v52 = vadd.f32 1e-05, %v809_v0 }
 0x14b   : > { %v629_v30 = vpop.xlane.xlu0 %628  ;;  %v5374_v50 = vpop.eup %4487  ;;  %v1130_v54 = vadd.f32 %v5159_v18, %v1054_v14  ;;  %v853_v57 = vsub.f32 %v5379_v40, %v5265_v23  ;;  %v854_v28 = vsub.f32 %v4552_v58, %v5265_v23  ;;  %v855_v22 = vsub.f32 %v5386_v15, %v5287_v7  ;;  %1821 = vmatmul.mubr.bf16.gmra.mxu0 %v5367_v43  ;;  %v5470_v15 = vld [vmem:[%s5024_s29 + $0x140] sm:$0xff] }
 0x14c   : > { %v715_v6 = vmul.f32 0.00625, %v629_v30  ;;  %v906_v47 = vadd.f32 1e-05, %v810_v41  ;;  %2014 = vmatmul.mubr.bf16.gmra.mxu1 %v5367_v43  ;;  %v748_v4 = vmul.f32 %v5369_v24, %v5369_v24  ;;  %v977_v0 = vmul.f32 %v5333_v33, %v849_v21 }
 0x14d   : > { %v632_v10 = vpop.xlane.xlu1 %631  ;;  %v5392_v61 = vpack.c.bf16 %v1130_v54, %v1128_v29  ;;  %3040 = vmatpush2.bf16.msra.mxu1 %v4370_v42  ;;  %v1051_v38 = vmul.f32 %v5153_v3, %v975_v46  ;;  %v980_v11 = vmul.f32 %v4486_v36, %v852_v39  ;;  %v982_v12 = vmul.f32 %v5374_v50, %v854_v28  ;;  %v4375_v39 = vld [vmem:[#allocation8 + $0xb4] ss:$8 sps:$4 sm:$0xff]   ;;  %v4554_v42 = vld [vmem:[%s5024_s29 + $0x108] sm:$0xff] }
 0x14e   : > { %v779_v60 = vsub.f32 %v715_v6, %v747_v45  ;;  %v716_v63 = vmul.f32 0.00625, %v632_v10  ;;  %4493 = vrsqrt.f32 %v905_v52  ;;  %v1053_v33 = vmul.f32 %v5153_v3, %v977_v0  ;;  %3041 = vmatprep.subr.bf16.mxu1 %v4375_v39  ;;  %v4556_v0 = vld [vmem:[%s5024_s29 + $0x118] sm:$0xff] }
 0x14f   : > { %v475_v5 = vpop.xlane.xlu0 %474  ;;  %1830 = vmatprep.mubr.bf16.mxu0 %v5392_v61  ;;  %2023 = vmatprep.mubr.bf16.mxu1 %v5392_v61  ;;  %4495 = vrsqrt.f32 %v906_v47  ;;  %v1056_v27 = vmul.f32 %v5139_v59, %v980_v11  ;;  %v1058_v37 = vmul.f32 %v5139_v59, %v982_v12  ;;  %v856_v45 = vsub.f32 %v4554_v42, %v5287_v7 }
 0x150   : > { %v811_v13 = vmax.f32 %v779_v60, 0.0  ;;  %v780_v14 = vsub.f32 %v716_v63, %v748_v4  ;;  %v5401_v17 = vmul.f32 0.00625, %v475_v5  ;;  %v979_v52 = vmul.f32 %v4486_v36, %v851_v34  ;;  %v5419_v36 = vld [vmem:[%s5024_s29 + $0x110] sm:$0xff] }
 0x151   : > { %v478_v21 = vpop.xlane.xlu1 %477  ;;  %v4490_v41 = vpop.eup %4489  ;;  %v1127_v6 = vadd.f32 %v5165_v25, %v1051_v38  ;;  %v1129_v29 = vadd.f32 %v5165_v25, %v1053_v33  ;;  %v1132_v60 = vadd.f32 %v5159_v18, %v1056_v27  ;;  %v1134_v4 = vadd.f32 %v5159_v18, %v1058_v37  ;;  %3042 = vmatpush2.bf16.msra.mxu1 %v4373_v9 }
 0x152   : > { %v907_v30 = vadd.f32 1e-05, %v811_v13  ;;  %v812_v46 = vmax.f32 %v780_v14, 0.0  ;;  %v5410_v54 = vmul.f32 0.00625, %v478_v21  ;;  %v749_v58 = vmul.f32 %v5401_v17, %v5401_v17 }
 0x153   : > { %v635_v28 = vpop.xlane.xlu0 %634  ;;  %v5416_v63 = vpop.eup %4491  ;;  %v857_v34 = vsub.f32 %v5419_v36, %v5297_v32  ;;  %v858_v38 = vsub.f32 %v4556_v0, %v5297_v32  ;;  %v5425_v5 = vpack.c.bf16 %v1129_v29, %v1127_v6  ;;  %v5427_v13 = vpack.c.bf16 %v1134_v4, %v1132_v60  ;;  %v4376_v6 = vld [vmem:[#allocation8 + $0xa0] ss:$8 sps:$4 sm:$0xff]  }
 0x154   : > { %v908_v47 = vadd.f32 1e-05, %v812_v46  ;;  %v717_v10 = vmul.f32 0.00625, %v635_v28  ;;  %4497 = vrsqrt.f32 %v907_v30  ;;  %v750_v14 = vmul.f32 %v5410_v54, %v5410_v54  ;;  %v5444_v29 = vld [vmem:[%s5024_s29 + $0x120] sm:$0xff] }
 0x155   : > { %v638_v11 = vpop.xlane.xlu1 %637  ;;  %1831 = vmatmul.mubr.bf16.gmra.mxu0 %v5425_v5  ;;  %2024 = vmatmul.mubr.bf16.gmra.mxu1 %v5425_v5  ;;  %v981_v33 = vmul.f32 %v5374_v50, %v853_v57  ;;  %v1055_v21 = vmul.f32 %v5153_v3, %v979_v52  ;;  %v984_v37 = vmul.f32 %v4490_v41, %v856_v45  ;;  %v4558_v50 = vld [vmem:[%s5024_s29 + $0x128] sm:$0xff] }
 0x156   : > { %v781_v12 = vsub.f32 %v717_v10, %v749_v58  ;;  %v718_v9 = vmul.f32 0.00625, %v638_v11  ;;  %4499 = vrsqrt.f32 %v908_v47  ;;  %1840 = vmatprep.mubr.bf16.mxu0 %v5427_v13  ;;  %2033 = vmatprep.mubr.bf16.mxu1 %v5427_v13  ;;  %v986_v46 = vmul.f32 %v5416_v63, %v858_v38  ;;  %v4378_v58 = vld [vmem:[#allocation8 + $0xa4] ss:$8 sps:$4 sm:$0xff]  }
 0x157   : > { %v481_v27 = vpop.xlane.xlu0 %480  ;;  %v860_v40 = vsub.f32 %v4558_v50, %v5319_v8  ;;  %v1057_v57 = vmul.f32 %v5153_v3, %v981_v33  ;;  %v1060_v52 = vmul.f32 %v5139_v59, %v984_v37  ;;  %v1131_v10 = vadd.f32 %v5165_v25, %v1055_v21  ;;  %3043 = vmatprep.subr.bf16.mxu1 %v4378_v58  ;;  %v4560_v33 = vld [vmem:[%s5024_s29 + $0x138] sm:$0xff] }
 0x158   : > { %v813_v39 = vmax.f32 %v781_v12, 0.0  ;;  %v782_v42 = vsub.f32 %v718_v9, %v750_v14  ;;  %v5440_v30 = vmul.f32 0.00625, %v481_v27  ;;  %v983_v60 = vmul.f32 %v4490_v41, %v855_v22  ;;  %v5463_v14 = vld [vmem:[%s5024_s29 + $0x130] sm:$0xff]  ;;  %3044 = vmatpush2.bf16.msra.mxu1 %v4376_v6  ;;  %v5518_v22 = vld [vmem:[%s5024_s29 + $0x160] sm:$0xff] }
 0x159   : > { %v484_v45 = vpop.xlane.xlu1 %483  ;;  %v1133_v4 = vadd.f32 %v5165_v25, %v1057_v57  ;;  %v1062_v12 = vmul.f32 %v5139_v59, %v986_v46  ;;  %v862_v7 = vsub.f32 %v4560_v33, %v5329_v20  ;;  %v4562_v57 = vld [vmem:[%s5024_s29 + $0x148] sm:$0xff] }
 0x15a   : > { %v909_v28 = vadd.f32 1e-05, %v813_v39  ;;  %v814_v47 = vmax.f32 %v782_v42, 0.0  ;;  %v5457_v0 = vmul.f32 0.00625, %v484_v45  ;;  %v751_v38 = vmul.f32 %v5440_v30, %v5440_v30 }
 0x15b   : > { %v641_v11 = vpop.xlane.xlu0 %640  ;;  %v5474_v21 = vpop.eup %4493  ;;  %v5476_v37 = vpack.c.bf16 %v1133_v4, %v1131_v10  ;;  %v1136_v39 = vadd.f32 %v5159_v18, %v1060_v52  ;;  %v1138_v42 = vadd.f32 %v5159_v18, %v1062_v12  ;;  %v864_v45 = vsub.f32 %v4562_v57, %v5355_v1 }
 0x15c   : > { %v719_v41 = vmul.f32 0.00625, %v641_v11  ;;  %v910_v27 = vadd.f32 1e-05, %v814_v47  ;;  %v4496_v50 = vpop.eup %4495  ;;  %v752_v11 = vmul.f32 %v5457_v0, %v5457_v0  ;;  %4501 = vrsqrt.f32 %v909_v28 }
 0x15d   : > { %v644_v46 = vpop.xlane.xlu1 %643  ;;  %1841 = vmatmul.mubr.bf16.gmra.mxu0 %v5476_v37  ;;  %2034 = vmatmul.mubr.bf16.gmra.mxu1 %v5476_v37  ;;  %v5486_v47 = vpack.c.bf16 %v1138_v42, %v1136_v39  ;;  %v985_v52 = vmul.f32 %v5416_v63, %v857_v34  ;;  %v1059_v10 = vmul.f32 %v5153_v3, %v983_v60  ;;  %v4381_v34 = vld [vmem:[#allocation8 + $0x94] ss:$8 sps:$4 sm:$0xff]  }
 0x15e   : > { %v783_v58 = vsub.f32 %v719_v41, %v751_v38  ;;  %v720_v6 = vmul.f32 0.00625, %v644_v46  ;;  %v988_v28 = vmul.f32 %v5474_v21, %v860_v40  ;;  %v4379_v41 = vld [vmem:[#allocation8 + $0x90] ss:$8 sps:$4 sm:$0xff]   ;;  %4503 = vrsqrt.f32 %v910_v27  ;;  %3045 = vmatprep.subr.bf16.mxu1 %v4381_v34 }
 0x15f   : > { %v487_v4 = vpop.xlane.xlu0 %486  ;;  %v5497_v46 = vld [vmem:[%s5024_s29 + $0x150] sm:$0xff]  ;;  %1850 = vmatprep.mubr.bf16.mxu0 %v5486_v47  ;;  %2043 = vmatprep.mubr.bf16.mxu1 %v5486_v47  ;;  %v1061_v32 = vmul.f32 %v5153_v3, %v985_v52  ;;  %v990_v36 = vmul.f32 %v4496_v50, %v862_v7  ;;  %v4564_v40 = vld [vmem:[%s5024_s29 + $0x158] sm:$0xff]  ;;  %v1135_v27 = vadd.f32 %v5165_v25, %v1059_v10 }
 0x160   : > { %v815_v38 = vmax.f32 %v783_v58, 0.0  ;;  %v784_v12 = vsub.f32 %v720_v6, %v752_v11  ;;  %v5493_v33 = vmul.f32 0.00625, %v487_v4  ;;  %v866_v42 = vsub.f32 %v4564_v40, %v5369_v24  ;;  %3046 = vmatpush2.bf16.msra.mxu1 %v4379_v41 }
 0x161   : > { %v490_v63 = vpop.xlane.xlu1 %489  ;;  %v5504_v60 = vpop.eup %4497  ;;  %v1137_v11 = vadd.f32 %v5165_v25, %v1061_v32  ;;  %v1064_v7 = vmul.f32 %v5139_v59, %v988_v28  ;;  %v1066_v32 = vmul.f32 %v5139_v59, %v990_v36  ;;  %v6808_v36 = vsub.f32 %v5444_v29, %v5319_v8 }
 0x162   : > { %v911_v57 = vadd.f32 1e-05, %v815_v38  ;;  %v816_v58 = vmax.f32 %v784_v12, 0.0  ;;  %v5510_v6 = vmul.f32 0.00625, %v490_v63  ;;  %v753_v52 = vmul.f32 %v5493_v33, %v5493_v33  ;;  %v5524_v63 = vld [vmem:[%s5024_s29 + $0x168] sm:$0xff] }
 0x163   : > { %v647_v4 = vpop.xlane.xlu0 %646  ;;  %v5515_v39 = vpop.eup %4499  ;;  %v5528_v28 = vpack.c.bf16 %v1137_v11, %v1135_v27  ;;  %v1140_v34 = vadd.f32 %v5159_v18, %v1064_v7  ;;  %v1142_v38 = vadd.f32 %v5159_v18, %v1066_v32  ;;  %v6809_v27 = vsub.f32 %v5463_v14, %v5329_v20  ;;  %v4384_v7 = vld [vmem:[#allocation8 + $0x174] ss:$8 sps:$4 sm:$0xff]  }
 0x164   : > { %v912_v12 = vadd.f32 1e-05, %v816_v58  ;;  %v721_v10 = vmul.f32 0.00625, %v647_v4  ;;  %4505 = vrsqrt.f32 %v911_v57  ;;  %v754_v58 = vmul.f32 %v5510_v6, %v5510_v6  ;;  %3210 = vmatprep.subr.bf16.mxu0 %v4384_v7  ;;  %v5570_v7 = vld [vmem:[%s5024_s29 + $0x180] sm:$0xff] }
 0x165   : > { %6807 = vst [vmem:[#allocation17_spill] sm:$0xff] %v5528_v28  ;;  %v650_v9 = vpop.xlane.xlu1 %649  ;;  %1851 = vmatmul.mubr.bf16.gmra.mxu0 %v5528_v28  ;;  %2044 = vmatmul.mubr.bf16.gmra.mxu1 %v5528_v28  ;;  %v987_v57 = vmul.f32 %v5474_v21, %v6808_v36  ;;  %v989_v11 = vmul.f32 %v4496_v50, %v6809_v27  ;;  %v4388_v50 = vld [vmem:[#allocation8 + $0x80] ss:$8 sps:$4 sm:$0xff]  }
 0x166   : > { %4507 = vrsqrt.f32 %v912_v12  ;;  %v785_v23 = vsub.f32 %v721_v10, %v753_v52  ;;  %v722_v41 = vmul.f32 0.00625, %v650_v9  ;;  %v992_v4 = vmul.f32 %v5504_v60, %v864_v45  ;;  %v5553_v45 = vld [vmem:[%s5024_s29 + $0x170] sm:$0xff] }
 0x167   : > { %v493_v52 = vpop.xlane.xlu0 %492  ;;  %v5544_v10 = vpack.c.bf16 %v1142_v38, %v1140_v34  ;;  %v994_v9 = vmul.f32 %v5515_v39, %v866_v42  ;;  %v1063_v29 = vmul.f32 %v5153_v3, %v987_v57  ;;  %v1065_v21 = vmul.f32 %v5153_v3, %v989_v11  ;;  %v4568_v38 = vld [vmem:[%s5024_s29 + $0x178] sm:$0xff] }
 0x168   : > { %v817_v12 = vmax.f32 %v785_v23, 0.0  ;;  %v5546_v32 = vmul.f32 0.00625, %v493_v52  ;;  %v786_v8 = vsub.f32 %v722_v41, %v754_v58  ;;  %v1068_v14 = vmul.f32 %v5139_v59, %v992_v4  ;;  %v4390_v41 = vld [vmem:[#allocation8 + $0x84] ss:$8 sps:$4 sm:$0xff]  }
 0x169   : > { %6810 = vst [vmem:[#allocation18_spill] sm:$0xff] %v5544_v10  ;;  %v496_v20 = vpop.xlane.xlu1 %495  ;;  %v870_v42 = vsub.f32 %v4568_v38, %v5410_v54  ;;  %1860 = vmatprep.mubr.bf16.mxu0 %v5544_v10  ;;  %2053 = vmatprep.mubr.bf16.mxu1 %v5544_v10  ;;  %v1139_v57 = vadd.f32 %v5165_v25, %v1063_v29  ;;  %v5567_v4 = vpop.eup %4501  ;;  %v5575_v38 = vld [vmem:[%s5024_s29 + $0x188] sm:$0xff] }
 0x16a   : > { %v913_v34 = vadd.f32 1e-05, %v817_v12  ;;  %v5561_v58 = vmul.f32 0.00625, %v496_v20  ;;  %v818_v36 = vmax.f32 %v786_v8, 0.0  ;;  %v1141_v27 = vadd.f32 %v5165_v25, %v1065_v21  ;;  %3047 = vmatprep.subr.bf16.mxu1 %v4390_v41 }
 0x16b   : > { %v755_v11 = vmul.f32 %v5546_v32, %v5546_v32  ;;  %v653_v52 = vpop.xlane.xlu0 %652  ;;  %v872_v8 = vsub.f32 %v5575_v38, %v5440_v30  ;;  %v1070_v23 = vmul.f32 %v5139_v59, %v994_v9  ;;  %v1144_v40 = vadd.f32 %v5159_v18, %v1068_v14  ;;  %3048 = vmatpush2.bf16.msra.mxu1 %v4388_v50  ;;  %v4504_v10 = vpop.eup %4503 }
 0x16c   : > { %4509 = vrsqrt.f32 %v913_v34  ;;  %v723_v29 = vmul.f32 0.00625, %v653_v52  ;;  %v914_v21 = vadd.f32 1e-05, %v818_v36  ;;  %v5579_v20 = vpack.c.bf16 %v1141_v27, %v1139_v57 }
 0x16d   : > { %v656_v35 = vpop.xlane.xlu1 %655  ;;  %v756_v12 = vmul.f32 %v5561_v58, %v5561_v58  ;;  %v6811_v34 = vsub.f32 %v5470_v15, %v5355_v1  ;;  %v1146_v9 = vadd.f32 %v5159_v18, %v1070_v23  ;;  %v6812_v14 = vsub.f32 %v5497_v46, %v5369_v24 }
 0x16e   : > { %v787_v28 = vsub.f32 %v723_v29, %v755_v11  ;;  %v724_v56 = vmul.f32 0.00625, %v656_v35  ;;  %4511 = vrsqrt.f32 %v914_v21  ;;  %1861 = vmatmul.mubr.bf16.gmra.mxu0 %v5579_v20  ;;  %2054 = vmatmul.mubr.bf16.gmra.mxu1 %v5579_v20  ;;  %v6813_v1 = vsub.f32 %v5524_v63, %v5401_v17  ;;  %v4571_v29 = vld [vmem:[%s5024_s29 + $0x190] sm:$0xff]  ;;  %v4572_v21 = vld [vmem:[%s5024_s29 + $0x198] sm:$0xff] }
 0x16f   : > { %v991_v41 = vmul.f32 %v5504_v60, %v6811_v34  ;;  %v993_v50 = vmul.f32 %v5515_v39, %v6812_v14  ;;  %v499_v35 = vpop.xlane.xlu0 %498  ;;  %v5603_v11 = vpack.c.bf16 %v1146_v9, %v1144_v40  ;;  %v998_v46 = vmul.f32 %v4504_v10, %v870_v42  ;;  %v4399_v34 = vld [vmem:[#allocation8 + $0x274] ss:$8 sps:$4 sm:$0xff]  }
 0x170   : > { %v996_v15 = vmul.f32 %v5567_v4, %v6813_v1  ;;  %v819_v60 = vmax.f32 %v787_v28, 0.0  ;;  %v788_v36 = vsub.f32 %v724_v56, %v756_v12  ;;  %v5601_v27 = vmul.f32 0.00625, %v499_v35  ;;  %3403 = vmatprep.subr.bf16.mxu1 %v4399_v34 }
 0x171   : > { %v1067_v57 = vmul.f32 %v5153_v3, %v991_v41  ;;  %v1069_v23 = vmul.f32 %v5153_v3, %v993_v50  ;;  %v502_v24 = vpop.xlane.xlu1 %501  ;;  %v4506_v52 = vpop.eup %4505  ;;  %v873_v63 = vsub.f32 %v4571_v29, %v5457_v0  ;;  %v874_v28 = vsub.f32 %v4572_v21, %v5457_v0  ;;  %1870 = vmatprep.mubr.bf16.mxu0 %v5603_v11 }
 0x172   : > { %v1072_v39 = vmul.f32 %v5139_v59, %v996_v15  ;;  %v915_v56 = vadd.f32 1e-05, %v819_v60  ;;  %v820_v12 = vmax.f32 %v788_v36, 0.0  ;;  %2063 = vmatprep.mubr.bf16.mxu1 %v5603_v11  ;;  %v5615_v9 = vmul.f32 0.00625, %v502_v24  ;;  %v4573_v15 = vld [vmem:[%s5024_s29 + $0x1a8] sm:$0xff] }
 0x173   : > { %v4508_v40 = vpop.eup %4507  ;;  %v1143_v42 = vadd.f32 %v5165_v25, %v1067_v57  ;;  %v1145_v41 = vadd.f32 %v5165_v25, %v1069_v23  ;;  %v757_v14 = vmul.f32 %v5601_v27, %v5601_v27  ;;  %v659_v0 = vpop.xlane.xlu0 %658  ;;  %v1074_v1 = vmul.f32 %v5139_v59, %v998_v46  ;;  %v4574_v36 = vld [vmem:[%s5024_s29 + $0x1b0] sm:$0xff] }
 0x174   : > { %4513 = vrsqrt.f32 %v915_v56  ;;  %v916_v50 = vadd.f32 1e-05, %v820_v12  ;;  %v725_v35 = vmul.f32 0.00625, %v659_v0  ;;  %v876_v60 = vsub.f32 %v4573_v15, %v5493_v33 }
 0x175   : > { %v877_v57 = vsub.f32 %v4574_v36, %v5510_v6  ;;  %v5624_v29 = vpack.c.bf16 %v1145_v41, %v1143_v42  ;;  %v1148_v23 = vadd.f32 %v5159_v18, %v1072_v39  ;;  %v662_v24 = vpop.xlane.xlu1 %661  ;;  %v1150_v56 = vadd.f32 %v5159_v18, %v1074_v1 }
 0x176   : > { %4515 = vrsqrt.f32 %v916_v50  ;;  %v789_v21 = vsub.f32 %v725_v35, %v757_v14  ;;  %v758_v12 = vmul.f32 %v5615_v9, %v5615_v9  ;;  %v726_v46 = vmul.f32 0.00625, %v662_v24 }
 0x177   : > { %1871 = vmatmul.mubr.bf16.gmra.mxu0 %v5624_v29  ;;  %2064 = vmatmul.mubr.bf16.gmra.mxu1 %v5624_v29  ;;  %v6814_v34 = vsub.f32 %v5518_v22, %v5401_v17  ;;  %v6815_v39 = vsub.f32 %v5553_v45, %v5410_v54  ;;  %v1000_v14 = vmul.f32 %v4506_v52, %v872_v8 }
 0x178   : > { %v821_v0 = vmax.f32 %v789_v21, 0.0  ;;  %v5642_v50 = vpack.c.bf16 %v1150_v56, %v1148_v23  ;;  %v1002_v35 = vmul.f32 %v4508_v40, %v874_v28  ;;  %v6816_v1 = vsub.f32 %v5570_v7, %v5440_v30 }
 0x179   : > { %v995_v42 = vmul.f32 %v5567_v4, %v6814_v34  ;;  %v997_v41 = vmul.f32 %v4504_v10, %v6815_v39  ;;  %v4510_v36 = vpop.eup %4509  ;;  %v790_v17 = vsub.f32 %v726_v46, %v758_v12  ;;  %v1076_v54 = vmul.f32 %v5139_v59, %v1000_v14  ;;  %v4575_v10 = vld [vmem:[%s5024_s29 + $0x1b8] sm:$0xff]  ;;  %v4576_v34 = vld [vmem:[%s5024_s29 + $0x1a0] sm:$0xff] }
 0x17a   : > { %v999_v15 = vmul.f32 %v4506_v52, %v6816_v1  ;;  %v878_v45 = vsub.f32 %v4575_v10, %v5510_v6  ;;  %v917_v38 = vadd.f32 1e-05, %v821_v0  ;;  %1880 = vmatprep.mubr.bf16.mxu0 %v5642_v50  ;;  %2073 = vmatprep.mubr.bf16.mxu1 %v5642_v50  ;;  %v1078_v30 = vmul.f32 %v5139_v59, %v1002_v35 }
 0x17b   : > { %v1071_v22 = vmul.f32 %v5153_v3, %v995_v42  ;;  %v1073_v4 = vmul.f32 %v5153_v3, %v997_v41  ;;  %v1001_v7 = vmul.f32 %v4508_v40, %v873_v63  ;;  %v822_v8 = vmax.f32 %v790_v17, 0.0  ;;  %v4512_v24 = vpop.eup %4511 }
 0x17c   : > { %v1075_v23 = vmul.f32 %v5153_v3, %v999_v15  ;;  %4517 = vrsqrt.f32 %v917_v38  ;;  %v1152_v6 = vadd.f32 %v5159_v18, %v1076_v54  ;;  %v1154_v21 = vadd.f32 %v5159_v18, %v1078_v30 }
 0x17d   : > { %v1147_v52 = vadd.f32 %v5165_v25, %v1071_v22  ;;  %v1149_v28 = vadd.f32 %v5165_v25, %v1073_v4  ;;  %v1077_v56 = vmul.f32 %v5153_v3, %v1001_v7  ;;  %v918_v12 = vadd.f32 1e-05, %v822_v8  ;;  %v4578_v4 = vld [vmem:[%s5024_s29 + $0x1d8] sm:$0xff] }
 0x17e   : > { %v1004_v63 = vmul.f32 %v4510_v36, %v876_v60  ;;  %v1006_v40 = vmul.f32 %v4512_v24, %v878_v45  ;;  %v875_v42 = vsub.f32 %v4576_v34, %v5493_v33  ;;  %v5665_v39 = vpack.c.bf16 %v1154_v21, %v1152_v6  ;;  %v4577_v60 = vld [vmem:[%s5024_s29 + $0x1c8] sm:$0xff]  ;;  %v4580_v6 = vld [vmem:[%s5024_s29 + $0x1c0] sm:$0xff] }
 0x17f   : > { %v5661_v46 = vpack.c.bf16 %v1149_v28, %v1147_v52  ;;  %v1153_v41 = vadd.f32 %v5165_v25, %v1077_v56  ;;  %4519 = vrsqrt.f32 %v918_v12  ;;  %v1005_v35 = vmul.f32 %v4512_v24, %v877_v57  ;;  %v4579_v52 = vld [vmem:[%s5024_s29 + $0x1d0] sm:$0xff] }
 0x180   : > { %v1080_v14 = vmul.f32 %v5139_v59, %v1004_v63  ;;  %v1082_v0 = vmul.f32 %v5139_v59, %v1006_v40  ;;  %v880_v1 = vsub.f32 %v4577_v60, %v5546_v32  ;;  %v1151_v15 = vadd.f32 %v5165_v25, %v1075_v23  ;;  %v4581_v63 = vld [vmem:[%s5024_s29 + $0x1e8] sm:$0xff] }
 0x181   : > { %1881 = vmatmul.mubr.bf16.gmra.mxu0 %v5661_v46  ;;  %2074 = vmatmul.mubr.bf16.gmra.mxu1 %v5661_v46  ;;  %v4514_v33 = vpop.eup %4513  ;;  %v1003_v22 = vmul.f32 %v4510_v36, %v875_v42  ;;  %v882_v54 = vsub.f32 %v4578_v4, %v5561_v58  ;;  %v1081_v30 = vmul.f32 %v5153_v3, %v1005_v35 }
 0x182   : > { %1890 = vmatprep.mubr.bf16.mxu0 %v5665_v39  ;;  %2083 = vmatprep.mubr.bf16.mxu1 %v5665_v39  ;;  %v1158_v17 = vadd.f32 %v5159_v18, %v1082_v0  ;;  %v1156_v57 = vadd.f32 %v5159_v18, %v1080_v14  ;;  %v1008_v10 = vmul.f32 %v4514_v33, %v880_v1  ;;  %v4582_v0 = vld [vmem:[%s5024_s29 + $0x1f8] sm:$0xff] }
 0x183   : > { %v4516_v45 = vpop.eup %4515  ;;  %v5681_v38 = vpack.c.bf16 %v1153_v41, %v1151_v15  ;;  %v881_v28 = vsub.f32 %v4579_v52, %v5561_v58  ;;  %v1079_v36 = vmul.f32 %v5153_v3, %v1003_v22  ;;  %v879_v21 = vsub.f32 %v4580_v6, %v5546_v32  ;;  %v4583_v22 = vld [vmem:[%s5024_s29 + $0x1f0] sm:$0xff] }
 0x184   : > { %v5684_v7 = vpack.c.bf16 %v1158_v17, %v1156_v57  ;;  %v1010_v8 = vmul.f32 %v4516_v45, %v882_v54  ;;  %v1084_v23 = vmul.f32 %v5139_v59, %v1008_v10  ;;  %v1157_v56 = vadd.f32 %v5165_v25, %v1081_v30 }
 0x185   : > { %v1009_v12 = vmul.f32 %v4516_v45, %v881_v28  ;;  %v884_v58 = vsub.f32 %v4581_v63, %v5601_v27  ;;  %v1155_v32 = vadd.f32 %v5165_v25, %v1079_v36  ;;  %v1007_v42 = vmul.f32 %v4514_v33, %v879_v21  ;;  %v4584_v33 = vld [vmem:[%s5024_s29 + $0x1e0] sm:$0xff] }
 0x186   : > { %v1086_v24 = vmul.f32 %v5139_v59, %v1010_v8  ;;  %v1160_v41 = vadd.f32 %v5159_v18, %v1084_v23  ;;  %v886_v35 = vsub.f32 %v4582_v0, %v5615_v9  ;;  %v885_v4 = vsub.f32 %v4583_v22, %v5615_v9  ;;  %v4385_v63 = vld [vmem:[#allocation8 + $0x160] ss:$8 sps:$4 sm:$0xff]  }
 0x187   : > { %v5705_v60 = vpack.c.bf16 %v1157_v56, %v1155_v32  ;;  %v1085_v1 = vmul.f32 %v5153_v3, %v1009_v12  ;;  %v1083_v54 = vmul.f32 %v5153_v3, %v1007_v42  ;;  %v883_v10 = vsub.f32 %v4584_v33, %v5601_v27  ;;  %v4387_v12 = vld [vmem:[#allocation8 + $0x164] ss:$8 sps:$4 sm:$0xff]   ;;  %v4403_v32 = vld [vmem:[#allocation8 + $0x120] ss:$8 sps:$4 sm:$0xff]   ;;  %v4408_v42 = vld [vmem:[#allocation8 + $0x114] ss:$8 sps:$4 sm:$0xff]  }
 0x188   : > { %v1162_v40 = vadd.f32 %v5159_v18, %v1086_v24  ;;  %v4418_v0 = vld [vmem:[#allocation8 + $0x1e0] ss:$8 sps:$4 sm:$0xff]  }
 0x189   : > { %1891 = vmatmul.mubr.bf16.gmra.mxu0 %v5681_v38  ;;  %2084 = vmatmul.mubr.bf16.gmra.mxu1 %v5681_v38  ;;  %v4518_v34 = vpop.eup %4517  ;;  %v1161_v30 = vadd.f32 %v5165_v25, %v1085_v1  ;;  %v1159_v9 = vadd.f32 %v5165_v25, %v1083_v54  ;;  %v4424_v1 = vld [vmem:[#allocation8 + $0x1c0] ss:$8 sps:$4 sm:$0xff]  }
 0x18a   : > { %1900 = vmatprep.mubr.bf16.mxu0 %v5684_v7  ;;  %2093 = vmatprep.mubr.bf16.mxu1 %v5684_v7  ;;  %v1012_v14 = vmul.f32 %v4518_v34, %v884_v58  ;;  %v5708_v17 = vpack.c.bf16 %v1162_v40, %v1160_v41  ;;  %v1011_v27 = vmul.f32 %v4518_v34, %v883_v10  ;;  %v4393_v58 = vld [vmem:[#allocation8 + $0x154] ss:$8 sps:$4 sm:$0xff]   ;;  %v4396_v40 = vld [vmem:[#allocation8 + $0x144] ss:$8 sps:$4 sm:$0xff]   ;;  %v4409_v41 = vld [vmem:[#allocation8 + $0x100] ss:$8 sps:$4 sm:$0xff]  }
 0x18b   : > { %v5725_v23 = vpack.c.bf16 %v1161_v30, %v1159_v9  ;;  %v4402_v34 = vld [vmem:[#allocation8 + $0x134] ss:$8 sps:$4 sm:$0xff]   ;;  %v4433_v22 = vld [vmem:[#allocation8 + $0x1a0] ss:$8 sps:$4 sm:$0xff]  }
 0x18c   : > { %v4520_v15 = vpop.eup %4519  ;;  %v1088_v45 = vmul.f32 %v5139_v59, %v1012_v14  ;;  %v4417_v14 = vld [vmem:[#allocation8 + $0x1f4] ss:$8 sps:$4 sm:$0xff]   ;;  %v6817_v10 = vld [vmem:[#allocation16_spill] sm:$0xff] }
 0x18d   : > { %v1014_v57 = vmul.f32 %v4520_v15, %v886_v35  ;;  %v1013_v52 = vmul.f32 %v4520_v15, %v885_v4  ;;  %v4423_v35 = vld [vmem:[#allocation8 + $0x1d4] ss:$8 sps:$4 sm:$0xff]  }
 0x18e   : > { %v1164_v36 = vadd.f32 %v5159_v18, %v1088_v45  ;;  %v4432_v15 = vld [vmem:[#allocation8 + $0x1b4] ss:$8 sps:$4 sm:$0xff]  }
 0x18f   : > { %v1090_v8 = vmul.f32 %v5139_v59, %v1014_v57  ;;  %v1089_v24 = vmul.f32 %v5153_v3, %v1013_v52  ;;  %v1087_v59 = vmul.f32 %v5153_v3, %v1011_v27  ;;  %v4382_v3 = vld [vmem:[#allocation8 + $0x170] ss:$8 sps:$4 sm:$0xff]   ;;  %v4438_v4 = vld [vmem:[#allocation8 + $0x194] ss:$8 sps:$4 sm:$0xff]  }
 0x190   : > { %v5760_v54 = vld [vmem:[%s6776_s4] sm:$0x1f] }
 0x191   : > { %1901 = vmatmul.mubr.bf16.gmra.mxu0 %v5705_v60  ;;  %2094 = vmatmul.mubr.bf16.gmra.mxu1 %v5705_v60  ;;  %v1166_v28 = vadd.f32 %v5159_v18, %v1090_v8  ;;  %v1165_v21 = vadd.f32 %v5165_v25, %v1089_v24  ;;  %v1163_v18 = vadd.f32 %v5165_v25, %v1087_v59  ;;  %v4391_v25 = vld [vmem:[#allocation8 + $0x150] ss:$8 sps:$4 sm:$0xff]  }
 0x192   : > { %1910 = vmatprep.mubr.bf16.mxu0 %v5708_v17  ;;  %2103 = vmatprep.mubr.bf16.mxu1 %v5708_v17  ;;  %v5767_v33 = vrot.slane %v5760_v54, %v5127_v44  ;;  %v6818_v24 = vld [vmem:[#allocation17_spill] sm:$0xff] }
 0x193   : > { %v5728_v6 = vpack.c.bf16 %v1166_v28, %v1164_v36  ;;  %v5737_v56 = vpack.c.bf16 %v1165_v21, %v1163_v18  ;;  %v6819_v21 = vld [vmem:[#allocation18_spill] sm:$0xff] }
 0x199   : > { %1911 = vmatmul.mubr.bf16.gmra.mxu0 %v5725_v23  ;;  %2104 = vmatmul.mubr.bf16.gmra.mxu1 %v5725_v23 }
 0x19a   : > { %1920 = vmatprep.mubr.bf16.mxu0 %v5728_v6  ;;  %2113 = vmatprep.mubr.bf16.mxu1 %v5728_v6 }
 0x1a1   : > { %1921 = vmatmul.mubr.bf16.gmra.mxu0 %v5737_v56  ;;  %2114 = vmatmul.mubr.bf16.gmra.mxu1 %v5737_v56 }
 0x1a2   : > { %2156 = vmatprep.mubr.bf16.mxu0 %v5181_v48  ;;  %v4394_v48 = vld [vmem:[#allocation8 + $0x140] ss:$8 sps:$4 sm:$0xff]  }
 0x1a9   : > { %2157 = vmatmul.mubr.bf16.vlgmr.msra.gmra.mxu0 %v5193_v2  ;;  %v4400_v2 = vld [vmem:[#allocation8 + $0x130] ss:$8 sps:$4 sm:$0xff]  }
 0x1aa   : > { %2164 = vmatprep.mubr.bf16.mxu0 %v5219_v53  ;;  %3211 = vmatpush1.bf16.msra.mxu0 %v4382_v3  ;;  %v4405_v53 = vld [vmem:[#allocation8 + $0x124] ss:$8 sps:$4 sm:$0xff]  }
 0x1ab   : > { %3212 = vmatprep.subr.bf16.mxu0 %v4387_v12 }
 0x1ae   : > { %3213 = vmatpush1.bf16.msra.mxu0 %v4385_v63 }
 0x1af   : > { %3214 = vmatprep.subr.bf16.mxu0 %v4393_v58 }
 0x1b1   : > { %2165 = vmatmul.mubr.bf16.gmra.mxu0 %v5223_v62  ;;  %v4406_v62 = vld [vmem:[#allocation8 + $0x110] ss:$8 sps:$4 sm:$0xff]  }
 0x1b2   : > { %2172 = vmatprep.mubr.bf16.mxu0 %v5249_v51  ;;  %3215 = vmatpush1.bf16.msra.mxu0 %v4391_v25  ;;  %v4411_v51 = vld [vmem:[#allocation8 + $0x104] ss:$8 sps:$4 sm:$0xff]  }
 0x1b3   : > { %3216 = vmatprep.subr.bf16.mxu0 %v4396_v40 }
 0x1b6   : > { %3217 = vmatpush1.bf16.msra.mxu0 %v4394_v48 }
 0x1b7   : > { %3218 = vmatprep.subr.bf16.mxu0 %v4402_v34 }
 0x1b9   : > { %2173 = vmatmul.mubr.bf16.gmra.mxu0 %v5259_v19  ;;  %v4415_v19 = vld [vmem:[#allocation8 + $0x1f0] ss:$8 sps:$4 sm:$0xff]  }
 0x1ba   : > { %2180 = vmatprep.mubr.bf16.mxu0 %v5278_v49  ;;  %3219 = vmatpush1.bf16.msra.mxu0 %v4400_v2  ;;  %v4420_v49 = vld [vmem:[#allocation8 + $0x1e4] ss:$8 sps:$4 sm:$0xff]   ;;  %v4397_v2 = vld [vmem:[#allocation8 + $0x270] ss:$8 sps:$4 sm:$0xff]  }
 0x1bb   : > { %3220 = vmatprep.subr.bf16.mxu0 %v4405_v53 }
 0x1be   : > { %3221 = vmatpush1.bf16.msra.mxu0 %v4403_v32 }
 0x1bf   : > { %3222 = vmatprep.subr.bf16.mxu0 %v4408_v42 }
 0x1c1   : > { %2181 = vmatmul.mubr.bf16.gmra.mxu0 %v5293_v26  ;;  %v4421_v26 = vld [vmem:[#allocation8 + $0x1d0] ss:$8 sps:$4 sm:$0xff]  }
 0x1c2   : > { %2188 = vmatprep.mubr.bf16.mxu0 %v5310_v55  ;;  %3223 = vmatpush1.bf16.msra.mxu0 %v4406_v62  ;;  %v4426_v55 = vld [vmem:[#allocation8 + $0x1c4] ss:$8 sps:$4 sm:$0xff]  }
 0x1c3   : > { %3224 = vmatprep.subr.bf16.mxu0 %v4411_v51  ;;  %v4414_v62 = vld [vmem:[#allocation8 + $0x264] ss:$8 sps:$4 sm:$0xff]  }
 0x1c6   : > { %3225 = vmatpush1.bf16.msra.mxu0 %v4409_v41 }
 0x1c7   : > { %3226 = vmatprep.subr.bf16.mxu0 %v4417_v14 }
 0x1c9   : > { %2189 = vmatmul.mubr.bf16.gmra.mxu0 %v5327_v31  ;;  %v4430_v31 = vld [vmem:[#allocation8 + $0x1b0] ss:$8 sps:$4 sm:$0xff]  }
 0x1ca   : > { %2196 = vmatprep.mubr.bf16.mxu0 %v5345_v16  ;;  %3227 = vmatpush2.bf16.msra.mxu0 %v4415_v19  ;;  %v4435_v16 = vld [vmem:[#allocation8 + $0x1a4] ss:$8 sps:$4 sm:$0xff]  }
 0x1cb   : > { %3228 = vmatprep.subr.bf16.mxu0 %v4420_v49 }
 0x1ce   : > { %3229 = vmatpush2.bf16.msra.mxu0 %v4418_v0 }
 0x1cf   : > { %3230 = vmatprep.subr.bf16.mxu0 %v4423_v35  ;;  %v4412_v35 = vld [vmem:[#allocation8 + $0x260] ss:$8 sps:$4 sm:$0xff]  }
 0x1d1   : > { %2197 = vmatmul.mubr.bf16.gmra.mxu0 %v5367_v43  ;;  %v4436_v43 = vld [vmem:[#allocation8 + $0x190] ss:$8 sps:$4 sm:$0xff]  }
 0x1d2   : > { %2204 = vmatprep.mubr.bf16.mxu0 %v5392_v61  ;;  %3231 = vmatpush2.bf16.msra.mxu0 %v4421_v26  ;;  %v4441_v61 = vld [vmem:[#allocation8 + $0x184] ss:$8 sps:$4 sm:$0xff]  }
 0x1d3   : > { %3232 = vmatprep.subr.bf16.mxu0 %v4426_v55  ;;  %v4429_v55 = vld [vmem:[#allocation8 + $0x254] ss:$8 sps:$4 sm:$0xff]  }
 0x1d6   : > { %3233 = vmatpush2.bf16.msra.mxu0 %v4424_v1 }
 0x1d7   : > { %3234 = vmatprep.subr.bf16.mxu0 %v4432_v15 }
 0x1d9   : > { %2205 = vmatmul.mubr.bf16.gmra.mxu0 %v5425_v5 }
 0x1da   : > { %2212 = vmatprep.mubr.bf16.mxu0 %v5427_v13  ;;  %3235 = vmatpush2.bf16.msra.mxu0 %v4430_v31  ;;  %v4439_v13 = vld [vmem:[#allocation8 + $0x180] ss:$8 sps:$4 sm:$0xff]  }
 0x1db   : > { %3236 = vmatprep.subr.bf16.mxu0 %v4435_v16 }
 0x1de   : > { %3237 = vmatpush2.bf16.msra.mxu0 %v4433_v22  ;;  %v1772_v5 = vpop.f32.mrf.mxu0  ;;  %v5763_v57 = vpop.f32.mrf.mxu1 }
 0x1df   : > { %3238 = vmatprep.subr.bf16.mxu0 %v4438_v4 }
 0x1e0   : > { %v1774_v45 = vpop.f32.mrf.mxu0  ;;  %v5773_v30 = vpop.f32.mrf.mxu1 }
 0x1e1   : > { %2213 = vmatmul.mubr.bf16.gmra.mxu0 %v5476_v37  ;;  %v5771_v37 = vrot.slane %v5760_v54, %v6817_v10 }
 0x1e2   : > { %2220 = vmatprep.mubr.bf16.mxu0 %v5486_v47  ;;  %3239 = vmatpush2.bf16.msra.mxu0 %v4436_v43  ;;  %v1776_v8 = vpop.f32.mrf.mxu0  ;;  %v5775_v52 = vpop.f32.mrf.mxu1  ;;  %v1775_v47 = vadd.f32 %v1774_v45, %v5767_v33 }
 0x1e3   : > { %3240 = vmatprep.subr.bf16.mxu0 %v4441_v61  ;;  %v1777_v9 = vadd.f32 %v1776_v8, %v5771_v37  ;;  %v1773_v28 = vadd.f32 %v1772_v5, %v5771_v37  ;;  %v4444_v61 = vld [vmem:[#allocation8 + $0x244] ss:$8 sps:$4 sm:$0xff]   ;;  %v4442_v8 = vld [vmem:[#allocation8 + $0x240] ss:$8 sps:$4 sm:$0xff]  }
 0x1e4   : > { %v1778_v27 = vpop.f32.mrf.mxu0  ;;  %v5780_v36 = vpop.f32.mrf.mxu1  ;;  %v2286_v63 = vmax.f32 %v1775_v47, 0.0 }
 0x1e5   : > { %v1779_v59 = vadd.f32 %v1778_v27, %v5767_v33  ;;  %v2290_v18 = vmax.f32 %v1777_v9, 0.0  ;;  %v2285_v25 = vmax.f32 %v1773_v28, 0.0  ;;  %v4447_v28 = vld [vmem:[#allocation8 + $0x234] ss:$8 sps:$4 sm:$0xff]  }
 0x1e6   : > { %3241 = vmatpush2.bf16.msra.mxu0 %v4439_v13  ;;  %v1782_v3 = vpop.f32.mrf.mxu0  ;;  %v5785_v12 = vpop.f32.mrf.mxu1 }
 0x1e7   : > { %v2291_v58 = vmax.f32 %v1779_v59, 0.0  ;;  %v2445_v53 = vpack.c.bf16 %v2290_v18, %v2285_v25  ;;  %v1783_v14 = vadd.f32 %v1782_v3, %v5771_v37  ;;  %v4445_v18 = vld [vmem:[#allocation8 + $0x230] ss:$8 sps:$4 sm:$0xff]  }
 0x1e8   : > { %v1784_v40 = vpop.f32.mrf.mxu0  ;;  %v5787_v48 = vpop.f32.mrf.mxu1 }
 0x1e9   : > { %2221 = vmatmul.mubr.bf16.gmra.mxu0 %v6818_v24  ;;  %v2446_v34 = vpack.c.bf16 %v2291_v58, %v2286_v63  ;;  %v1785_v51 = vadd.f32 %v1784_v40, %v5767_v33  ;;  %v2295_v31 = vmax.f32 %v1783_v14, 0.0  ;;  %v4450_v40 = vld [vmem:[#allocation8 + $0x224] ss:$8 sps:$4 sm:$0xff]   ;;  %v4453_v14 = vld [vmem:[#allocation8 + $0x214] ss:$8 sps:$4 sm:$0xff]  }
 0x1ea   : > { %2228 = vmatprep.mubr.bf16.mxu0 %v6819_v21  ;;  %v1786_v32 = vpop.f32.mrf.mxu0  ;;  %v5789_v42 = vpop.f32.mrf.mxu1 }
 0x1eb   : > { %v1787_v41 = vadd.f32 %v1786_v32, %v5771_v37  ;;  %3049 = vmatprep.mubr.bf16.mxu1 %v2446_v34  ;;  %v2296_v1 = vmax.f32 %v1785_v51, 0.0 }
 0x1ec   : > { %v1788_v19 = vpop.f32.mrf.mxu0  ;;  %3050 = vmatmul.mubr.bf16.vlgmr.msra.gmra.mxu1 %v2445_v53  ;;  %v5796_v0 = vpop.f32.mrf.mxu1 }
 0x1ed   : > { %v1789_v49 = vadd.f32 %v1788_v19, %v5767_v33  ;;  %3404 = vmatpush1.bf16.msra.mxu1 %v4397_v2  ;;  %v2300_v26 = vmax.f32 %v1787_v41, 0.0 }
 0x1ee   : > { %3405 = vmatprep.subr.bf16.mxu1 %v4414_v62  ;;  %v4448_v62 = vld [vmem:[#allocation8 + $0x220] ss:$8 sps:$4 sm:$0xff]  }
 0x1ef   : > { %v2301_v15 = vmax.f32 %v1789_v49, 0.0  ;;  %v2450_v43 = vpack.c.bf16 %v2300_v26, %v2295_v31 }
 0x1f1   : > { %2229 = vmatmul.mubr.bf16.gmra.mxu0 %v5579_v20  ;;  %v1792_v16 = vpop.f32.mrf.mxu0  ;;  %v5799_v22 = vpop.f32.mrf.mxu1  ;;  %v2451_v4 = vpack.c.bf16 %v2301_v15, %v2296_v1  ;;  %3406 = vmatpush1.bf16.msra.mxu1 %v4412_v35  ;;  %v4427_v20 = vld [vmem:[#allocation8 + $0x250] ss:$8 sps:$4 sm:$0xff]   ;;  %v4456_v15 = vld [vmem:[#allocation8 + $0x204] ss:$8 sps:$4 sm:$0xff]  }
 0x1f2   : > { %2236 = vmatprep.mubr.bf16.mxu0 %v5603_v11  ;;  %3407 = vmatprep.subr.bf16.mxu1 %v4429_v55  ;;  %v1793_v27 = vadd.f32 %v1792_v16, %v5771_v37 }
 0x1f3   : > { %v1794_v5 = vpop.f32.mrf.mxu0  ;;  %v5801_v13 = vpop.f32.mrf.mxu1  ;;  %3059 = vmatprep.mubr.bf16.mxu1 %v2451_v4 }
 0x1f4   : > { %3060 = vmatmul.mubr.bf16.gmra.mxu1 %v2450_v43  ;;  %v1795_v47 = vadd.f32 %v1794_v5, %v5767_v33  ;;  %v2305_v25 = vmax.f32 %v1793_v27, 0.0 }
 0x1f5   : > { %v1796_v11 = vpop.f32.mrf.mxu0  ;;  %v5804_v45 = vpop.f32.mrf.mxu1  ;;  %3408 = vmatpush1.bf16.msra.mxu1 %v4427_v20 }
 0x1f6   : > { %v1797_v9 = vadd.f32 %v1796_v11, %v5771_v37  ;;  %3409 = vmatprep.subr.bf16.mxu1 %v4444_v61  ;;  %v2306_v3 = vmax.f32 %v1795_v47, 0.0 }
 0x1f7   : > { %v1798_v24 = vpop.f32.mrf.mxu0  ;;  %v5810_v59 = vpop.f32.mrf.mxu1 }
 0x1f8   : > { %v2310_v21 = vmax.f32 %v1797_v9, 0.0 }
 0x1f9   : > { %2237 = vmatmul.mubr.bf16.gmra.mxu0 %v5624_v29  ;;  %v1799_v29 = vadd.f32 %v1798_v24, %v5767_v33  ;;  %3410 = vmatpush1.bf16.msra.mxu1 %v4442_v8  ;;  %v1802_v58 = vpop.f32.mrf.mxu0  ;;  %v4454_v8 = vld [vmem:[#allocation8 + $0x200] ss:$8 sps:$4 sm:$0xff]  }
 0x1fa   : > { %2244 = vmatprep.mubr.bf16.mxu0 %v5642_v50  ;;  %v5813_v50 = vpop.f32.mrf.mxu1  ;;  %3411 = vmatprep.subr.bf16.mxu1 %v4447_v28  ;;  %v2455_v32 = vpack.c.bf16 %v2310_v21, %v2305_v25  ;;  %v1803_v35 = vadd.f32 %v1802_v58, %v5771_v37 }
 0x1fb   : > { %v2311_v63 = vmax.f32 %v1799_v29, 0.0  ;;  %v1804_v34 = vpop.f32.mrf.mxu0 }
 0x1fc   : > { %v5815_v2 = vpop.f32.mrf.mxu1  ;;  %v1805_v19 = vadd.f32 %v1804_v34, %v5767_v33  ;;  %v2315_v43 = vmax.f32 %v1803_v35, 0.0 }
 0x1fd   : > { %v2456_v53 = vpack.c.bf16 %v2311_v63, %v2306_v3  ;;  %3412 = vmatpush1.bf16.msra.mxu1 %v4445_v18  ;;  %v1806_v51 = vpop.f32.mrf.mxu0 }
 0x1fe   : > { %v5819_v41 = vpop.f32.mrf.mxu1  ;;  %v1807_v49 = vadd.f32 %v1806_v51, %v5771_v37  ;;  %3413 = vmatprep.subr.bf16.mxu1 %v4450_v40  ;;  %v2316_v31 = vmax.f32 %v1805_v19, 0.0 }
 0x1ff   : > { %3069 = vmatprep.mubr.bf16.mxu1 %v2456_v53  ;;  %v1808_v26 = vpop.f32.mrf.mxu0 }
 0x200   : > { %3070 = vmatmul.mubr.bf16.gmra.mxu1 %v2455_v32  ;;  %v5824_v55 = vpop.f32.mrf.mxu1  ;;  %v2320_v1 = vmax.f32 %v1807_v49, 0.0  ;;  %v6820_v32 = vld [vmem:[#allocation15_spill] sm:$0xff] }
 0x201   : > { %2245 = vmatmul.mubr.bf16.gmra.mxu0 %v5661_v46  ;;  %v1809_v46 = vadd.f32 %v1808_v26, %v5767_v33  ;;  %3414 = vmatpush1.bf16.msra.mxu1 %v4448_v62  ;;  %v1311_v62 = vsub.s32 3, %v6820_v32 }
 0x202   : > { %2252 = vmatprep.mubr.bf16.mxu0 %v5665_v39  ;;  %v4451_v39 = vld [vmem:[#allocation8 + $0x210] ss:$8 sps:$4 sm:$0xff]   ;;  %3415 = vmatprep.subr.bf16.mxu1 %v4453_v14  ;;  %v2460_v47 = vpack.c.bf16 %v2320_v1, %v2315_v43  ;;  %v1307_v43 = vsub.s32 2, %v6820_v32 }
 0x203   : > { %v2321_v16 = vmax.f32 %v1809_v46, 0.0  ;;  %v1812_v4 = vpop.f32.mrf.mxu0  ;;  %v5827_v20 = vpop.f32.mrf.mxu1  ;;  %v5856_v1 = vrot.slane %v5760_v54, %v1311_v62 }
 0x205   : > { %v1814_v61 = vpop.f32.mrf.mxu0  ;;  %v5830_v5 = vpop.f32.mrf.mxu1  ;;  %v2461_v11 = vpack.c.bf16 %v2321_v16, %v2316_v31  ;;  %3416 = vmatpush1.bf16.msra.mxu1 %v4451_v39  ;;  %v1972_v31 = vadd.f32 %v5780_v36, %v5856_v1 }
 0x206   : > { %3417 = vmatprep.subr.bf16.mxu1 %v4456_v15  ;;  %v1815_v27 = vadd.f32 %v1814_v61, %v5767_v33 }
 0x207   : > { %v1816_v9 = vpop.f32.mrf.mxu0  ;;  %v5833_v28 = vpop.f32.mrf.mxu1  ;;  %3079 = vmatprep.mubr.bf16.mxu1 %v2461_v11  ;;  %v2293_v36 = vmax.f32 %v1972_v31, 0.0 }
 0x208   : > { %v1817_v24 = vadd.f32 %v1816_v9, %v5771_v37  ;;  %3080 = vmatmul.mubr.bf16.gmra.mxu1 %v2460_v47  ;;  %v2326_v58 = vmax.f32 %v1815_v27, 0.0  ;;  %v1968_v47 = vadd.f32 %v5773_v30, %v5856_v1 }
 0x209   : > { %2253 = vmatmul.mubr.bf16.gmra.mxu0 %v5681_v38  ;;  %v1813_v38 = vadd.f32 %v1812_v4, %v5771_v37  ;;  %v1818_v29 = vpop.f32.mrf.mxu0  ;;  %v5838_v21 = vpop.f32.mrf.mxu1  ;;  %3418 = vmatpush1.bf16.msra.mxu1 %v4454_v8 }
 0x20a   : > { %2260 = vmatprep.mubr.bf16.mxu0 %v5684_v7  ;;  %v1819_v18 = vadd.f32 %v1818_v29, %v5767_v33  ;;  %v2330_v3 = vmax.f32 %v1817_v24, 0.0  ;;  %v5871_v29 = vrot.slane %v5760_v54, %v1307_v43 }
 0x20b   : > { %v1822_v7 = vpop.f32.mrf.mxu0  ;;  %v2325_v40 = vmax.f32 %v1813_v38, 0.0 }
 0x20c   : > { %v5841_v63 = vpop.f32.mrf.mxu1  ;;  %v2331_v25 = vmax.f32 %v1819_v18, 0.0  ;;  %v1823_v46 = vadd.f32 %v1822_v7, %v5771_v37 }
 0x20d   : > { %v1824_v34 = vpop.f32.mrf.mxu0  ;;  %v2465_v14 = vpack.c.bf16 %v2330_v3, %v2325_v40 }
 0x20e   : > { %v5844_v53 = vpop.f32.mrf.mxu1  ;;  %v2466_v51 = vpack.c.bf16 %v2331_v25, %v2326_v58  ;;  %v1825_v35 = vadd.f32 %v1824_v34, %v5767_v33  ;;  %v2335_v61 = vmax.f32 %v1823_v46, 0.0  ;;  %v1982_v34 = vadd.f32 %v5796_v0, %v5856_v1 }
 0x20f   : > { %v1826_v19 = vpop.f32.mrf.mxu0 }
 0x210   : > { %v5848_v49 = vpop.f32.mrf.mxu1  ;;  %v1827_v26 = vadd.f32 %v1826_v19, %v5771_v37  ;;  %3089 = vmatprep.mubr.bf16.mxu1 %v2466_v51  ;;  %v2336_v16 = vmax.f32 %v1825_v35, 0.0 }
 0x211   : > { %2261 = vmatmul.mubr.bf16.gmra.mxu0 %v5705_v60  ;;  %v1828_v60 = vpop.f32.mrf.mxu0  ;;  %3090 = vmatmul.mubr.bf16.gmra.mxu1 %v2465_v14  ;;  %v1966_v14 = vadd.f32 %v5763_v57, %v5871_v29 }
 0x212   : > { %2268 = vmatprep.mubr.bf16.mxu0 %v5708_v17  ;;  %v5853_v39 = vpop.f32.mrf.mxu1  ;;  %v1829_v17 = vadd.f32 %v1828_v60, %v5767_v33  ;;  %v2340_v15 = vmax.f32 %v1827_v26, 0.0 }
 0x213   : > { %v2287_v57 = vmax.f32 %v1966_v14, 0.0 }
 0x214   : > { %v2341_v4 = vmax.f32 %v1829_v17, 0.0  ;;  %v2470_v27 = vpack.c.bf16 %v2340_v15, %v2335_v61 }
 0x215   : > { %v1832_v11 = vpop.f32.mrf.mxu0  ;;  %v5862_v8 = vpop.f32.mrf.mxu1 }
 0x216   : > { %v2471_v9 = vpack.c.bf16 %v2341_v4, %v2336_v16  ;;  %v1833_v58 = vadd.f32 %v1832_v11, %v5771_v37  ;;  %v2303_v16 = vmax.f32 %v1982_v34, 0.0 }
 0x217   : > { %v1834_v24 = vpop.f32.mrf.mxu0  ;;  %v5868_v38 = vpop.f32.mrf.mxu1 }
 0x218   : > { %3099 = vmatprep.mubr.bf16.mxu1 %v2471_v9  ;;  %v1835_v7 = vadd.f32 %v1834_v24, %v5767_v33  ;;  %v2345_v0 = vmax.f32 %v1833_v58, 0.0 }
 0x219   : > { %2269 = vmatmul.mubr.bf16.gmra.mxu0 %v5725_v23  ;;  %v1836_v18 = vpop.f32.mrf.mxu0  ;;  %v5873_v3 = vpop.f32.mrf.mxu1  ;;  %3100 = vmatmul.mubr.bf16.gmra.mxu1 %v2470_v27  ;;  %v2288_v23 = vmax.f32 %v1968_v47, 0.0  ;;  %v1980_v27 = vadd.f32 %v5789_v42, %v5871_v29  ;;  %v1988_v42 = vadd.f32 %v5801_v13, %v5856_v1 }
 0x21a   : > { %2276 = vmatprep.mubr.bf16.mxu0 %v5728_v6  ;;  %v1837_v30 = vadd.f32 %v1836_v18, %v5771_v37  ;;  %v1970_v6 = vadd.f32 %v5775_v52, %v5871_v29  ;;  %v1978_v52 = vadd.f32 %v5787_v48, %v5856_v1  ;;  %v2346_v46 = vmax.f32 %v1835_v7, 0.0 }
 0x21b   : > { %v1838_v25 = vpop.f32.mrf.mxu0  ;;  %v5880_v40 = vpop.f32.mrf.mxu1  ;;  %v2448_v51 = vpack.c.bf16 %v2293_v36, %v2288_v23  ;;  %v1992_v23 = vadd.f32 %v5810_v59, %v5856_v1  ;;  %v2302_v14 = vmax.f32 %v1980_v27, 0.0  ;;  %v1986_v27 = vadd.f32 %v5799_v22, %v5871_v29 }
 0x21c   : > { %v1839_v62 = vadd.f32 %v1838_v25, %v5767_v33  ;;  %v2350_v19 = vmax.f32 %v1837_v30, 0.0  ;;  %v2292_v17 = vmax.f32 %v1970_v6, 0.0  ;;  %v2298_v47 = vmax.f32 %v1978_v52, 0.0 }
 0x21d   : > { %v1842_v35 = vpop.f32.mrf.mxu0  ;;  %v5887_v26 = vpop.f32.mrf.mxu1  ;;  %v1976_v6 = vadd.f32 %v5785_v12, %v5871_v29  ;;  %v2313_v52 = vmax.f32 %v1992_v23, 0.0 }
 0x21e   : > { %v2351_v60 = vmax.f32 %v1839_v62, 0.0  ;;  %v2475_v43 = vpack.c.bf16 %v2350_v19, %v2345_v0  ;;  %v2447_v9 = vpack.c.bf16 %v2292_v17, %v2287_v57  ;;  %v1843_v24 = vadd.f32 %v1842_v35, %v5771_v37 }
 0x21f   : > { %v1844_v15 = vpop.f32.mrf.mxu0  ;;  %v5892_v31 = vpop.f32.mrf.mxu1  ;;  %v2453_v30 = vpack.c.bf16 %v2303_v16, %v2298_v47  ;;  %v1990_v57 = vadd.f32 %v5804_v45, %v5871_v29  ;;  %v1998_v45 = vadd.f32 %v5815_v2, %v5856_v1 }
 0x220   : > { %v2476_v4 = vpack.c.bf16 %v2351_v60, %v2346_v46  ;;  %v2355_v19 = vmax.f32 %v1843_v24, 0.0  ;;  %v2297_v60 = vmax.f32 %v1976_v6, 0.0 }
 0x221   : > { %2277 = vmatmul.mubr.bf16.gmra.mxu0 %v5737_v56  ;;  %v1846_v61 = vpop.f32.mrf.mxu0  ;;  %v5894_v11 = vpop.f32.mrf.mxu1  ;;  %v1845_v56 = vadd.f32 %v1844_v15, %v5767_v33  ;;  %v2308_v15 = vmax.f32 %v1988_v42, 0.0  ;;  %v2312_v6 = vmax.f32 %v1990_v57, 0.0  ;;  %v1996_v57 = vadd.f32 %v5813_v50, %v5871_v29 }
 0x222   : > { %3242 = vmatprep.mubr.bf16.mxu0 %v2448_v51  ;;  %v1847_v48 = vadd.f32 %v1846_v61, %v5771_v37  ;;  %3109 = vmatprep.mubr.bf16.mxu1 %v2476_v4  ;;  %v2452_v4 = vpack.c.bf16 %v2302_v14, %v2297_v60  ;;  %v2000_v60 = vadd.f32 %v5819_v41, %v5871_v29 }
 0x223   : > { %v1848_v36 = vpop.f32.mrf.mxu0  ;;  %v5901_v18 = vpop.f32.mrf.mxu1  ;;  %3110 = vmatmul.mubr.bf16.gmra.mxu1 %v2475_v43  ;;  %v2356_v62 = vmax.f32 %v1845_v56, 0.0  ;;  %v2002_v56 = vadd.f32 %v5824_v55, %v5856_v1  ;;  %v2008_v41 = vadd.f32 %v5830_v5, %v5856_v1 }
 0x224   : > { %v1849_v7 = vadd.f32 %v1848_v36, %v5767_v33  ;;  %v2360_v58 = vmax.f32 %v1847_v48, 0.0 }
 0x225   : > { %v1852_v25 = vpop.f32.mrf.mxu0  ;;  %v5908_v34 = vpop.f32.mrf.mxu1  ;;  %v2323_v42 = vmax.f32 %v2002_v56, 0.0 }
 0x226   : > { %v2361_v51 = vmax.f32 %v1849_v7, 0.0  ;;  %v2480_v12 = vpack.c.bf16 %v2360_v58, %v2355_v19  ;;  %v1853_v43 = vadd.f32 %v1852_v25, %v5771_v37 }
 0x227   : > { %v1854_v59 = vpop.f32.mrf.mxu0  ;;  %v5912_v35 = vpop.f32.mrf.mxu1 }
 0x228   : > { %v2481_v46 = vpack.c.bf16 %v2361_v51, %v2356_v62  ;;  %v1855_v16 = vadd.f32 %v1854_v59, %v5767_v33  ;;  %v2365_v58 = vmax.f32 %v1853_v43, 0.0  ;;  %v2307_v51 = vmax.f32 %v1986_v27, 0.0 }
 0x229   : > { %3243 = vmatmul.mubr.bf16.vlgmr.msra.gmra.mxu0 %v2447_v9  ;;  %v1856_v17 = vpop.f32.mrf.mxu0  ;;  %v5914_v0 = vpop.f32.mrf.mxu1  ;;  %v2458_v9 = vpack.c.bf16 %v2313_v52, %v2308_v15  ;;  %v2318_v59 = vmax.f32 %v1998_v45, 0.0  ;;  %v2322_v27 = vmax.f32 %v2000_v60, 0.0  ;;  %v2006_v60 = vadd.f32 %v5827_v20, %v5871_v29 }
 0x22a   : > { %3252 = vmatprep.mubr.bf16.mxu0 %v2453_v30  ;;  %v1857_v13 = vadd.f32 %v1856_v17, %v5771_v37  ;;  %3119 = vmatprep.mubr.bf16.mxu1 %v2481_v46  ;;  %v2366_v7 = vmax.f32 %v1855_v16, 0.0  ;;  %v2457_v46 = vpack.c.bf16 %v2312_v6, %v2307_v51  ;;  %v2012_v16 = vadd.f32 %v5838_v21, %v5856_v1 }
 0x22b   : > { %v1858_v61 = vpop.f32.mrf.mxu0  ;;  %v5921_v47 = vpop.f32.mrf.mxu1  ;;  %3120 = vmatmul.mubr.bf16.gmra.mxu1 %v2480_v12  ;;  %v2010_v51 = vadd.f32 %v5833_v28, %v5871_v29  ;;  %v2018_v28 = vadd.f32 %v5844_v53, %v5856_v1 }
 0x22c   : > { %v1859_v48 = vadd.f32 %v1858_v61, %v5767_v33  ;;  %v2370_v24 = vmax.f32 %v1857_v13, 0.0  ;;  %v2333_v45 = vmax.f32 %v2012_v16, 0.0 }
 0x22e   : > { %v1862_v36 = vpop.f32.mrf.mxu0  ;;  %v5928_v23 = vpop.f32.mrf.mxu1  ;;  %v2371_v30 = vmax.f32 %v1859_v48, 0.0  ;;  %v2485_v22 = vpack.c.bf16 %v2370_v24, %v2365_v58 }
 0x22f   : > { %v1863_v12 = vadd.f32 %v1862_v36, %v5771_v37 }
 0x230   : > { %v1864_v55 = vpop.f32.mrf.mxu0  ;;  %v5932_v25 = vpop.f32.mrf.mxu1  ;;  %v2486_v62 = vpack.c.bf16 %v2371_v30, %v2366_v7  ;;  %v2317_v30 = vmax.f32 %v1996_v57, 0.0  ;;  %v2332_v57 = vmax.f32 %v2010_v51, 0.0 }
 0x231   : > { %3253 = vmatmul.mubr.bf16.gmra.mxu0 %v2452_v4  ;;  %v1865_v52 = vadd.f32 %v1864_v55, %v5767_v33  ;;  %v2463_v4 = vpack.c.bf16 %v2323_v42, %v2318_v59  ;;  %v2375_v24 = vmax.f32 %v1863_v12, 0.0  ;;  %v2328_v55 = vmax.f32 %v2008_v41, 0.0 }
 0x232   : > { %3262 = vmatprep.mubr.bf16.mxu0 %v2458_v9  ;;  %v1866_v14 = vpop.f32.mrf.mxu0  ;;  %v5934_v19 = vpop.f32.mrf.mxu1  ;;  %3129 = vmatprep.mubr.bf16.mxu1 %v2486_v62  ;;  %v2462_v62 = vpack.c.bf16 %v2322_v27, %v2317_v30 }
 0x233   : > { %v1867_v2 = vadd.f32 %v1866_v14, %v5771_v37  ;;  %3130 = vmatmul.mubr.bf16.gmra.mxu1 %v2485_v22  ;;  %v2376_v48 = vmax.f32 %v1865_v52, 0.0  ;;  %v2022_v52 = vadd.f32 %v5853_v39, %v5856_v1 }
 0x234   : > { %v1868_v17 = vpop.f32.mrf.mxu0  ;;  %v5941_v15 = vpop.f32.mrf.mxu1 }
 0x235   : > { %v1869_v13 = vadd.f32 %v1868_v17, %v5767_v33  ;;  %v2380_v43 = vmax.f32 %v1867_v2, 0.0 }
 0x237   : > { %v1872_v61 = vpop.f32.mrf.mxu0  ;;  %v5948_v56 = vpop.f32.mrf.mxu1  ;;  %v2381_v9 = vmax.f32 %v1869_v13, 0.0  ;;  %v2490_v50 = vpack.c.bf16 %v2380_v43, %v2375_v24  ;;  %v2338_v24 = vmax.f32 %v2018_v28, 0.0 }
 0x238   : > { %v1873_v22 = vadd.f32 %v1872_v61, %v5771_v37  ;;  %v2343_v61 = vmax.f32 %v2022_v52, 0.0 }
 0x239   : > { %3263 = vmatmul.mubr.bf16.gmra.mxu0 %v2457_v46  ;;  %v1874_v21 = vpop.f32.mrf.mxu0  ;;  %v5952_v36 = vpop.f32.mrf.mxu1  ;;  %v2491_v7 = vpack.c.bf16 %v2381_v9, %v2376_v48  ;;  %v2468_v46 = vpack.c.bf16 %v2333_v45, %v2328_v55  ;;  %v2327_v48 = vmax.f32 %v2006_v60, 0.0 }
 0x23a   : > { %3272 = vmatprep.mubr.bf16.mxu0 %v2463_v4  ;;  %v1875_v42 = vadd.f32 %v1874_v21, %v5767_v33  ;;  %v2385_v43 = vmax.f32 %v1873_v22, 0.0 }
 0x23b   : > { %v1876_v6 = vpop.f32.mrf.mxu0  ;;  %v5954_v58 = vpop.f32.mrf.mxu1  ;;  %3139 = vmatprep.mubr.bf16.mxu1 %v2491_v7  ;;  %v2467_v53 = vpack.c.bf16 %v2332_v57, %v2327_v48  ;;  %v2020_v7 = vadd.f32 %v5848_v49, %v5871_v29  ;;  %v2028_v49 = vadd.f32 %v5868_v38, %v5856_v1  ;;  %v2042_v48 = vadd.f32 %v5901_v18, %v5856_v1 }
 0x23c   : > { %v1877_v5 = vadd.f32 %v1876_v6, %v5771_v37  ;;  %3140 = vmatmul.mubr.bf16.gmra.mxu1 %v2490_v50  ;;  %v2386_v13 = vmax.f32 %v1875_v42, 0.0  ;;  %v2032_v6 = vadd.f32 %v5880_v40, %v5856_v1  ;;  %v2473_v42 = vpack.c.bf16 %v2343_v61, %v2338_v24 }
 0x23d   : > { %v1878_v14 = vpop.f32.mrf.mxu0  ;;  %v5961_v59 = vpop.f32.mrf.mxu1  ;;  %v2026_v24 = vadd.f32 %v5862_v8, %v5871_v29 }
 0x23e   : > { %v1879_v2 = vadd.f32 %v1878_v14, %v5767_v33  ;;  %v2390_v12 = vmax.f32 %v1877_v5, 0.0  ;;  %v2016_v5 = vadd.f32 %v5841_v63, %v5871_v29  ;;  %v2353_v60 = vmax.f32 %v2032_v6, 0.0 }
 0x240   : > { %v2391_v4 = vmax.f32 %v1879_v2, 0.0  ;;  %v2495_v9 = vpack.c.bf16 %v2390_v12, %v2385_v43  ;;  %v2342_v2 = vmax.f32 %v2020_v7, 0.0 }
 0x241   : > { %v1882_v17 = vpop.f32.mrf.mxu0  ;;  %v5968_v16 = vpop.f32.mrf.mxu1  ;;  %3273 = vmatmul.mubr.bf16.gmra.mxu0 %v2462_v62 }
 0x242   : > { %3282 = vmatprep.mubr.bf16.mxu0 %v2468_v46  ;;  %v2496_v41 = vpack.c.bf16 %v2391_v4, %v2386_v13  ;;  %v1883_v30 = vadd.f32 %v1882_v17, %v5771_v37  ;;  %v2337_v17 = vmax.f32 %v2016_v5, 0.0  ;;  %v2348_v4 = vmax.f32 %v2028_v49, 0.0 }
 0x243   : > { %v1884_v39 = vpop.f32.mrf.mxu0  ;;  %v5972_v27 = vpop.f32.mrf.mxu1  ;;  %v2347_v5 = vmax.f32 %v2026_v24, 0.0 }
 0x244   : > { %v1885_v21 = vadd.f32 %v1884_v39, %v5767_v33  ;;  %3149 = vmatprep.mubr.bf16.mxu1 %v2496_v41  ;;  %v2395_v46 = vmax.f32 %v1883_v30, 0.0  ;;  %v2472_v38 = vpack.c.bf16 %v2342_v2, %v2337_v17  ;;  %v2030_v39 = vadd.f32 %v5873_v3, %v5871_v29 }
 0x245   : > { %v1886_v20 = vpop.f32.mrf.mxu0  ;;  %3150 = vmatmul.mubr.bf16.gmra.mxu1 %v2495_v9  ;;  %v5984_v51 = vpop.f32.mrf.mxu1  ;;  %v2038_v3 = vadd.f32 %v5892_v31, %v5856_v1  ;;  %v2040_v2 = vadd.f32 %v5894_v11, %v5871_v29  ;;  %v2048_v11 = vadd.f32 %v5912_v35, %v5856_v1 }
 0x246   : > { %v1887_v45 = vadd.f32 %v1886_v20, %v5771_v37  ;;  %v2396_v14 = vmax.f32 %v1885_v21, 0.0  ;;  %v2478_v20 = vpack.c.bf16 %v2353_v60, %v2348_v4  ;;  %v2052_v60 = vadd.f32 %v5921_v47, %v5856_v1 }
 0x247   : > { %v1888_v50 = vpop.f32.mrf.mxu0  ;;  %v5988_v13 = vpop.f32.mrf.mxu1  ;;  %v2358_v49 = vmax.f32 %v2038_v3, 0.0 }
 0x248   : > { %v1889_v55 = vadd.f32 %v1888_v50, %v5767_v33  ;;  %v2400_v62 = vmax.f32 %v1887_v45, 0.0  ;;  %v2352_v50 = vmax.f32 %v2030_v39, 0.0  ;;  %v2362_v39 = vmax.f32 %v2040_v2, 0.0 }
 0x249   : > { %v1892_v22 = vpop.f32.mrf.mxu0  ;;  %3283 = vmatmul.mubr.bf16.gmra.mxu0 %v2467_v53  ;;  %v6000_v21 = vpop.f32.mrf.mxu1 }
 0x24a   : > { %v2401_v52 = vmax.f32 %v1889_v55, 0.0  ;;  %3292 = vmatprep.mubr.bf16.mxu0 %v2473_v42  ;;  %v2500_v28 = vpack.c.bf16 %v2400_v62, %v2395_v46  ;;  %v1893_v61 = vadd.f32 %v1892_v22, %v5771_v37  ;;  %v2363_v55 = vmax.f32 %v2042_v48, 0.0 }
 0x24b   : > { %v1894_v40 = vpop.f32.mrf.mxu0  ;;  %v6004_v62 = vpop.f32.mrf.mxu1  ;;  %v2477_v31 = vpack.c.bf16 %v2352_v50, %v2347_v5 }
 0x24c   : > { %v2501_v12 = vpack.c.bf16 %v2401_v52, %v2396_v14  ;;  %v1895_v57 = vadd.f32 %v1894_v40, %v5767_v33  ;;  %v2405_v6 = vmax.f32 %v1893_v61, 0.0  ;;  %v2483_v17 = vpack.c.bf16 %v2363_v55, %v2358_v49 }
 0x24d   : > { %v1896_v63 = vpop.f32.mrf.mxu0 }
 0x24e   : > { %v1897_v43 = vadd.f32 %v1896_v63, %v5771_v37  ;;  %3159 = vmatprep.mubr.bf16.mxu1 %v2501_v12  ;;  %v2406_v7 = vmax.f32 %v1895_v57, 0.0  ;;  %v6016_v63 = vpop.f32.mrf.mxu1 }
 0x24f   : > { %v1898_v41 = vpop.f32.mrf.mxu0  ;;  %3160 = vmatmul.mubr.bf16.gmra.mxu1 %v2500_v28  ;;  %v2036_v28 = vadd.f32 %v5887_v26, %v5871_v29 }
 0x250   : > { %v1899_v9 = vadd.f32 %v1898_v41, %v5767_v33  ;;  %v2410_v45 = vmax.f32 %v1897_v43, 0.0  ;;  %v2373_v41 = vmax.f32 %v2052_v60, 0.0 }
 0x251   : > { %v1902_v53 = vpop.f32.mrf.mxu0  ;;  %3293 = vmatmul.mubr.bf16.gmra.mxu0 %v2472_v38 }
 0x252   : > { %v2411_v30 = vmax.f32 %v1899_v9, 0.0  ;;  %3302 = vmatprep.mubr.bf16.mxu0 %v2478_v20  ;;  %v2505_v8 = vpack.c.bf16 %v2410_v45, %v2405_v6  ;;  %v1903_v46 = vadd.f32 %v1902_v53, %v5771_v37  ;;  %v2357_v9 = vmax.f32 %v2036_v28, 0.0  ;;  %v6020_v20 = vpop.f32.mrf.mxu1 }
 0x253   : > { %v1904_v18 = vpop.f32.mrf.mxu0  ;;  %v2368_v45 = vmax.f32 %v2048_v11, 0.0  ;;  %v2062_v6 = vadd.f32 %v5941_v15, %v5856_v1 }
 0x254   : > { %v2506_v42 = vpack.c.bf16 %v2411_v30, %v2406_v7  ;;  %v1905_v14 = vadd.f32 %v1904_v18, %v5767_v33  ;;  %v2415_v61 = vmax.f32 %v1903_v46, 0.0  ;;  %v2482_v35 = vpack.c.bf16 %v2362_v39, %v2357_v9  ;;  %v6032_v5 = vpop.f32.mrf.mxu1 }
 0x255   : > { %v1906_v22 = vpop.f32.mrf.mxu0  ;;  %v2050_v7 = vadd.f32 %v5914_v0, %v5871_v29  ;;  %v2488_v55 = vpack.c.bf16 %v2373_v41, %v2368_v45  ;;  %v2058_v0 = vadd.f32 %v5932_v25, %v5856_v1  ;;  %v2383_v2 = vmax.f32 %v2062_v6, 0.0 }
 0x256   : > { %v1907_v52 = vadd.f32 %v1906_v22, %v5771_v37  ;;  %3169 = vmatprep.mubr.bf16.mxu1 %v2506_v42  ;;  %v2416_v43 = vmax.f32 %v1905_v14, 0.0  ;;  %v2046_v42 = vadd.f32 %v5908_v34, %v5871_v29  ;;  %v6036_v60 = vpop.f32.mrf.mxu1  ;;  %v2056_v41 = vadd.f32 %v5928_v23, %v5871_v29 }
 0x257   : > { %v1908_v40 = vpop.f32.mrf.mxu0  ;;  %3170 = vmatmul.mubr.bf16.gmra.mxu1 %v2505_v8 }
 0x258   : > { %v1909_v12 = vadd.f32 %v1908_v40, %v5767_v33  ;;  %v2420_v4 = vmax.f32 %v1907_v52, 0.0  ;;  %v2372_v52 = vmax.f32 %v2050_v7, 0.0  ;;  %v2367_v40 = vmax.f32 %v2046_v42, 0.0 }
 0x259   : > { %v1912_v57 = vpop.f32.mrf.mxu0  ;;  %3303 = vmatmul.mubr.bf16.gmra.mxu0 %v2477_v31  ;;  %v2082_v42 = vadd.f32 %v5988_v13, %v5856_v1 }
 0x25a   : > { %v2421_v38 = vmax.f32 %v1909_v12, 0.0  ;;  %3312 = vmatprep.mubr.bf16.mxu0 %v2483_v17  ;;  %v2510_v26 = vpack.c.bf16 %v2420_v4, %v2415_v61  ;;  %v1913_v30 = vadd.f32 %v1912_v57, %v5771_v37  ;;  %v2378_v17 = vmax.f32 %v2058_v0, 0.0 }
 0x25b   : > { %v1914_v47 = vpop.f32.mrf.mxu0  ;;  %v2487_v25 = vpack.c.bf16 %v2372_v52, %v2367_v40  ;;  %v2060_v57 = vadd.f32 %v5934_v19, %v5871_v29  ;;  %v4839_v0 = vmov 0  }
 0x25c   : > { %v2511_v48 = vpack.c.bf16 %v2421_v38, %v2416_v43  ;;  %v1915_v53 = vadd.f32 %v1914_v47, %v5767_v33  ;;  %v2425_v31 = vmax.f32 %v1913_v30, 0.0  ;;  %v2072_v38 = vadd.f32 %v5961_v59, %v5856_v1 }
 0x25d   : > { %v1916_v24 = vpop.f32.mrf.mxu0  ;;  %v2493_v61 = vpack.c.bf16 %v2383_v2, %v2378_v17  ;;  %v1315_v47 = vsub.s32 4, %v6820_v32  ;;  %v2382_v59 = vmax.f32 %v2060_v57, 0.0  ;;  %v2403_v2 = vmax.f32 %v2082_v42, 0.0 }
 0x25e   : > { %v1917_v3 = vadd.f32 %v1916_v24, %v5771_v37  ;;  %3179 = vmatprep.mubr.bf16.mxu1 %v2511_v48  ;;  %v2426_v49 = vmax.f32 %v1915_v53, 0.0  ;;  %v6049_v48 = vpop.f32.mrf.mxu1  ;;  %v2393_v53 = vmax.f32 %v2072_v38, 0.0  ;;  %v2080_v57 = vadd.f32 %v5984_v51, %v5871_v29 }
 0x25f   : > { %v1918_v50 = vpop.f32.mrf.mxu0  ;;  %3180 = vmatmul.mubr.bf16.gmra.mxu1 %v2510_v26  ;;  %v6054_v32 = vrot.slane %v5760_v54, %v1315_v47  ;;  %v2088_v51 = vadd.f32 %v6004_v62, %v5856_v1 }
 0x260   : > { %v1919_v18 = vadd.f32 %v1918_v50, %v5767_v33  ;;  %v2430_v8 = vmax.f32 %v1917_v3, 0.0  ;;  %v6056_v7 = vpop.f32.mrf.mxu1 }
 0x261   : > { %v1922_v22 = vpop.f32.mrf.mxu0  ;;  %3313 = vmatmul.mubr.bf16.gmra.mxu0 %v2482_v35  ;;  %v2377_v35 = vmax.f32 %v2056_v41, 0.0  ;;  %v2102_v62 = vadd.f32 %v6056_v7, %v5856_v1 }
 0x262   : > { %v2431_v14 = vmax.f32 %v1919_v18, 0.0  ;;  %3322 = vmatprep.mubr.bf16.mxu0 %v2488_v55  ;;  %v2515_v34 = vpack.c.bf16 %v2430_v8, %v2425_v31  ;;  %v1923_v11 = vadd.f32 %v1922_v22, %v5771_v37  ;;  %v2070_v18 = vadd.f32 %v5954_v58, %v5871_v29 }
 0x263   : > { %v1924_v15 = vpop.f32.mrf.mxu0  ;;  %v2078_v58 = vadd.f32 %v5972_v27, %v5856_v1 }
 0x264   : > { %v2516_v46 = vpack.c.bf16 %v2431_v14, %v2426_v49  ;;  %v1925_v28 = vadd.f32 %v1924_v15, %v5767_v33  ;;  %v2435_v45 = vmax.f32 %v1923_v11, 0.0  ;;  %v2066_v49 = vadd.f32 %v5948_v56, %v5871_v29  ;;  %v6066_v14 = vpop.f32.mrf.mxu1 }
 0x265   : > { %v1926_v12 = vpop.f32.mrf.mxu0  ;;  %v2392_v13 = vmax.f32 %v2070_v18, 0.0  ;;  %v2092_v11 = vadd.f32 %v6020_v20, %v5856_v1  ;;  %v2402_v20 = vmax.f32 %v2080_v57, 0.0  ;;  %v2086_v18 = vadd.f32 %v6000_v21, %v5871_v29 }
 0x266   : > { %v1927_v4 = vadd.f32 %v1926_v12, %v5771_v37  ;;  %3189 = vmatprep.mubr.bf16.mxu1 %v2516_v46  ;;  %v2068_v37 = vadd.f32 %v5952_v36, %v5856_v1  ;;  %v2436_v19 = vmax.f32 %v1925_v28, 0.0  ;;  %v2492_v36 = vpack.c.bf16 %v2382_v59, %v2377_v35  ;;  %v6071_v17 = vpop.f32.mrf.mxu1 }
 0x267   : > { %v1928_v43 = vpop.f32.mrf.mxu0  ;;  %3190 = vmatmul.mubr.bf16.gmra.mxu1 %v2515_v34  ;;  %v2387_v12 = vmax.f32 %v2066_v49, 0.0  ;;  %v2398_v28 = vmax.f32 %v2078_v58, 0.0  ;;  %v2090_v35 = vadd.f32 %v6016_v63, %v5871_v29  ;;  %v2098_v63 = vadd.f32 %v6036_v60, %v5856_v1 }
 0x268   : > { %v1929_v39 = vadd.f32 %v1928_v43, %v5767_v33  ;;  %v2440_v9 = vmax.f32 %v1927_v4, 0.0  ;;  %v2388_v6 = vmax.f32 %v2068_v37, 0.0  ;;  %v6080_v47 = vpop.f32.mrf.mxu1  ;;  %v2413_v37 = vmax.f32 %v2092_v11, 0.0 }
 0x269   : > { %v4043_v26 = vpop.f32.mrf.mxu0  ;;  %3323 = vmatmul.mubr.bf16.gmra.mxu0 %v2487_v25  ;;  %v2497_v25 = vpack.c.bf16 %v2392_v13, %v2387_v12  ;;  %v2412_v7 = vmax.f32 %v2090_v35, 0.0 }
 0x26a   : > { %v2441_v24 = vmax.f32 %v1929_v39, 0.0  ;;  %3332 = vmatprep.mubr.bf16.mxu0 %v2493_v61  ;;  %v2520_v30 = vpack.c.bf16 %v2440_v9, %v2435_v45  ;;  %v2498_v22 = vpack.c.bf16 %v2393_v53, %v2388_v6  ;;  %v2503_v39 = vpack.c.bf16 %v2403_v2, %v2398_v28 }
 0x26b   : > { %v4044_v33 = vpop.f32.mrf.mxu0  ;;  %v2076_v61 = vadd.f32 %v5968_v16, %v5871_v29  ;;  %v2111_v16 = vpop.f32.mrf.mxu1  ;;  %v2408_v53 = vmax.f32 %v2088_v51, 0.0 }
 0x26c   : > { %v4045_v3 = vadd.f32 %v4044_v33, %v4043_v26  ;;  %v2521_v23 = vpack.c.bf16 %v2441_v24, %v2436_v19  ;;  %v2112_v60 = vadd.f32 %v2111_v16, %v5856_v1 }
 0x26d   : > { %v4046_v50 = vpop.f32.mrf.mxu0  ;;  %v2397_v45 = vmax.f32 %v2076_v61, 0.0 }
 0x26e   : > { %3199 = vmatprep.mubr.bf16.mxu1 %v2521_v23  ;;  %v2159_v54 = vadd.f32 %v4045_v3, %v6054_v32 }
 0x26f   : > { %v4047_v55 = vpop.f32.mrf.mxu0  ;;  %3200 = vmatmul.mubr.bf16.gmra.mxu1 %v2520_v30  ;;  %v2502_v23 = vpack.c.bf16 %v2402_v20, %v2397_v45 }
 0x270   : > { %v4048_v8 = vadd.f32 %v4047_v55, %v4046_v50  ;;  %3435 = vmatprep.mubr.bf16.mxu1 %v4839_v0  ;;  %v2289_v46 = vmax.f32 %v2159_v54, 0.0  ;;  %v6093_v55 = vpop.f32.mrf.mxu1 }
 0x271   : > { %v4049_v52 = vpop.f32.mrf.mxu0  ;;  %3333 = vmatmul.mubr.bf16.gmra.mxu0 %v2492_v36  ;;  %v2508_v36 = vpack.c.bf16 %v2413_v37, %v2408_v53 }
 0x272   : > { %v2162_v31 = vadd.f32 %v4048_v8, %v6054_v32  ;;  %3342 = vmatprep.mubr.bf16.mxu0 %v2498_v22  ;;  %v2423_v22 = vmax.f32 %v2102_v62, 0.0  ;;  %v2117_v21 = vpop.f32.mrf.mxu1 }
 0x273   : > { %v4050_v15 = vpop.f32.mrf.mxu0 }
 0x274   : > { %v2294_v40 = vmax.f32 %v2162_v31, 0.0  ;;  %v4051_v34 = vadd.f32 %v4050_v15, %v4049_v52  ;;  %v2407_v31 = vmax.f32 %v2086_v18, 0.0  ;;  %v2418_v15 = vmax.f32 %v2098_v63, 0.0 }
 0x275   : > { %v4052_v56 = vpop.f32.mrf.mxu0 }
 0x276   : > { %v2449_v4 = vpack.c.bf16 %v2294_v40, %v2289_v46  ;;  %v2167_v43 = vadd.f32 %v4051_v34, %v6054_v32  ;;  %v2507_v46 = vpack.c.bf16 %v2412_v7, %v2407_v31  ;;  %v2100_v40 = vadd.f32 %v6049_v48, %v5871_v29 }
 0x277   : > { %v4053_v27 = vpop.f32.mrf.mxu0  ;;  %v2513_v28 = vpack.c.bf16 %v2423_v22, %v2418_v15 }
 0x278   : > { %v4054_v38 = vadd.f32 %v4053_v27, %v4052_v56  ;;  %3436 = vmatmul.mubr.bf16.vlgmr.msra.gmra.mxu1 %v2449_v4  ;;  %v2299_v19 = vmax.f32 %v2167_v43, 0.0  ;;  %v2096_v4 = vadd.f32 %v6032_v5, %v5871_v29  ;;  %v2108_v27 = vadd.f32 %v6071_v17, %v5856_v1 }
 0x279   : > { %v4055_v41 = vpop.f32.mrf.mxu0  ;;  %3343 = vmatmul.mubr.bf16.gmra.mxu0 %v2497_v25  ;;  %3445 = vmatprep.mubr.bf16.mxu1 %v4839_v0  ;;  %v2119_v25 = vpop.f32.mrf.mxu1  ;;  %v2422_v11 = vmax.f32 %v2100_v40, 0.0 }
 0x27a   : > { %v2170_v9 = vadd.f32 %v4054_v38, %v6054_v32  ;;  %3352 = vmatprep.mubr.bf16.mxu0 %v2503_v39  ;;  %v2433_v38 = vmax.f32 %v2112_v60, 0.0  ;;  %v2417_v51 = vmax.f32 %v2096_v4, 0.0  ;;  %v2428_v20 = vmax.f32 %v2108_v27, 0.0 }
 0x27b   : > { %v4056_v26 = vpop.f32.mrf.mxu0 }
 0x27c   : > { %v2304_v24 = vmax.f32 %v2170_v9, 0.0  ;;  %v4057_v59 = vadd.f32 %v4056_v26, %v4055_v41  ;;  %v2121_v9 = vpop.f32.mrf.mxu1  ;;  %v2512_v37 = vpack.c.bf16 %v2422_v11, %v2417_v51  ;;  %v2518_v16 = vpack.c.bf16 %v2433_v38, %v2428_v20 }
 0x27d   : > { %v4058_v33 = vpop.f32.mrf.mxu0  ;;  %v2122_v17 = vadd.f32 %v2121_v9, %v5856_v1 }
 0x27e   : > { %v2454_v3 = vpack.c.bf16 %v2304_v24, %v2299_v19  ;;  %v2175_v50 = vadd.f32 %v4057_v59, %v6054_v32  ;;  %v2110_v19 = vadd.f32 %v6080_v47, %v5871_v29 }
 0x27f   : > { %v4059_v30 = vpop.f32.mrf.mxu0 }
 0x280   : > { %v4060_v6 = vadd.f32 %v4059_v30, %v4058_v33  ;;  %3446 = vmatmul.mubr.bf16.gmra.mxu1 %v2454_v3  ;;  %v2309_v49 = vmax.f32 %v2175_v50, 0.0  ;;  %v2106_v33 = vadd.f32 %v6066_v14, %v5871_v29  ;;  %v2118_v3 = vadd.f32 %v2117_v21, %v5856_v1 }
 0x281   : > { %v4061_v42 = vpop.f32.mrf.mxu0  ;;  %3353 = vmatmul.mubr.bf16.gmra.mxu0 %v2502_v23  ;;  %3455 = vmatprep.mubr.bf16.mxu1 %v4839_v0  ;;  %v2432_v47 = vmax.f32 %v2110_v19, 0.0  ;;  %v2443_v30 = vmax.f32 %v2122_v17, 0.0 }
 0x282   : > { %v2178_v54 = vadd.f32 %v4060_v6, %v6054_v32  ;;  %3362 = vmatprep.mubr.bf16.mxu0 %v2508_v36  ;;  %v2427_v36 = vmax.f32 %v2106_v33, 0.0 }
 0x283   : > { %v4062_v8 = vpop.f32.mrf.mxu0 }
 0x284   : > { %v2314_v52 = vmax.f32 %v2178_v54, 0.0  ;;  %v4063_v58 = vadd.f32 %v4062_v8, %v4061_v42  ;;  %v2438_v42 = vmax.f32 %v2118_v3, 0.0  ;;  %v2517_v14 = vpack.c.bf16 %v2432_v47, %v2427_v36 }
 0x285   : > { %v4064_v13 = vpop.f32.mrf.mxu0  ;;  %v2120_v54 = vadd.f32 %v2119_v25, %v5871_v29 }
 0x286   : > { %v2459_v2 = vpack.c.bf16 %v2314_v52, %v2309_v49  ;;  %v2183_v12 = vadd.f32 %v4063_v58, %v6054_v32  ;;  %v2523_v22 = vpack.c.bf16 %v2443_v30, %v2438_v42  ;;  %v2116_v49 = vadd.f32 %v6093_v55, %v5871_v29 }
 0x287   : > { %v4065_v34 = vpop.f32.mrf.mxu0  ;;  %v2442_v31 = vmax.f32 %v2120_v54, 0.0 }
 0x288   : > { %v4066_v56 = vadd.f32 %v4065_v34, %v4064_v13  ;;  %3456 = vmatmul.mubr.bf16.gmra.mxu1 %v2459_v2  ;;  %v2319_v39 = vmax.f32 %v2183_v12, 0.0 }
 0x289   : > { %v4067_v57 = vpop.f32.mrf.mxu0  ;;  %3363 = vmatmul.mubr.bf16.gmra.mxu0 %v2507_v46  ;;  %3465 = vmatprep.mubr.bf16.mxu1 %v4839_v0  ;;  %v2437_v46 = vmax.f32 %v2116_v49, 0.0 }
 0x28a   : > { %v2186_v48 = vadd.f32 %v4066_v56, %v6054_v32  ;;  %3372 = vmatprep.mubr.bf16.mxu0 %v2513_v28 }
 0x28b   : > { %v4068_v43 = vpop.f32.mrf.mxu0  ;;  %v2522_v60 = vpack.c.bf16 %v2442_v31, %v2437_v46 }
 0x28c   : > { %v2324_v61 = vmax.f32 %v2186_v48, 0.0  ;;  %v4069_v41 = vadd.f32 %v4068_v43, %v4067_v57 }
 0x28d   : > { %v4070_v5 = vpop.f32.mrf.mxu0 }
 0x28e   : > { %v2464_v26 = vpack.c.bf16 %v2324_v61, %v2319_v39  ;;  %v2191_v59 = vadd.f32 %v4069_v41, %v6054_v32 }
 0x28f   : > { %v4071_v24 = vpop.f32.mrf.mxu0 }
 0x290   : > { %v4072_v45 = vadd.f32 %v4071_v24, %v4070_v5  ;;  %3466 = vmatmul.mubr.bf16.gmra.mxu1 %v2464_v26  ;;  %v2329_v62 = vmax.f32 %v2191_v59, 0.0 }
 0x291   : > { %v4073_v53 = vpop.f32.mrf.mxu0  ;;  %3373 = vmatmul.mubr.bf16.gmra.mxu0 %v2512_v37  ;;  %3475 = vmatprep.mubr.bf16.mxu1 %v4839_v0 }
 0x292   : > { %v2194_v23 = vadd.f32 %v4072_v45, %v6054_v32  ;;  %3382 = vmatprep.mubr.bf16.mxu0 %v2518_v16 }
 0x293   : > { %v4074_v35 = vpop.f32.mrf.mxu0 }
 0x294   : > { %v2334_v50 = vmax.f32 %v2194_v23, 0.0  ;;  %v4075_v6 = vadd.f32 %v4074_v35, %v4073_v53 }
 0x295   : > { %v4076_v18 = vpop.f32.mrf.mxu0 }
 0x296   : > { %v2469_v63 = vpack.c.bf16 %v2334_v50, %v2329_v62  ;;  %v2199_v8 = vadd.f32 %v4075_v6, %v6054_v32 }
 0x297   : > { %v4077_v7 = vpop.f32.mrf.mxu0 }
 0x298   : > { %v4078_v1 = vadd.f32 %v4077_v7, %v4076_v18  ;;  %3476 = vmatmul.mubr.bf16.gmra.mxu1 %v2469_v63  ;;  %v2339_v13 = vmax.f32 %v2199_v8, 0.0 }
 0x299   : > { %v4079_v52 = vpop.f32.mrf.mxu0  ;;  %3383 = vmatmul.mubr.bf16.gmra.mxu0 %v2517_v14  ;;  %3485 = vmatprep.mubr.bf16.mxu1 %v4839_v0 }
 0x29a   : > { %v2202_v58 = vadd.f32 %v4078_v1, %v6054_v32  ;;  %3392 = vmatprep.mubr.bf16.mxu0 %v2523_v22 }
 0x29b   : > { %v4080_v21 = vpop.f32.mrf.mxu0 }
 0x29c   : > { %v2344_v15 = vmax.f32 %v2202_v58, 0.0  ;;  %v4081_v2 = vadd.f32 %v4080_v21, %v4079_v52 }
 0x29d   : > { %v4082_v40 = vpop.f32.mrf.mxu0 }
 0x29e   : > { %v2474_v34 = vpack.c.bf16 %v2344_v15, %v2339_v13  ;;  %v2207_v56 = vadd.f32 %v4081_v2, %v6054_v32 }
 0x29f   : > { %v4083_v12 = vpop.f32.mrf.mxu0 }
 0x2a0   : > { %v4084_v29 = vadd.f32 %v4083_v12, %v4082_v40  ;;  %3486 = vmatmul.mubr.bf16.gmra.mxu1 %v2474_v34  ;;  %v2349_v25 = vmax.f32 %v2207_v56, 0.0 }
 0x2a1   : > { %v4085_v55 = vpop.f32.mrf.mxu0  ;;  %3393 = vmatmul.mubr.bf16.gmra.mxu0 %v2522_v60  ;;  %3495 = vmatprep.mubr.bf16.mxu1 %v4839_v0 }
 0x2a2   : > { %v2210_v28 = vadd.f32 %v4084_v29, %v6054_v32 }
 0x2a3   : > { %v4086_v4 = vpop.f32.mrf.mxu0 }
 0x2a4   : > { %v2354_v57 = vmax.f32 %v2210_v28, 0.0  ;;  %v4087_v27 = vadd.f32 %v4086_v4, %v4085_v55 }
 0x2a5   : > { %v4088_v48 = vpop.f32.mrf.mxu0 }
 0x2a6   : > { %v2479_v11 = vpack.c.bf16 %v2354_v57, %v2349_v25  ;;  %v2215_v38 = vadd.f32 %v4087_v27, %v6054_v32 }
 0x2a7   : > { %v4089_v43 = vpop.f32.mrf.mxu0 }
 0x2a8   : > { %v4090_v39 = vadd.f32 %v4089_v43, %v4088_v48  ;;  %3496 = vmatmul.mubr.bf16.gmra.mxu1 %v2479_v11  ;;  %v2359_v9 = vmax.f32 %v2215_v38, 0.0 }
 0x2a9   : > { %v4091_v61 = vpop.f32.mrf.mxu0  ;;  %3505 = vmatprep.mubr.bf16.mxu1 %v4839_v0 }
 0x2aa   : > { %v2218_v41 = vadd.f32 %v4090_v39, %v6054_v32 }
 0x2ab   : > { %v4092_v51 = vpop.f32.mrf.mxu0 }
 0x2ac   : > { %v2364_v5 = vmax.f32 %v2218_v41, 0.0  ;;  %v4093_v20 = vadd.f32 %v4092_v51, %v4091_v61  ;;  %v6131_v59 = vpop.f32.mrf.mxu1 }
 0x2ad   : > { %v4094_v26 = vpop.f32.mrf.mxu0 }
 0x2ae   : > { %v2484_v37 = vpack.c.bf16 %v2364_v5, %v2359_v9  ;;  %v2223_v24 = vadd.f32 %v4093_v20, %v6054_v32  ;;  %v6135_v33 = vpop.f32.mrf.mxu1 }
 0x2af   : > { %v4095_v19 = vpop.f32.mrf.mxu0 }
 0x2b0   : > { %v4096_v17 = vadd.f32 %v4095_v19, %v4094_v26  ;;  %3506 = vmatmul.mubr.bf16.gmra.mxu1 %v2484_v37  ;;  %v2369_v3 = vmax.f32 %v2223_v24, 0.0  ;;  %v6137_v35 = vpop.f32.mrf.mxu1 }
 0x2b1   : > { %v4097_v45 = vpop.f32.mrf.mxu0  ;;  %3515 = vmatprep.mubr.bf16.mxu1 %v4839_v0 }
 0x2b2   : > { %v2226_v16 = vadd.f32 %v4096_v17, %v6054_v32  ;;  %v6139_v50 = vpop.f32.mrf.mxu1 }
 0x2b3   : > { %v4098_v53 = vpop.f32.mrf.mxu0 }
 0x2b4   : > { %v2374_v23 = vmax.f32 %v2226_v16, 0.0  ;;  %v4099_v47 = vadd.f32 %v4098_v53, %v4097_v45  ;;  %v6142_v42 = vpop.f32.mrf.mxu1 }
 0x2b5   : > { %v4100_v30 = vpop.f32.mrf.mxu0 }
 0x2b6   : > { %v2489_v62 = vpack.c.bf16 %v2374_v23, %v2369_v3  ;;  %v2231_v36 = vadd.f32 %v4099_v47, %v6054_v32  ;;  %v6146_v54 = vpop.f32.mrf.mxu1 }
 0x2b7   : > { %v4101_v6 = vpop.f32.mrf.mxu0 }
 0x2b8   : > { %v4102_v18 = vadd.f32 %v4101_v6, %v4100_v30  ;;  %3516 = vmatmul.mubr.bf16.gmra.mxu1 %v2489_v62  ;;  %v2379_v8 = vmax.f32 %v2231_v36, 0.0  ;;  %v6148_v49 = vpop.f32.mrf.mxu1 }
 0x2b9   : > { %v4103_v63 = vpop.f32.mrf.mxu0  ;;  %3525 = vmatprep.mubr.bf16.mxu1 %v4839_v0 }
 0x2ba   : > { %v2234_v14 = vadd.f32 %v4102_v18, %v6054_v32  ;;  %v6150_v21 = vpop.f32.mrf.mxu1 }
 0x2bb   : > { %v4104_v7 = vpop.f32.mrf.mxu0 }
 0x2bc   : > { %v2384_v1 = vmax.f32 %v2234_v14, 0.0  ;;  %v4105_v22 = vadd.f32 %v4104_v7, %v4103_v63 }
 0x2bd   : > { %v4106_v52 = vpop.f32.mrf.mxu0 }
 0x2be   : > { %v2494_v58 = vpack.c.bf16 %v2384_v1, %v2379_v8  ;;  %v2239_v13 = vadd.f32 %v4105_v22, %v6054_v32 }
 0x2bf   : > { %v4107_v31 = vpop.f32.mrf.mxu0 }
 0x2c0   : > { %v4108_v15 = vadd.f32 %v4107_v31, %v4106_v52  ;;  %3526 = vmatmul.mubr.bf16.gmra.mxu1 %v2494_v58  ;;  %v6155_v34 = vpop.f32.mrf.mxu1  ;;  %v2389_v60 = vmax.f32 %v2239_v13, 0.0 }
 0x2c1   : > { %v4109_v2 = vpop.f32.mrf.mxu0  ;;  %3535 = vmatprep.mubr.bf16.mxu1 %v4839_v0 }
 0x2c2   : > { %v2242_v46 = vadd.f32 %v4108_v15, %v6054_v32  ;;  %v6157_v55 = vpop.f32.mrf.mxu1 }
 0x2c3   : > { %v4110_v40 = vpop.f32.mrf.mxu0 }
 0x2c4   : > { %v2394_v12 = vmax.f32 %v2242_v46, 0.0  ;;  %v4111_v56 = vadd.f32 %v4110_v40, %v4109_v2  ;;  %v6159_v25 = vpop.f32.mrf.mxu1 }
 0x2c5   : > { %v4112_v29 = vpop.f32.mrf.mxu0 }
 0x2c6   : > { %v2499_v28 = vpack.c.bf16 %v2394_v12, %v2389_v60  ;;  %v2247_v57 = vadd.f32 %v4111_v56, %v6054_v32  ;;  %v6162_v11 = vpop.f32.mrf.mxu1 }
 0x2c7   : > { %v4113_v4 = vpop.f32.mrf.mxu0 }
 0x2c8   : > { %v4114_v27 = vadd.f32 %v4113_v4, %v4112_v29  ;;  %3536 = vmatmul.mubr.bf16.gmra.mxu1 %v2499_v28  ;;  %v2399_v39 = vmax.f32 %v2247_v57, 0.0  ;;  %v6166_v51 = vpop.f32.mrf.mxu1 }
 0x2c9   : > { %v4115_v48 = vpop.f32.mrf.mxu0  ;;  %3545 = vmatprep.mubr.bf16.mxu1 %v4839_v0 }
 0x2ca   : > { %v2250_v43 = vadd.f32 %v4114_v27, %v6054_v32  ;;  %v6168_v20 = vpop.f32.mrf.mxu1 }
 0x2cb   : > { %v4116_v38 = vpop.f32.mrf.mxu0 }
 0x2cc   : > { %v2404_v61 = vmax.f32 %v2250_v43, 0.0  ;;  %v4117_v41 = vadd.f32 %v4116_v38, %v4115_v48  ;;  %v6171_v24 = vpop.f32.mrf.mxu1 }
 0x2cd   : > { %v4118_v9 = vpop.f32.mrf.mxu0 }
 0x2ce   : > { %v2504_v5 = vpack.c.bf16 %v2404_v61, %v2399_v39  ;;  %v2255_v37 = vadd.f32 %v4117_v41, %v6054_v32  ;;  %v6175_v16 = vpop.f32.mrf.mxu1 }
 0x2cf   : > { %v4119_v26 = vpop.f32.mrf.mxu0 }
 0x2d0   : > { %v4120_v19 = vadd.f32 %v4119_v26, %v4118_v9  ;;  %3546 = vmatmul.mubr.bf16.gmra.mxu1 %v2504_v5  ;;  %v2409_v3 = vmax.f32 %v2255_v37, 0.0 }
 0x2d1   : > { %v4121_v17 = vpop.f32.mrf.mxu0  ;;  %3555 = vmatprep.mubr.bf16.mxu1 %v4839_v0  ;;  %v6177_v62 = vpop.f32.mrf.mxu1 }
 0x2d2   : > { %v2258_v45 = vadd.f32 %v4120_v19, %v6054_v32 }
 0x2d3   : > { %v4122_v53 = vpop.f32.mrf.mxu0  ;;  %v6179_v18 = vpop.f32.mrf.mxu1 }
 0x2d4   : > { %v2414_v23 = vmax.f32 %v2258_v45, 0.0  ;;  %v4123_v47 = vadd.f32 %v4122_v53, %v4121_v17 }
 0x2d5   : > { %v4124_v30 = vpop.f32.mrf.mxu0  ;;  %v6182_v8 = vpop.f32.mrf.mxu1 }
 0x2d6   : > { %v2509_v6 = vpack.c.bf16 %v2414_v23, %v2409_v3  ;;  %v2263_v63 = vadd.f32 %v4123_v47, %v6054_v32 }
 0x2d7   : > { %v4125_v36 = vpop.f32.mrf.mxu0  ;;  %v6186_v52 = vpop.f32.mrf.mxu1 }
 0x2d8   : > { %v4126_v14 = vadd.f32 %v4125_v36, %v4124_v30  ;;  %3556 = vmatmul.mubr.bf16.gmra.mxu1 %v2509_v6  ;;  %v2419_v58 = vmax.f32 %v2263_v63, 0.0 }
 0x2d9   : > { %v4127_v7 = vpop.f32.mrf.mxu0  ;;  %3565 = vmatprep.mubr.bf16.mxu1 %v4839_v0  ;;  %v6188_v2 = vpop.f32.mrf.mxu1 }
 0x2da   : > { %v2266_v1 = vadd.f32 %v4126_v14, %v6054_v32 }
 0x2db   : > { %v4128_v22 = vpop.f32.mrf.mxu0  ;;  %v6190_v60 = vpop.f32.mrf.mxu1 }
 0x2dc   : > { %v2424_v31 = vmax.f32 %v2266_v1, 0.0  ;;  %v4129_v13 = vadd.f32 %v4128_v22, %v4127_v7 }
 0x2dd   : > { %v4130_v15 = vpop.f32.mrf.mxu0  ;;  %v6193_v28 = vpop.f32.mrf.mxu1 }
 0x2de   : > { %v2514_v46 = vpack.c.bf16 %v2424_v31, %v2419_v58  ;;  %v2271_v12 = vadd.f32 %v4129_v13, %v6054_v32 }
 0x2df   : > { %v4131_v40 = vpop.f32.mrf.mxu0  ;;  %v6197_v27 = vpop.f32.mrf.mxu1 }
 0x2e0   : > { %v4132_v56 = vadd.f32 %v4131_v40, %v4130_v15  ;;  %3566 = vmatmul.mubr.bf16.gmra.mxu1 %v2514_v46  ;;  %v2429_v48 = vmax.f32 %v2271_v12, 0.0 }
 0x2e1   : > { %v4133_v29 = vpop.f32.mrf.mxu0  ;;  %3575 = vmatprep.mubr.bf16.mxu1 %v4839_v0 }
 0x2e2   : > { %v2274_v4 = vadd.f32 %v4132_v56, %v6054_v32 }
 0x2e3   : > { %v4134_v57 = vpop.f32.mrf.mxu0  ;;  %v6199_v9 = vpop.f32.mrf.mxu1 }
 0x2e4   : > { %v2434_v43 = vmax.f32 %v2274_v4, 0.0  ;;  %v4135_v38 = vadd.f32 %v4134_v57, %v4133_v29 }
 0x2e5   : > { %v4136_v39 = vpop.f32.mrf.mxu0  ;;  %v6202_v37 = vpop.f32.mrf.mxu1 }
 0x2e6   : > { %v2519_v61 = vpack.c.bf16 %v2434_v43, %v2429_v48  ;;  %v2279_v5 = vadd.f32 %v4135_v38, %v6054_v32 }
 0x2e7   : > { %v4137_v41 = vpop.f32.mrf.mxu0  ;;  %v6208_v45 = vpop.f32.mrf.mxu1 }
 0x2e8   : > { %v4138_v26 = vadd.f32 %v4137_v41, %v4136_v39  ;;  %3576 = vmatmul.mubr.bf16.gmra.mxu1 %v2519_v61  ;;  %6821 = vst [vmem:[#allocation16_spill] sm:$0xff] %v6208_v45  ;;  %v2439_v3 = vmax.f32 %v2279_v5, 0.0 }
 0x2e9   : > { %v6204_v19 = vpop.f32.mrf.mxu0  ;;  %3585 = vmatprep.mubr.bf16.mxu1 %v4839_v0  ;;  %v6212_v47 = vpop.f32.mrf.mxu1 }
 0x2ea   : > { %v2282_v17 = vadd.f32 %v4138_v26, %v6054_v32  ;;  %6822 = vst [vmem:[#allocation17_spill] sm:$0xff] %v6212_v47 }
 0x2eb   : > { %v6210_v53 = vpop.f32.mrf.mxu0  ;;  %v6216_v36 = vpop.f32.mrf.mxu1 }
 0x2ec   : > { %v2444_v23 = vmax.f32 %v2282_v17, 0.0  ;;  %6823 = vst [vmem:[#allocation18_spill] sm:$0xff] %v6216_v36 }
 0x2ed   : > { %v6214_v30 = vpop.f32.mrf.mxu0  ;;  %v6220_v14 = vpop.f32.mrf.mxu1 }
 0x2ee   : > { %v2524_v6 = vpack.c.bf16 %v2444_v23, %v2439_v3  ;;  %6824 = vst [vmem:[#allocation15_spill] sm:$0xff] %v6220_v14 }
 0x2ef   : > { %v6218_v63 = vpop.f32.mrf.mxu0  ;;  %v6224_v32 = vpop.f32.mrf.mxu1 }
 0x2f0   : > { %3586 = vmatmul.mubr.bf16.gmra.mxu1 %v2524_v6  ;;  %6825 = vst [vmem:[#allocation19_spill] sm:$0xff] %v6224_v32 }
 0x2f1   : > { %v6222_v0 = vpop.f32.mrf.mxu0  ;;  %v6228_v1 = vpop.f32.mrf.mxu1 }
 0x2f2   : > { %6826 = vst [vmem:[#allocation20_spill] sm:$0xff] %v6228_v1 }
 0x2f3   : > { %v6226_v7 = vpop.f32.mrf.mxu0  ;;  %v6232_v58 = vpop.f32.mrf.mxu1 }
 0x2f4   : > { %6827 = vst [vmem:[#allocation21_spill] sm:$0xff] %v6232_v58 }
 0x2f5   : > { %v6230_v22 = vpop.f32.mrf.mxu0  ;;  %v6236_v13 = vpop.f32.mrf.mxu1 }
 0x2f6   : > { %6828 = vst [vmem:[#allocation22_spill] sm:$0xff] %v6236_v13 }
 0x2f7   : > { %v6234_v31 = vpop.f32.mrf.mxu0  ;;  %v6240_v46 = vpop.f32.mrf.mxu1 }
 0x2f8   : > { %6829 = vst [vmem:[#allocation23_spill] sm:$0xff] %v6240_v46 }
 0x2f9   : > { %v6238_v15 = vpop.f32.mrf.mxu0  ;;  %v6244_v12 = vpop.f32.mrf.mxu1 }
 0x2fa   : > { %6830 = vst [vmem:[#allocation24_spill] sm:$0xff] %v6244_v12 }
 0x2fb   : > { %v6242_v40 = vpop.f32.mrf.mxu0 }
 0x2fc   : > { %v6248_v29 = vpop.f32.mrf.mxu1 }
 0x2fd   : > { %v6246_v56 = vpop.f32.mrf.mxu0  ;;  %6831 = vst [vmem:[#allocation25_spill] sm:$0xff] %v6248_v29 }
 0x2fe   : > { %v6252_v57 = vpop.f32.mrf.mxu1 }
 0x2ff   : > { %v6250_v4 = vpop.f32.mrf.mxu0  ;;  %6832 = vst [vmem:[#allocation26_spill] sm:$0xff] %v6252_v57 }
 0x300   : > { %v6256_v43 = vpop.f32.mrf.mxu1 }
 0x301   : > { %v6254_v48 = vpop.f32.mrf.mxu0  ;;  %6833 = vst [vmem:[#allocation27_spill] sm:$0xff] %v6256_v43 }
 0x302   : > { %v6260_v39 = vpop.f32.mrf.mxu1 }
 0x303   : > { %v6258_v38 = vpop.f32.mrf.mxu0  ;;  %6834 = vst [vmem:[#allocation28_spill] sm:$0xff] %v6260_v39 }
 0x305   : > { %v6262_v61 = vpop.f32.mrf.mxu0  ;;  %v6264_v41 = vpop.f32.mrf.mxu1 }
 0x306   : > { %6835 = vst [vmem:[#allocation29_spill] sm:$0xff] %v6264_v41 }
 0x307   : > { %v6266_v5 = vpop.f32.mrf.mxu0  ;;  %v6268_v26 = vpop.f32.mrf.mxu1 }
 0x308   : > { %6836 = vst [vmem:[#allocation30_spill] sm:$0xff] %v6268_v26 }
 0x309   : > { %v6270_v17 = vpop.f32.mrf.mxu0  ;;  %v6272_v3 = vpop.f32.mrf.mxu1 }
 0x30a   : > { %6837 = vst [vmem:[#allocation31_spill] sm:$0xff] %v6272_v3 }
 0x30b   : > { %v6274_v23 = vpop.f32.mrf.mxu0  ;;  %v6276_v6 = vpop.f32.mrf.mxu1 }
 0x30c   : > { %6838 = vst [vmem:[#allocation32_spill] sm:$0xff] %v6276_v6 }
 0x30d   : > { %v6278_v43 = vpop.f32.mrf.mxu0 }
 0x30f   : > { %v6280_v57 = vpop.f32.mrf.mxu1  ;;  %v6282_v39 = vpop.f32.mrf.mxu0 }
 0x310   : > { %6839 = vst [vmem:[#allocation33_spill] sm:$0xff] %v6280_v57 }
 0x311   : > { %v6284_v29 = vpop.f32.mrf.mxu1  ;;  %v6286_v41 = vpop.f32.mrf.mxu0 }
 0x312   : > { %6840 = vst [vmem:[#allocation34_spill] sm:$0xff] %v6284_v29 }
 0x313   : > { %v6288_v12 = vpop.f32.mrf.mxu1  ;;  %v6290_v26 = vpop.f32.mrf.mxu0 }
 0x314   : > { %6841 = vst [vmem:[#allocation35_spill] sm:$0xff] %v6288_v12 }
 0x315   : > { %v6292_v46 = vpop.f32.mrf.mxu1  ;;  %v6294_v3 = vpop.f32.mrf.mxu0 }
 0x316   : > { %6842 = vst [vmem:[#allocation36_spill] sm:$0xff] %v6292_v46 }
 0x317   : > { %v6296_v13 = vpop.f32.mrf.mxu1  ;;  %v6298_v6 = vpop.f32.mrf.mxu0 }
 0x318   : > { %6843 = vst [vmem:[#allocation37_spill] sm:$0xff] %v6296_v13 }
 0x319   : > { %v6300_v58 = vpop.f32.mrf.mxu1  ;;  %v6302_v57 = vpop.f32.mrf.mxu0 }
 0x31a   : > { %6844 = vst [vmem:[#allocation38_spill] sm:$0xff] %v6300_v58  ;;  %6845 = vst [vmem:[#allocation39_spill] sm:$0xff] %v6302_v57 }
 0x31b   : > { %v6304_v1 = vpop.f32.mrf.mxu1  ;;  %v6306_v29 = vpop.f32.mrf.mxu0 }
 0x31c   : > { %6846 = vst [vmem:[#allocation40_spill] sm:$0xff] %v6304_v1  ;;  %6847 = vst [vmem:[#allocation41_spill] sm:$0xff] %v6306_v29 }
 0x31d   : > { %v6308_v32 = vpop.f32.mrf.mxu1  ;;  %v6310_v12 = vpop.f32.mrf.mxu0 }
 0x31e   : > { %6848 = vst [vmem:[#allocation42_spill] sm:$0xff] %v6308_v32  ;;  %6849 = vst [vmem:[#allocation43_spill] sm:$0xff] %v6310_v12 }
 0x31f   : > { %v6312_v14 = vpop.f32.mrf.mxu1  ;;  %v6316_v36 = vpop.f32.mrf.mxu0 }
 0x320   : > { %6850 = vst [vmem:[#allocation44_spill] sm:$0xff] %v6312_v14  ;;  %6852 = vst [vmem:[#allocation46_spill] sm:$0xff] %v6316_v36 }
 0x321   : > { %v6314_v46 = vpop.f32.mrf.mxu1  ;;  %v6322_v58 = vpop.f32.mrf.mxu0 }
 0x322   : > { %6851 = vst [vmem:[#allocation45_spill] sm:$0xff] %v6314_v46  ;;  %6855 = vst [vmem:[#allocation49_spill] sm:$0xff] %v6322_v58  ;;  %v2605_v46 = vld [vmem:[%s6778_s6] sm:$0x3] }
 0x323   : > { %v6318_v13 = vpop.f32.mrf.mxu1  ;;  %v6328_v29 = vpop.f32.mrf.mxu0 }
 0x324   : > { %6853 = vst [vmem:[#allocation47_spill] sm:$0xff] %v6318_v13  ;;  %6858 = vst [vmem:[#allocation52_spill] sm:$0xff] %v6328_v29 }
 0x325   : > { %v6320_v47 = vpop.f32.mrf.mxu1  ;;  %v6337_v14 = vpop.f32.mrf.mxu0 }
 0x326   : > { %6854 = vst [vmem:[#allocation48_spill] sm:$0xff] %v6320_v47  ;;  %6861 = vst [vmem:[#allocation55_spill] sm:$0xff] %v6337_v14  ;;  %v6342_v47 = vrot.slane %v2605_v46, %v6817_v10 }
 0x327   : > { %v6324_v45 = vpop.f32.mrf.mxu1 }
 0x328   : > { %6856 = vst [vmem:[#allocation50_spill] sm:$0xff] %v6324_v45  ;;  %v3052_v29 = vadd.f32 %v6131_v59, %v6342_v47  ;;  %v3062_v57 = vadd.f32 %v6142_v42, %v6342_v47 }
 0x329   : > { %v6326_v1 = vpop.f32.mrf.mxu1 }
 0x32a   : > { %6857 = vst [vmem:[#allocation51_spill] sm:$0xff] %v6326_v1  ;;  %v6346_v1 = vpop.f32.mrf.mxu0  ;;  %v3255_v42 = vadd.f32 %v6222_v0, %v3062_v57 }
 0x32b   : > { %v6330_v32 = vpop.f32.mrf.mxu1  ;;  %6864 = vst [vmem:[#allocation58_spill] sm:$0xff] %v6346_v1 }
 0x32c   : > { %6859 = vst [vmem:[#allocation53_spill] sm:$0xff] %v6330_v32  ;;  %v6349_v32 = vrot.slane %v2605_v46, %v5127_v44  ;;  %v6357_v14 = vpop.f32.mrf.mxu0  ;;  %v3056_v44 = vadd.f32 %v6137_v35, %v6342_v47 }
 0x32d   : > { %v6332_v12 = vpop.f32.mrf.mxu1  ;;  %6867 = vst [vmem:[#allocation61_spill] sm:$0xff] %v6357_v14 }
 0x32e   : > { %6860 = vst [vmem:[#allocation54_spill] sm:$0xff] %v6332_v12  ;;  %v3054_v10 = vadd.f32 %v6135_v33, %v6349_v32  ;;  %v6365_v1 = vpop.f32.mrf.mxu0  ;;  %v3249_v14 = vadd.f32 %v6214_v30, %v3056_v44  ;;  %v4585_v33 = vld [vmem:[%s5024_s29] sm:$0xff]  ;;  %v3068_v57 = vadd.f32 %v6150_v21, %v6349_v32 }
 0x32f   : > { %v6339_v13 = vpop.f32.mrf.mxu1 }
 0x330   : > { %6862 = vst [vmem:[#allocation56_spill] sm:$0xff] %v6339_v13  ;;  %v3247_v46 = vadd.f32 %v6210_v53, %v3054_v10  ;;  %v6380_v30 = vpop.f32.mrf.mxu0 }
 0x331   : > { %v6344_v45 = vpop.f32.mrf.mxu1 }
 0x332   : > { %6863 = vst [vmem:[#allocation57_spill] sm:$0xff] %v6344_v45  ;;  %v3245_v45 = vadd.f32 %v6204_v19, %v3052_v29 }
 0x333   : > { %v6351_v12 = vpop.f32.mrf.mxu1 }
 0x334   : > { %6865 = vst [vmem:[#allocation59_spill] sm:$0xff] %v6351_v12 }
 0x335   : > { %v6355_v58 = vpop.f32.mrf.mxu1 }
 0x336   : > { %6866 = vst [vmem:[#allocation60_spill] sm:$0xff] %v6355_v58  ;;  %v3058_v58 = vadd.f32 %v6139_v50, %v6349_v32  ;;  %v4586_v50 = vld [vmem:[%s5024_s29 + $0x8] sm:$0xff] }
 0x338   : > { %v3437_v13 = vpop.f32.mrf.mxu1  ;;  %v3251_v35 = vadd.f32 %v6218_v63, %v3058_v58  ;;  %v4587_v63 = vld [vmem:[%s5024_s29 + $0x10] sm:$0xff] }
 0x339   : > { %v3438_v12 = vadd.f32 %v3437_v13, %v3245_v45 }
 0x33a   : > { %v3439_v59 = vpop.f32.mrf.mxu1 }
 0x33b   : > { %v3596_v36 = vadd.f32 %v4585_v33, %v3438_v12  ;;  %v3440_v19 = vadd.f32 %v3439_v59, %v3247_v46  ;;  %v3064_v12 = vadd.f32 %v6146_v54, %v6349_v32  ;;  %v4588_v46 = vld [vmem:[%s5024_s29 + $0x18] sm:$0xff]  ;;  %v6392_v33 = vpop.f32.mrf.mxu0 }
 0x33c   : > { %v3441_v29 = vpop.f32.mrf.mxu1 }
 0x33d   : > { %3660 = vst [vmem:[%s6376_s14] sm:$0xff] %v3596_v36  ;;  %v3597_v45 = vadd.f32 %v4586_v50, %v3440_v19  ;;  %v3442_v53 = vadd.f32 %v3441_v29, %v3249_v14  ;;  %v3066_v36 = vadd.f32 %v6148_v49, %v6342_v47  ;;  %v3257_v14 = vadd.f32 %v6226_v7, %v3064_v12  ;;  %v4589_v49 = vld [vmem:[%s5024_s29 + $0x20] sm:$0xff]  ;;  %v6404_v12 = vpop.f32.mrf.mxu0 }
 0x33e   : > { %v3443_v13 = vpop.f32.mrf.mxu1  ;;  %v3072_v50 = vadd.f32 %v6155_v34, %v6342_v47  ;;  %v4591_v34 = vld [vmem:[%s5024_s29 + $0x30] sm:$0xff] }
 0x33f   : > { %3661 = vst [vmem:[%s6376_s14 + $0x8] sm:$0xff] %v3597_v45  ;;  %v3598_v58 = vadd.f32 %v4587_v63, %v3442_v53  ;;  %v3444_v10 = vadd.f32 %v3443_v13, %v3251_v35  ;;  %v3259_v19 = vadd.f32 %v6230_v22, %v3066_v36  ;;  %v3261_v45 = vadd.f32 %v6234_v31, %v3068_v57  ;;  %v4590_v53 = vld [vmem:[%s5024_s29 + $0x28] sm:$0xff] }
 0x340   : > { %v3447_v44 = vpop.f32.mrf.mxu1  ;;  %v3265_v63 = vadd.f32 %v6238_v15, %v3072_v50 }
 0x341   : > { %3662 = vst [vmem:[%s6376_s14 + $0x10] sm:$0xff] %v3598_v58  ;;  %v3599_v59 = vadd.f32 %v4588_v46, %v3444_v10  ;;  %v3448_v54 = vadd.f32 %v3447_v44, %v3255_v42  ;;  %v3074_v42 = vadd.f32 %v6157_v55, %v6349_v32  ;;  %v3076_v44 = vadd.f32 %v6159_v25, %v6342_v47  ;;  %v4593_v25 = vld [vmem:[%s5024_s29 + $0x40] sm:$0xff] }
 0x342   : > { %v3449_v0 = vpop.f32.mrf.mxu1 }
 0x343   : > { %3663 = vst [vmem:[%s6376_s14 + $0x18] sm:$0xff] %v3599_v59  ;;  %v3600_v29 = vadd.f32 %v4589_v49, %v3448_v54  ;;  %v3450_v7 = vadd.f32 %v3449_v0, %v3257_v14  ;;  %v3267_v36 = vadd.f32 %v6242_v40, %v3074_v42  ;;  %v4592_v14 = vld [vmem:[%s5024_s29 + $0x38] sm:$0xff]  ;;  %v6416_v59 = vpop.f32.mrf.mxu0  ;;  %v3078_v54 = vadd.f32 %v6162_v11, %v6349_v32 }
 0x344   : > { %v3451_v35 = vpop.f32.mrf.mxu1  ;;  %v3269_v0 = vadd.f32 %v6246_v56, %v3076_v44  ;;  %v3082_v49 = vadd.f32 %v6166_v51, %v6342_v47  ;;  %v4595_v51 = vld [vmem:[%s5024_s29 + $0x50] sm:$0xff] }
 0x345   : > { %3664 = vst [vmem:[%s6376_s14 + $0x20] sm:$0xff] %v3600_v29  ;;  %v3601_v13 = vadd.f32 %v4590_v53, %v3450_v7  ;;  %v3452_v21 = vadd.f32 %v3451_v35, %v3259_v19  ;;  %v3271_v29 = vadd.f32 %v6250_v4, %v3078_v54  ;;  %v4594_v7 = vld [vmem:[%s5024_s29 + $0x48] sm:$0xff]  ;;  %v6428_v50 = vpop.f32.mrf.mxu0 }
 0x346   : > { %v3453_v22 = vpop.f32.mrf.mxu1  ;;  %v3275_v53 = vadd.f32 %v6254_v48, %v3082_v49 }
 0x347   : > { %3665 = vst [vmem:[%s6376_s14 + $0x28] sm:$0xff] %v3601_v13  ;;  %v3602_v58 = vadd.f32 %v4591_v34, %v3452_v21  ;;  %v3454_v31 = vadd.f32 %v3453_v22, %v3261_v45  ;;  %v3084_v45 = vadd.f32 %v6168_v20, %v6349_v32  ;;  %v3086_v22 = vadd.f32 %v6171_v24, %v6342_v47  ;;  %v4597_v24 = vld [vmem:[%s5024_s29 + $0x60] sm:$0xff] }
 0x348   : > { %v3457_v10 = vpop.f32.mrf.mxu1 }
 0x349   : > { %3666 = vst [vmem:[%s6376_s14 + $0x30] sm:$0xff] %v3602_v58  ;;  %v3603_v46 = vadd.f32 %v4592_v14, %v3454_v31  ;;  %v3458_v55 = vadd.f32 %v3457_v10, %v3265_v63  ;;  %v3277_v42 = vadd.f32 %v6258_v38, %v3084_v45  ;;  %v4596_v63 = vld [vmem:[%s5024_s29 + $0x58] sm:$0xff]  ;;  %v6440_v58 = vpop.f32.mrf.mxu0  ;;  %v3088_v31 = vadd.f32 %v6175_v16, %v6349_v32 }
 0x34a   : > { %v3459_v15 = vpop.f32.mrf.mxu1  ;;  %v3279_v10 = vadd.f32 %v6262_v61, %v3086_v22  ;;  %v3092_v14 = vadd.f32 %v6177_v62, %v6342_v47  ;;  %v4599_v62 = vld [vmem:[%s5024_s29 + $0x70] sm:$0xff] }
 0x34b   : > { %3667 = vst [vmem:[%s6376_s14 + $0x38] sm:$0xff] %v3603_v46  ;;  %v3604_v57 = vadd.f32 %v4593_v25, %v3458_v55  ;;  %v3460_v40 = vadd.f32 %v3459_v15, %v3267_v36  ;;  %v3281_v46 = vadd.f32 %v6266_v5, %v3088_v31  ;;  %v4598_v55 = vld [vmem:[%s5024_s29 + $0x68] sm:$0xff]  ;;  %v6452_v54 = vpop.f32.mrf.mxu0 }
 0x34c   : > { %v3461_v19 = vpop.f32.mrf.mxu1  ;;  %v3285_v25 = vadd.f32 %v6270_v17, %v3092_v14 }
 0x34d   : > { %3668 = vst [vmem:[%s6376_s14 + $0x40] sm:$0xff] %v3604_v57  ;;  %v3605_v35 = vadd.f32 %v4594_v7, %v3460_v40  ;;  %v3462_v11 = vadd.f32 %v3461_v19, %v3269_v0  ;;  %v3094_v0 = vadd.f32 %v6179_v18, %v6349_v32  ;;  %v3096_v19 = vadd.f32 %v6182_v8, %v6342_v47  ;;  %v4601_v8 = vld [vmem:[%s5024_s29 + $0x80] sm:$0xff] }
 0x34e   : > { %v3463_v56 = vpop.f32.mrf.mxu1 }
 0x34f   : > { %3669 = vst [vmem:[%s6376_s14 + $0x48] sm:$0xff] %v3605_v35  ;;  %v3606_v13 = vadd.f32 %v4595_v51, %v3462_v11  ;;  %v3464_v4 = vadd.f32 %v3463_v56, %v3271_v29  ;;  %v3287_v49 = vadd.f32 %v6274_v23, %v3094_v0  ;;  %v4600_v29 = vld [vmem:[%s5024_s29 + $0x78] sm:$0xff]  ;;  %v6464_v35 = vpop.f32.mrf.mxu0  ;;  %v3098_v11 = vadd.f32 %v6186_v52, %v6349_v32 }
 0x350   : > { %v3467_v21 = vpop.f32.mrf.mxu1  ;;  %v3289_v56 = vadd.f32 %v6278_v43, %v3096_v19  ;;  %v3102_v51 = vadd.f32 %v6188_v2, %v6342_v47  ;;  %v4603_v2 = vld [vmem:[%s5024_s29 + $0x90] sm:$0xff] }
 0x351   : > { %3670 = vst [vmem:[%s6376_s14 + $0x50] sm:$0xff] %v3606_v13  ;;  %v3607_v34 = vadd.f32 %v4596_v63, %v3464_v4  ;;  %v3468_v20 = vadd.f32 %v3467_v21, %v3275_v53  ;;  %v3291_v13 = vadd.f32 %v6282_v39, %v3098_v11  ;;  %v4602_v4 = vld [vmem:[%s5024_s29 + $0x88] sm:$0xff]  ;;  %v6476_v22 = vpop.f32.mrf.mxu0 }
 0x352   : > { %v3469_v48 = vpop.f32.mrf.mxu1  ;;  %v3295_v63 = vadd.f32 %v6286_v41, %v3102_v51  ;;  %v6869_v19 = vld [vmem:[#allocation16_spill] sm:$0xff]  ;;  %v4609_v51 = vld [vmem:[%s5024_s29 + $0xc0] sm:$0xff] }
 0x353   : > { %3671 = vst [vmem:[%s6376_s14 + $0x58] sm:$0xff] %v3607_v34  ;;  %v3608_v44 = vadd.f32 %v4597_v24, %v3468_v20  ;;  %v3470_v38 = vadd.f32 %v3469_v48, %v3277_v42  ;;  %v3104_v42 = vadd.f32 %v6190_v60, %v6349_v32  ;;  %v3106_v48 = vadd.f32 %v6193_v28, %v6342_v47  ;;  %v4605_v28 = vld [vmem:[%s5024_s29 + $0xa0] sm:$0xff] }
 0x354   : > { %v3471_v36 = vpop.f32.mrf.mxu1 }
 0x355   : > { %3672 = vst [vmem:[%s6376_s14 + $0x60] sm:$0xff] %v3608_v44  ;;  %v3609_v15 = vadd.f32 %v4598_v55, %v3470_v38  ;;  %v3472_v16 = vadd.f32 %v3471_v36, %v3279_v10  ;;  %v3297_v31 = vadd.f32 %v6290_v26, %v3104_v42  ;;  %v4604_v10 = vld [vmem:[%s5024_s29 + $0x98] sm:$0xff]  ;;  %v6488_v44 = vpop.f32.mrf.mxu0  ;;  %v3108_v38 = vadd.f32 %v6197_v27, %v6349_v32 }
 0x356   : > { %v3473_v61 = vpop.f32.mrf.mxu1  ;;  %v3299_v36 = vadd.f32 %v6294_v3, %v3106_v48  ;;  %v3112_v55 = vadd.f32 %v6199_v9, %v6342_v47  ;;  %v4607_v9 = vld [vmem:[%s5024_s29 + $0xb0] sm:$0xff]  ;;  %v6874_v42 = vld [vmem:[#allocation46_spill] sm:$0xff] }
 0x357   : > { %3673 = vst [vmem:[%s6376_s14 + $0x68] sm:$0xff] %v3609_v15  ;;  %v3610_v57 = vadd.f32 %v4599_v62, %v3472_v16  ;;  %v3474_v5 = vadd.f32 %v3473_v61, %v3281_v46  ;;  %v3301_v15 = vadd.f32 %v6298_v6, %v3108_v38  ;;  %v4606_v16 = vld [vmem:[%s5024_s29 + $0xa8] sm:$0xff]  ;;  %v6500_v0 = vpop.f32.mrf.mxu0 }
 0x358   : > { %v3477_v40 = vpop.f32.mrf.mxu1  ;;  %v6868_v62 = vld [vmem:[#allocation39_spill] sm:$0xff] }
 0x359   : > { %3674 = vst [vmem:[%s6376_s14 + $0x70] sm:$0xff] %v3610_v57  ;;  %v3611_v7 = vadd.f32 %v4600_v29, %v3474_v5  ;;  %v3478_v18 = vadd.f32 %v3477_v40, %v3285_v25  ;;  %v3114_v25 = vadd.f32 %v6202_v37, %v6349_v32  ;;  %v3305_v57 = vadd.f32 %v6868_v62, %v3112_v55  ;;  %v6870_v29 = vld [vmem:[#allocation41_spill] sm:$0xff]  ;;  %v6512_v11 = vpop.f32.mrf.mxu0 }
 0x35a   : > { %v3479_v17 = vpop.f32.mrf.mxu1 }
 0x35b   : > { %3675 = vst [vmem:[%s6376_s14 + $0x78] sm:$0xff] %v3611_v7  ;;  %v3612_v45 = vadd.f32 %v4601_v8, %v3478_v18  ;;  %v3480_v23 = vadd.f32 %v3479_v17, %v3287_v49  ;;  %v3116_v49 = vadd.f32 %v6869_v19, %v6342_v47  ;;  %v3307_v7 = vadd.f32 %v6870_v29, %v3114_v25  ;;  %v4608_v18 = vld [vmem:[%s5024_s29 + $0xb8] sm:$0xff]  ;;  %v6879_v25 = vld [vmem:[#allocation20_spill] sm:$0xff] }
 0x35c   : > { %v3481_v53 = vpop.f32.mrf.mxu1  ;;  %v6871_v8 = vld [vmem:[#allocation17_spill] sm:$0xff]  ;;  %v3128_v62 = vadd.f32 %v6879_v25, %v6349_v32 }
 0x35d   : > { %3676 = vst [vmem:[%s6376_s14 + $0x80] sm:$0xff] %v3612_v45  ;;  %v3613_v21 = vadd.f32 %v4602_v4, %v3480_v23  ;;  %v3482_v52 = vadd.f32 %v3481_v53, %v3289_v56  ;;  %v3118_v45 = vadd.f32 %v6871_v8, %v6349_v32  ;;  %v6872_v23 = vld [vmem:[#allocation43_spill] sm:$0xff] }
 0x35e   : > { %v3483_v43 = vpop.f32.mrf.mxu1  ;;  %v3309_v53 = vadd.f32 %v6872_v23, %v3116_v49  ;;  %v6881_v49 = vld [vmem:[#allocation21_spill] sm:$0xff]  ;;  %v6883_v23 = vld [vmem:[#allocation22_spill] sm:$0xff] }
 0x35f   : > { %3677 = vst [vmem:[%s6376_s14 + $0x88] sm:$0xff] %v3613_v21  ;;  %v3614_v34 = vadd.f32 %v4603_v2, %v3482_v52  ;;  %v3484_v39 = vadd.f32 %v3483_v43, %v3291_v13  ;;  %v6873_v52 = vld [vmem:[#allocation18_spill] sm:$0xff]  ;;  %v4610_v2 = vld [vmem:[%s5024_s29 + $0xc8] sm:$0xff]  ;;  %v3132_v29 = vadd.f32 %v6881_v49, %v6342_v47 }
 0x360   : > { %v3487_v20 = vpop.f32.mrf.mxu1  ;;  %v3122_v43 = vadd.f32 %v6873_v52, %v6342_v47  ;;  %v4620_v49 = vld [vmem:[%s5024_s29 + $0x118] sm:$0xff] }
 0x361   : > { %3678 = vst [vmem:[%s6376_s14 + $0x90] sm:$0xff] %v3614_v34  ;;  %v3615_v24 = vadd.f32 %v4604_v10, %v3484_v39  ;;  %v3488_v60 = vadd.f32 %v3487_v20, %v3295_v63  ;;  %v3311_v63 = vadd.f32 %v6874_v42, %v3118_v45  ;;  %v6524_v20 = vpop.f32.mrf.mxu0  ;;  %v6885_v42 = vld [vmem:[#allocation23_spill] sm:$0xff] }
 0x362   : > { %v3489_v41 = vpop.f32.mrf.mxu1 }
 0x363   : > { %3679 = vst [vmem:[%s6376_s14 + $0x98] sm:$0xff] %v3615_v24  ;;  %v3616_v14 = vadd.f32 %v4605_v28, %v3488_v60  ;;  %v3490_v26 = vadd.f32 %v3489_v41, %v3297_v31  ;;  %v6875_v31 = vld [vmem:[#allocation15_spill] sm:$0xff]  ;;  %v6876_v24 = vld [vmem:[#allocation49_spill] sm:$0xff] }
 0x364   : > { %v3491_v46 = vpop.f32.mrf.mxu1  ;;  %v3124_v10 = vadd.f32 %v6875_v31, %v6349_v32  ;;  %v3315_v60 = vadd.f32 %v6876_v24, %v3122_v43  ;;  %v4611_v41 = vld [vmem:[%s5024_s29 + $0xd0] sm:$0xff] }
 0x365   : > { %3680 = vst [vmem:[%s6376_s14 + $0xa0] sm:$0xff] %v3616_v14  ;;  %v3617_v61 = vadd.f32 %v4606_v16, %v3490_v26  ;;  %v3492_v27 = vadd.f32 %v3491_v46, %v3299_v36  ;;  %v6877_v14 = vld [vmem:[#allocation19_spill] sm:$0xff]  ;;  %v6878_v46 = vld [vmem:[#allocation52_spill] sm:$0xff] }
 0x366   : > { %v3493_v3 = vpop.f32.mrf.mxu1  ;;  %v3126_v26 = vadd.f32 %v6877_v14, %v6342_v47  ;;  %v3317_v55 = vadd.f32 %v6878_v46, %v3124_v10  ;;  %v6886_v24 = vld [vmem:[#allocation24_spill] sm:$0xff]  ;;  %v6887_v14 = vld [vmem:[#allocation25_spill] sm:$0xff] }
 0x367   : > { %3681 = vst [vmem:[%s6376_s14 + $0xa8] sm:$0xff] %v3617_v61  ;;  %v3618_v5 = vadd.f32 %v4607_v9, %v3492_v27  ;;  %v3494_v6 = vadd.f32 %v3493_v3, %v3301_v15  ;;  %v4612_v15 = vld [vmem:[%s5024_s29 + $0xd8] sm:$0xff]  ;;  %v6536_v27 = vpop.f32.mrf.mxu0 }
 0x368   : > { %v3497_v40 = vpop.f32.mrf.mxu1 }
 0x369   : > { %3682 = vst [vmem:[%s6376_s14 + $0xb0] sm:$0xff] %v3618_v5  ;;  %v3619_v17 = vadd.f32 %v4608_v18, %v3494_v6  ;;  %v3498_v37 = vadd.f32 %v3497_v40, %v3305_v57  ;;  %v6880_v57 = vld [vmem:[#allocation55_spill] sm:$0xff]  ;;  %v6548_v8 = vpop.f32.mrf.mxu0 }
 0x36a   : > { %v3499_v56 = vpop.f32.mrf.mxu1  ;;  %v3319_v9 = vadd.f32 %v6880_v57, %v3126_v26  ;;  %v4613_v5 = vld [vmem:[%s5024_s29 + $0xe0] sm:$0xff]  ;;  %v3142_v26 = vadd.f32 %v6887_v14, %v6342_v47  ;;  %v4619_v57 = vld [vmem:[%s5024_s29 + $0x110] sm:$0xff] }
 0x36b   : > { %3683 = vst [vmem:[%s6376_s14 + $0xb8] sm:$0xff] %v3619_v17  ;;  %v3620_v13 = vadd.f32 %v4609_v51, %v3498_v37  ;;  %v3500_v4 = vadd.f32 %v3499_v56, %v3307_v7  ;;  %v6882_v7 = vld [vmem:[#allocation58_spill] sm:$0xff]  ;;  %v4614_v17 = vld [vmem:[%s5024_s29 + $0xe8] sm:$0xff]  ;;  %v6884_v51 = vld [vmem:[#allocation61_spill] sm:$0xff]  ;;  %v6560_v31 = vpop.f32.mrf.mxu0 }
 0x36c   : > { %v3501_v21 = vpop.f32.mrf.mxu1  ;;  %v3321_v18 = vadd.f32 %v6882_v7, %v3128_v62  ;;  %v3335_v62 = vadd.f32 %v6404_v12, %v3142_v26  ;;  %v6894_v14 = vld [vmem:[#allocation32_spill] sm:$0xff] }
 0x36d   : > { %3684 = vst [vmem:[%s6376_s14 + $0xc0] sm:$0xff] %v3620_v13  ;;  %v3621_v34 = vadd.f32 %v4610_v2, %v3500_v4  ;;  %v3502_v39 = vadd.f32 %v3501_v21, %v3309_v53  ;;  %v3134_v53 = vadd.f32 %v6883_v23, %v6349_v32  ;;  %v3325_v13 = vadd.f32 %v6884_v51, %v3132_v29  ;;  %v4615_v4 = vld [vmem:[%s5024_s29 + $0xf0] sm:$0xff] }
 0x36e   : > { %v3503_v48 = vpop.f32.mrf.mxu1  ;;  %v6891_v51 = vld [vmem:[#allocation29_spill] sm:$0xff]  ;;  %v3158_v26 = vadd.f32 %v6894_v14, %v6349_v32 }
 0x36f   : > { %3685 = vst [vmem:[%s6376_s14 + $0xc8] sm:$0xff] %v3621_v34  ;;  %v3622_v38 = vadd.f32 %v4611_v41, %v3502_v39  ;;  %v3504_v36 = vadd.f32 %v3503_v48, %v3311_v63  ;;  %v3136_v63 = vadd.f32 %v6885_v42, %v6342_v47  ;;  %v3327_v2 = vadd.f32 %v6365_v1, %v3134_v53  ;;  %v4616_v34 = vld [vmem:[%s5024_s29 + $0xf8] sm:$0xff] }
 0x370   : > { %v3507_v28 = vpop.f32.mrf.mxu1 }
 0x371   : > { %3686 = vst [vmem:[%s6376_s14 + $0xd0] sm:$0xff] %v3622_v38  ;;  %v3623_v16 = vadd.f32 %v4612_v15, %v3504_v36  ;;  %v3508_v61 = vadd.f32 %v3507_v28, %v3315_v60  ;;  %v3138_v60 = vadd.f32 %v6886_v24, %v6349_v32  ;;  %v3329_v41 = vadd.f32 %v6380_v30, %v3136_v63  ;;  %v4617_v38 = vld [vmem:[%s5024_s29 + $0x100] sm:$0xff] }
 0x372   : > { %v3509_v3 = vpop.f32.mrf.mxu1  ;;  %v6892_v63 = vld [vmem:[#allocation30_spill] sm:$0xff]  ;;  %v6893_v24 = vld [vmem:[#allocation31_spill] sm:$0xff] }
 0x373   : > { %3687 = vst [vmem:[%s6376_s14 + $0xd8] sm:$0xff] %v3623_v16  ;;  %v3624_v6 = vadd.f32 %v4613_v5, %v3508_v61  ;;  %v3510_v40 = vadd.f32 %v3509_v3, %v3317_v55  ;;  %v3331_v46 = vadd.f32 %v6392_v33, %v3138_v60  ;;  %v4618_v55 = vld [vmem:[%s5024_s29 + $0x108] sm:$0xff]  ;;  %v6572_v61 = vpop.f32.mrf.mxu0  ;;  %v6888_v3 = vld [vmem:[#allocation26_spill] sm:$0xff]  ;;  %v3156_v60 = vadd.f32 %v6893_v24, %v6342_v47  ;;  %v4631_v24 = vld [vmem:[%s5024_s29 + $0x170] sm:$0xff] }
 0x374   : > { %v3511_v19 = vpop.f32.mrf.mxu1  ;;  %v3144_v25 = vadd.f32 %v6888_v3, %v6349_v32 }
 0x375   : > { %3688 = vst [vmem:[%s6376_s14 + $0xe0] sm:$0xff] %v3624_v6  ;;  %v3625_v37 = vadd.f32 %v4614_v17, %v3510_v40  ;;  %v3512_v56 = vadd.f32 %v3511_v19, %v3319_v9  ;;  %v6889_v6 = vld [vmem:[#allocation27_spill] sm:$0xff]  ;;  %v6890_v17 = vld [vmem:[#allocation28_spill] sm:$0xff] }
 0x376   : > { %v3513_v45 = vpop.f32.mrf.mxu1  ;;  %v3146_v40 = vadd.f32 %v6889_v6, %v6342_v47  ;;  %v3337_v19 = vadd.f32 %v6416_v59, %v3144_v25  ;;  %v3351_v25 = vadd.f32 %v6488_v44, %v3158_v26 }
 0x377   : > { %3689 = vst [vmem:[%s6376_s14 + $0xe8] sm:$0xff] %v3625_v37  ;;  %v3626_v21 = vadd.f32 %v4615_v4, %v3512_v56  ;;  %v3514_v52 = vadd.f32 %v3513_v45, %v3321_v18  ;;  %v6584_v18 = vpop.f32.mrf.mxu0  ;;  %v3148_v37 = vadd.f32 %v6890_v17, %v6349_v32  ;;  %v4621_v45 = vld [vmem:[%s5024_s29 + $0x120] sm:$0xff] }
 0x378   : > { %v3517_v43 = vpop.f32.mrf.mxu1  ;;  %v3339_v56 = vadd.f32 %v6428_v50, %v3146_v40 }
 0x379   : > { %3690 = vst [vmem:[%s6376_s14 + $0xf0] sm:$0xff] %v3626_v21  ;;  %v3627_v39 = vadd.f32 %v4616_v34, %v3514_v52  ;;  %v3518_v48 = vadd.f32 %v3517_v43, %v3325_v13  ;;  %v3152_v13 = vadd.f32 %v6891_v51, %v6342_v47  ;;  %v3341_v4 = vadd.f32 %v6440_v58, %v3148_v37  ;;  %v4622_v21 = vld [vmem:[%s5024_s29 + $0x128] sm:$0xff]  ;;  %v6596_v42 = vpop.f32.mrf.mxu0  ;;  %v4628_v37 = vld [vmem:[%s5024_s29 + $0x158] sm:$0xff] }
 0x37a   : > { %v3519_v10 = vpop.f32.mrf.mxu1 }
 0x37b   : > { %3691 = vst [vmem:[%s6376_s14 + $0xf8] sm:$0xff] %v3627_v39  ;;  %v3628_v36 = vadd.f32 %v4617_v38, %v3518_v48  ;;  %v3520_v1 = vadd.f32 %v3519_v10, %v3327_v2  ;;  %v3154_v2 = vadd.f32 %v6892_v63, %v6349_v32  ;;  %v3345_v34 = vadd.f32 %v6452_v54, %v3152_v13  ;;  %v4623_v39 = vld [vmem:[%s5024_s29 + $0x130] sm:$0xff]  ;;  %v4624_v38 = vld [vmem:[%s5024_s29 + $0x138] sm:$0xff]  ;;  %v4629_v13 = vld [vmem:[%s5024_s29 + $0x160] sm:$0xff] }
 0x37c   : > { %v3521_v28 = vpop.f32.mrf.mxu1  ;;  %v4630_v63 = vld [vmem:[%s5024_s29 + $0x168] sm:$0xff] }
 0x37d   : > { %3692 = vst [vmem:[%s6376_s14 + $0x100] sm:$0xff] %v3628_v36  ;;  %v3629_v15 = vadd.f32 %v4618_v55, %v3520_v1  ;;  %v3522_v16 = vadd.f32 %v3521_v28, %v3329_v41  ;;  %v3347_v41 = vadd.f32 %v6464_v35, %v3154_v2  ;;  %v6608_v28 = vpop.f32.mrf.mxu0  ;;  %v4625_v55 = vld [vmem:[%s5024_s29 + $0x140] sm:$0xff] }
 0x37e   : > { %v3523_v30 = vpop.f32.mrf.mxu1 }
 0x37f   : > { %3693 = vst [vmem:[%s6376_s14 + $0x108] sm:$0xff] %v3629_v15  ;;  %v3630_v9 = vadd.f32 %v4619_v57, %v3522_v16  ;;  %v3524_v33 = vadd.f32 %v3523_v30, %v3331_v46  ;;  %v3349_v46 = vadd.f32 %v6476_v22, %v3156_v60  ;;  %v6895_v30 = vld [vmem:[#allocation33_spill] sm:$0xff] }
 0x380   : > { %v3527_v5 = vpop.f32.mrf.mxu1  ;;  %v3162_v3 = vadd.f32 %v6895_v30, %v6342_v47 }
 0x381   : > { %3694 = vst [vmem:[%s6376_s14 + $0x110] sm:$0xff] %v3630_v9  ;;  %v3631_v29 = vadd.f32 %v4620_v49, %v3524_v33  ;;  %v3528_v7 = vadd.f32 %v3527_v5, %v3335_v62  ;;  %v4626_v62 = vld [vmem:[%s5024_s29 + $0x148] sm:$0xff]  ;;  %v6620_v33 = vpop.f32.mrf.mxu0  ;;  %v6896_v5 = vld [vmem:[#allocation34_spill] sm:$0xff] }
 0x382   : > { %v3529_v12 = vpop.f32.mrf.mxu1  ;;  %v3164_v6 = vadd.f32 %v6896_v5, %v6349_v32  ;;  %v3355_v40 = vadd.f32 %v6500_v0, %v3162_v3 }
 0x383   : > { %3695 = vst [vmem:[%s6376_s14 + $0x118] sm:$0xff] %v3631_v29  ;;  %v3632_v23 = vadd.f32 %v4621_v45, %v3528_v7  ;;  %v3530_v59 = vadd.f32 %v3529_v12, %v3337_v19  ;;  %v4627_v19 = vld [vmem:[%s5024_s29 + $0x150] sm:$0xff]  ;;  %v6897_v7 = vld [vmem:[#allocation35_spill] sm:$0xff] }
 0x384   : > { %v3531_v53 = vpop.f32.mrf.mxu1  ;;  %v3166_v12 = vadd.f32 %v6897_v7, %v6342_v47  ;;  %v3357_v17 = vadd.f32 %v6512_v11, %v3164_v6 }
 0x385   : > { %3696 = vst [vmem:[%s6376_s14 + $0x120] sm:$0xff] %v3632_v23  ;;  %v3633_v52 = vadd.f32 %v4622_v21, %v3530_v59  ;;  %v3532_v43 = vadd.f32 %v3531_v53, %v3339_v56  ;;  %v6632_v23 = vpop.f32.mrf.mxu0  ;;  %v6898_v59 = vld [vmem:[#allocation36_spill] sm:$0xff] }
 0x386   : > { %v3533_v50 = vpop.f32.mrf.mxu1  ;;  %v3168_v53 = vadd.f32 %v6898_v59, %v6349_v32  ;;  %v3359_v51 = vadd.f32 %v6524_v20, %v3166_v12  ;;  %v6905_v12 = vld [vmem:[#allocation47_spill] sm:$0xff] }
 0x387   : > { %3697 = vst [vmem:[%s6376_s14 + $0x128] sm:$0xff] %v3633_v52  ;;  %v3634_v48 = vadd.f32 %v4623_v39, %v3532_v43  ;;  %v3534_v58 = vadd.f32 %v3533_v50, %v3341_v4  ;;  %v6899_v52 = vld [vmem:[#allocation37_spill] sm:$0xff]  ;;  %v6644_v39 = vpop.f32.mrf.mxu0 }
 0x388   : > { %v3537_v10 = vpop.f32.mrf.mxu1  ;;  %v3172_v43 = vadd.f32 %v6899_v52, %v6342_v47  ;;  %v3361_v50 = vadd.f32 %v6536_v27, %v3168_v53  ;;  %v6906_v53 = vld [vmem:[#allocation48_spill] sm:$0xff]  ;;  %v6907_v52 = vld [vmem:[#allocation50_spill] sm:$0xff] }
 0x389   : > { %3698 = vst [vmem:[%s6376_s14 + $0x130] sm:$0xff] %v3634_v48  ;;  %v3635_v36 = vadd.f32 %v4624_v38, %v3534_v58  ;;  %v3538_v1 = vadd.f32 %v3537_v10, %v3345_v34  ;;  %v6900_v48 = vld [vmem:[#allocation38_spill] sm:$0xff]  ;;  %v6901_v38 = vld [vmem:[#allocation40_spill] sm:$0xff] }
 0x38a   : > { %v3539_v54 = vpop.f32.mrf.mxu1  ;;  %v3174_v58 = vadd.f32 %v6900_v48, %v6349_v32  ;;  %v3365_v10 = vadd.f32 %v6548_v8, %v3172_v43  ;;  %v3192_v43 = vadd.f32 %v6907_v52, %v6342_v47  ;;  %v6908_v48 = vld [vmem:[#allocation51_spill] sm:$0xff] }
 0x38b   : > { %3699 = vst [vmem:[%s6376_s14 + $0x138] sm:$0xff] %v3635_v36  ;;  %v3636_v15 = vadd.f32 %v4625_v55, %v3538_v1  ;;  %v3540_v35 = vadd.f32 %v3539_v54, %v3347_v41  ;;  %v3176_v36 = vadd.f32 %v6901_v38, %v6342_v47  ;;  %v4632_v54 = vld [vmem:[%s5024_s29 + $0x178] sm:$0xff] }
 0x38c   : > { %v3541_v16 = vpop.f32.mrf.mxu1  ;;  %v3367_v1 = vadd.f32 %v6560_v31, %v3174_v58  ;;  %v6902_v55 = vld [vmem:[#allocation42_spill] sm:$0xff]  ;;  %v3194_v58 = vadd.f32 %v6908_v48, %v6349_v32 }
 0x38d   : > { %3700 = vst [vmem:[%s6376_s14 + $0x140] sm:$0xff] %v3636_v15  ;;  %v3637_v57 = vadd.f32 %v4626_v62, %v3540_v35  ;;  %v3542_v9 = vadd.f32 %v3541_v16, %v3349_v46  ;;  %v3386_v46 = vpop.f32.mrf.mxu0  ;;  %v3178_v15 = vadd.f32 %v6902_v55, %v6349_v32  ;;  %v3369_v35 = vadd.f32 %v6572_v61, %v3176_v36  ;;  %v4633_v16 = vld [vmem:[%s5024_s29 + $0x180] sm:$0xff] }
 0x38e   : > { %v3543_v22 = vpop.f32.mrf.mxu1  ;;  %v3387_v36 = vadd.f32 %v3386_v46, %v3194_v58  ;;  %v6911_v46 = vld [vmem:[#allocation56_spill] sm:$0xff] }
 0x38f   : > { %3701 = vst [vmem:[%s6376_s14 + $0x148] sm:$0xff] %v3637_v57  ;;  %v3638_v49 = vadd.f32 %v4627_v19, %v3542_v9  ;;  %v3544_v44 = vadd.f32 %v3543_v22, %v3351_v25  ;;  %v6903_v25 = vld [vmem:[#allocation44_spill] sm:$0xff]  ;;  %v3371_v57 = vadd.f32 %v6584_v18, %v3178_v15  ;;  %v3388_v6 = vpop.f32.mrf.mxu0 }
 0x390   : > { %v3547_v29 = vpop.f32.mrf.mxu1  ;;  %v3182_v62 = vadd.f32 %v6903_v25, %v6342_v47  ;;  %v4634_v9 = vld [vmem:[%s5024_s29 + $0x188] sm:$0xff] }
 0x391   : > { %3702 = vst [vmem:[%s6376_s14 + $0x150] sm:$0xff] %v3638_v49  ;;  %v3639_v56 = vadd.f32 %v4628_v37, %v3544_v44  ;;  %v3548_v45 = vadd.f32 %v3547_v29, %v3355_v40  ;;  %v6904_v40 = vld [vmem:[#allocation45_spill] sm:$0xff]  ;;  %v3390_v59 = vpop.f32.mrf.mxu0 }
 0x392   : > { %v3549_v0 = vpop.f32.mrf.mxu1  ;;  %v3184_v19 = vadd.f32 %v6904_v40, %v6349_v32  ;;  %v3375_v49 = vadd.f32 %v6596_v42, %v3182_v62  ;;  %v4635_v44 = vld [vmem:[%s5024_s29 + $0x190] sm:$0xff]  ;;  %v4642_v62 = vld [vmem:[%s5024_s29 + $0x1c8] sm:$0xff] }
 0x393   : > { %3703 = vst [vmem:[%s6376_s14 + $0x158] sm:$0xff] %v3639_v56  ;;  %v3640_v4 = vadd.f32 %v4629_v13, %v3548_v45  ;;  %v3550_v11 = vadd.f32 %v3549_v0, %v3357_v17  ;;  %v3186_v17 = vadd.f32 %v6905_v12, %v6342_v47  ;;  %v4636_v56 = vld [vmem:[%s5024_s29 + $0x198] sm:$0xff] }
 0x394   : > { %v3551_v21 = vpop.f32.mrf.mxu1  ;;  %v3377_v37 = vadd.f32 %v6608_v28, %v3184_v19  ;;  %v4643_v19 = vld [vmem:[%s5024_s29 + $0x1d0] sm:$0xff] }
 0x395   : > { %3704 = vst [vmem:[%s6376_s14 + $0x160] sm:$0xff] %v3640_v4  ;;  %v3641_v2 = vadd.f32 %v4630_v63, %v3550_v11  ;;  %v3552_v34 = vadd.f32 %v3551_v21, %v3359_v51  ;;  %v3188_v51 = vadd.f32 %v6906_v53, %v6349_v32  ;;  %v3379_v13 = vadd.f32 %v6620_v33, %v3186_v17  ;;  %v4637_v4 = vld [vmem:[%s5024_s29 + $0x1a0] sm:$0xff]  ;;  %v4638_v63 = vld [vmem:[%s5024_s29 + $0x1a8] sm:$0xff]  ;;  %v4644_v17 = vld [vmem:[%s5024_s29 + $0x1d8] sm:$0xff] }
 0x396   : > { %v3553_v20 = vpop.f32.mrf.mxu1 }
 0x397   : > { %3705 = vst [vmem:[%s6376_s14 + $0x168] sm:$0xff] %v3641_v2  ;;  %v3642_v60 = vadd.f32 %v4631_v24, %v3552_v34  ;;  %v3554_v27 = vadd.f32 %v3553_v20, %v3361_v50  ;;  %v3381_v50 = vadd.f32 %v6632_v23, %v3188_v51  ;;  %v3394_v20 = vpop.f32.mrf.mxu0  ;;  %v4639_v24 = vld [vmem:[%s5024_s29 + $0x1b0] sm:$0xff]  ;;  %v4645_v51 = vld [vmem:[%s5024_s29 + $0x1e0] sm:$0xff] }
 0x398   : > { %v3557_v41 = vpop.f32.mrf.mxu1 }
 0x399   : > { %3706 = vst [vmem:[%s6376_s14 + $0x170] sm:$0xff] %v3642_v60  ;;  %v3643_v14 = vadd.f32 %v4632_v54, %v3554_v27  ;;  %v3558_v26 = vadd.f32 %v3557_v41, %v3365_v10  ;;  %v3385_v10 = vadd.f32 %v6644_v39, %v3192_v43  ;;  %v6909_v41 = vld [vmem:[#allocation53_spill] sm:$0xff]  ;;  %v6910_v39 = vld [vmem:[#allocation54_spill] sm:$0xff] }
 0x39a   : > { %v3559_v8 = vpop.f32.mrf.mxu1  ;;  %v3196_v38 = vadd.f32 %v6909_v41, %v6342_v47  ;;  %v3198_v55 = vadd.f32 %v6910_v39, %v6349_v32  ;;  %v4647_v43 = vld [vmem:[%s5024_s29 + $0x1f0] sm:$0xff] }
 0x39b   : > { %3707 = vst [vmem:[%s6376_s14 + $0x178] sm:$0xff] %v3643_v14  ;;  %v3644_v30 = vadd.f32 %v4633_v16, %v3558_v26  ;;  %v3560_v3 = vadd.f32 %v3559_v8, %v3367_v1  ;;  %v4640_v1 = vld [vmem:[%s5024_s29 + $0x1b8] sm:$0xff]  ;;  %v3396_v26 = vpop.f32.mrf.mxu0 }
 0x39c   : > { %v3561_v31 = vpop.f32.mrf.mxu1  ;;  %v3389_v15 = vadd.f32 %v3388_v6, %v3196_v38  ;;  %v3391_v25 = vadd.f32 %v3390_v59, %v3198_v55  ;;  %v6912_v6 = vld [vmem:[#allocation57_spill] sm:$0xff]  ;;  %v6914_v59 = vld [vmem:[#allocation60_spill] sm:$0xff] }
 0x39d   : > { %3708 = vst [vmem:[%s6376_s14 + $0x180] sm:$0xff] %v3644_v30  ;;  %v3645_v22 = vadd.f32 %v4634_v9, %v3560_v3  ;;  %v3562_v5 = vadd.f32 %v3561_v31, %v3369_v35  ;;  %v4641_v35 = vld [vmem:[%s5024_s29 + $0x1c0] sm:$0xff]  ;;  %v3202_v31 = vadd.f32 %v6911_v46, %v6342_v47 }
 0x39e   : > { %v3563_v61 = vpop.f32.mrf.mxu1 }
 0x39f   : > { %3709 = vst [vmem:[%s6376_s14 + $0x188] sm:$0xff] %v3645_v22  ;;  %v3646_v29 = vadd.f32 %v4635_v44, %v3562_v5  ;;  %v3564_v7 = vadd.f32 %v3563_v61, %v3371_v57  ;;  %v3398_v22 = vpop.f32.mrf.mxu0  ;;  %v3204_v61 = vadd.f32 %v6912_v6, %v6349_v32  ;;  %v3395_v40 = vadd.f32 %v3394_v20, %v3202_v31 }
 0x3a0   : > { %v3567_v18 = vpop.f32.mrf.mxu1 }
 0x3a1   : > { %3710 = vst [vmem:[%s6376_s14 + $0x190] sm:$0xff] %v3646_v29  ;;  %v3647_v45 = vadd.f32 %v4636_v56, %v3564_v7  ;;  %v3568_v0 = vadd.f32 %v3567_v18, %v3375_v49  ;;  %v6913_v7 = vld [vmem:[#allocation59_spill] sm:$0xff]  ;;  %v3397_v12 = vadd.f32 %v3396_v26, %v3204_v61 }
 0x3a2   : > { %v3569_v42 = vpop.f32.mrf.mxu1  ;;  %v3206_v18 = vadd.f32 %v6913_v7, %v6342_v47 }
 0x3a3   : > { %3711 = vst [vmem:[%s6376_s14 + $0x198] sm:$0xff] %v3647_v45  ;;  %v3648_v11 = vadd.f32 %v4637_v4, %v3568_v0  ;;  %v3570_v21 = vadd.f32 %v3569_v42, %v3377_v37  ;;  %v3400_v45 = vpop.f32.mrf.mxu0  ;;  %v3208_v42 = vadd.f32 %v6914_v59, %v6349_v32 }
 0x3a4   : > { %v3571_v28 = vpop.f32.mrf.mxu1  ;;  %v3399_v53 = vadd.f32 %v3398_v22, %v3206_v18 }
 0x3a5   : > { %3712 = vst [vmem:[%s6376_s14 + $0x1a0] sm:$0xff] %v3648_v11  ;;  %v3649_v2 = vadd.f32 %v4638_v63, %v3570_v21  ;;  %v3572_v34 = vadd.f32 %v3571_v28, %v3379_v13  ;;  %v3401_v11 = vadd.f32 %v3400_v45, %v3208_v42  ;;  %v4646_v21 = vld [vmem:[%s5024_s29 + $0x1e8] sm:$0xff] }
 0x3a6   : > { %v3573_v33 = vpop.f32.mrf.mxu1 }
 0x3a7   : > { %3713 = vst [vmem:[%s6376_s14 + $0x1a8] sm:$0xff] %v3649_v2  ;;  %v3650_v60 = vadd.f32 %v4639_v24, %v3572_v34  ;;  %v3574_v27 = vadd.f32 %v3573_v33, %v3381_v50  ;;  %v4648_v2 = vld [vmem:[%s5024_s29 + $0x1f8] sm:$0xff] }
 0x3a8   : > { %v3577_v23 = vpop.f32.mrf.mxu1 }
 0x3a9   : > { %3714 = vst [vmem:[%s6376_s14 + $0x1b0] sm:$0xff] %v3650_v60  ;;  %v3651_v54 = vadd.f32 %v4640_v1, %v3574_v27  ;;  %v3578_v14 = vadd.f32 %v3577_v23, %v3385_v10 }
 0x3aa   : > { %v3579_v8 = vpop.f32.mrf.mxu1 }
 0x3ab   : > { %3715 = vst [vmem:[%s6376_s14 + $0x1b8] sm:$0xff] %v3651_v54  ;;  %v3652_v16 = vadd.f32 %v4641_v35, %v3578_v14  ;;  %v3580_v30 = vadd.f32 %v3579_v8, %v3387_v36 }
 0x3ac   : > { %v3581_v3 = vpop.f32.mrf.mxu1 }
 0x3ad   : > { %3716 = vst [vmem:[%s6376_s14 + $0x1c0] sm:$0xff] %v3652_v16  ;;  %v3653_v57 = vadd.f32 %v4642_v62, %v3580_v30  ;;  %v3582_v9 = vadd.f32 %v3581_v3, %v3389_v15 }
 0x3ae   : > { %v3583_v5 = vpop.f32.mrf.mxu1 }
 0x3af   : > { %3717 = vst [vmem:[%s6376_s14 + $0x1c8] sm:$0xff] %v3653_v57  ;;  %v3654_v49 = vadd.f32 %v4643_v19, %v3582_v9  ;;  %v3584_v44 = vadd.f32 %v3583_v5, %v3391_v25 }
 0x3b0   : > { %v3587_v29 = vpop.f32.mrf.mxu1 }
 0x3b1   : > { %3718 = vst [vmem:[%s6376_s14 + $0x1d0] sm:$0xff] %v3654_v49  ;;  %v3655_v37 = vadd.f32 %v4644_v17, %v3584_v44  ;;  %v3588_v56 = vadd.f32 %v3587_v29, %v3395_v40 }
 0x3b2   : > { %v3589_v0 = vpop.f32.mrf.mxu1 }
 0x3b3   : > { %3719 = vst [vmem:[%s6376_s14 + $0x1d8] sm:$0xff] %v3655_v37  ;;  %v3656_v47 = vadd.f32 %v4645_v51, %v3588_v56  ;;  %v3590_v13 = vadd.f32 %v3589_v0, %v3397_v12 }
 0x3b4   : > { %v3591_v4 = vpop.f32.mrf.mxu1 }
 0x3b5   : > { %3720 = vst [vmem:[%s6376_s14 + $0x1e0] sm:$0xff] %v3656_v47  ;;  %v3657_v28 = vadd.f32 %v4646_v21, %v3590_v13  ;;  %v3592_v52 = vadd.f32 %v3591_v4, %v3399_v53 }
 0x3b6   : > { %v3593_v32 = vpop.f32.mrf.mxu1 }
 0x3b7   : > { %3721 = vst [vmem:[%s6376_s14 + $0x1e8] sm:$0xff] %v3657_v28  ;;  %v3658_v50 = vadd.f32 %v4647_v43, %v3592_v52  ;;  %v3594_v63 = vadd.f32 %v3593_v32, %v3401_v11 }
 0x3b9   : > { %3722 = vst [vmem:[%s6376_s14 + $0x1f0] sm:$0xff] %v3658_v50  ;;  %v3659_v34 = vadd.f32 %v4648_v2, %v3594_v63 }
 0x3bb   : > { %3723 = vst [vmem:[%s6376_s14 + $0x1f8] sm:$0xff] %v3659_v34 }
 0x3bc   : > { %4768 = shalt.err (!%p4765_p3)
}
 0x3bd   : > { %s4769_s29 = scalar_lea.hbm %s6724_s1, 8192  ;;  %s4773_s15 = scalar_lea.hbm %s6779_s7, 16384 }
 0x3be   : > { %p4770_p2 = scmp.ne.s32.totalorder %s6724_s1, %s4769_s29  ;;  %p4774_p5 = scmp.lt.s32.totalorder %s6724_s1, %s6779_s7 }
 0x3bf   : > { %p4775_p4 = scmp.lt.s32.totalorder %s4773_s15, %s4769_s29 }
 0x3c0   : > { %p4771_p9 = pnand %p4770_p2, %p6915_p12 }
 0x3c1   : > { %p4776_p6 = por %p4775_p4, %p4774_p5 }
 0x3c2   : > { %p4772_p11 = pneg %p4771_p9 }
 0x3c4   : > { %p4777_p8 = pnand %p4776_p6, %p4772_p11 }
 0x3c6   : > { %4780 = shalt.err (!%p4777_p8)
}
 0x3c7   : > { %s4841_s18 = smov 256   ;;  %s4842_s22 = smov 16  }
 0x3c8   : > { %4153 = dma.vmem_to_hbm [thread:$0]  (%p6915_p12), %s6726_s19, 8192, %s6724_s1, %s3725_s28, %s4841_s18, %s4841_s18, %s4842_s22  }
 0x3c9 PF: > { %s3754_s23 = sand.u32 1, %s4815_s24   ;;  %p6916_p7 = scmp.ne.s32.totalorder %s6792_s8, 0 }
 0x3ca   : > { %p6917_p10 = scmp.ge.s32.totalorder %s4827_s27, 2  ;;  %s3755_s30 = scalar_lea.sflag [#allocation4], %s3754_s23 }
 0x3cc   : > { %p4170_p13 = pnand %p6917_p10, %p6916_p7 }
 0x3ce   : > { %p4171_p0 = pneg %p4170_p13 }
 0x3d0   : > { %4810 = dma.done.wait (%p4171_p0), %s3755_s30, 8192  }
 0x3d1   : > { %4812 = vsyncadd (%p4171_p0), %s3755_s30, 4294959104  ;;  %p22_p1 = scmp.ge.s32.totalorder %s4963_s17, 4   ;;  %s6918_s24 = smov %s4819_s25 }
 0x3d2   : > { %s6919_s25 = smov %s4823_s26  ;;  %s6920_s26 = smov %s4973_s20 }
 0x3d3   : > { %s6921_s27 = smov %s4963_s17  ;;  %24 = sbr.rel (!%p22_p1) target bundleno = 9 (0x9), region = 105 }
 0x3d8   :  { %3760 = vsyncpa [#allocation3], 1 }
 0x3d9   :  { %3762 = vsyncpa [#allocation3 + $0x1], 1 }
 0x3da   :  { %3763 = vsyncpa [#allocation6], 1 }
 0x3db   :  { %3764 = vsyncpa [#allocation9], 1 }
 0x3dc   :  { %3765 = vsyncpa [#allocation4], 1 }
 0x3dd   :  { %3767 = vsyncpa [#allocation4 + $0x1], 1 }

</bundles_post_ra>
